<compile_context>
chip_gen: v7x
topology: tpu7x:2x2x1
jax: 0.10.0
libtpu: 0.0.40
codegen_flags: <defaults>
</compile_context>

<pallas_src>
import functools
import math

import jax
import jax.numpy as jnp
from jax.experimental import pallas as pl
from jax.experimental.pallas import tpu as pltpu

# ----------------------------- config (small) -------------------------------
B = 2                 # batch
L = 8                 # DEFAULT_SENTENCE_LEN
H = 128               # roberta hidden size (768 in the real model, scaled down)
NUM_HEADS = 4
HEAD_DIM = H // NUM_HEADS
FFN = 256             # intermediate size
NUM_LAYERS = 2
VOCAB = 100
TYPE_VOCAB = 2
MAX_POS = 64
PAD_IDX = 1           # roberta padding_idx
POS_TAGS_COUNT = 12
POS_EMB_SIZE = 30     # model_config['POS_EMBEDDINGS_SIZE']
NER_DICT_COUNT = 9
LN_EPS = 1e-5

NER_X_FEATURES = POS_EMB_SIZE + 1 + 1     # numbers + upcase + pos-tag embedding
NER_OUT_PAD = 128                         # lane-dense padded output tile for the head
NEG_INF = -1e9


# ------------------------------- helpers ------------------------------------
def _ln(x, g, b, eps):
    """Row-wise LayerNorm over the last (lane) dim, f32 math."""
    mu = jnp.mean(x, axis=-1, keepdims=True)
    var = jnp.mean(jnp.square(x - mu), axis=-1, keepdims=True)
    return (x - mu) * jax.lax.rsqrt(var + eps) * g + b


def _matmul_nt(x, w):
    """y = x @ w.T (PyTorch nn.Linear convention), bf16 operands, f32 accumulate."""
    return jax.lax.dot_general(
        x.astype(jnp.bfloat16), w.astype(jnp.bfloat16),
        (((1,), (1,)), ((), ())),
        preferred_element_type=jnp.float32,
    )


# --------------------- single fused forward kernel ---------------------------
def _fused_kernel(x_emb_ref, bias_ref, emb_g_ref, emb_b_ref,
                  wqkv_ref, bqkv_ref, wo_ref, bo_ref,
                  ln1_g_ref, ln1_b_ref, w1_ref, b1_ref,
                  w2_ref, b2_ref, ln2_g_ref, ln2_b_ref,
                  xfeat_ref, nw_h_ref, nw_x_ref, ng_ref, nb_ref,
                  logits_ref,
                  *, num_layers, num_heads, head_dim, eps, n_valid):
    hidden = num_heads * head_dim
    scale = 1.0 / math.sqrt(head_dim)

    # --- embedding LayerNorm (layer-0 prologue) ---
    h = _ln(x_emb_ref[...], emb_g_ref[...], emb_b_ref[...], eps)     # (B*L, H) f32

    # Combined additive attention bias (cross-batch block mask + key padding),
    # read once, shared by every head / layer.
    bias = bias_ref[...]                                             # (B*L, B*L) f32

    for layer in range(num_layers):                 # static unroll (tiny model)
        # --- fused QKV projection: one [3H, H] matmul, one bf16 cast ---
        qkv = _matmul_nt(h, wqkv_ref[layer]) + bqkv_ref[layer]       # (B*L, 3H) f32
        qkv_bf = qkv.astype(jnp.bfloat16)

        # --- multi-head attention: 4 head iterations, both batch rows at once,
        #     cross-batch score blocks masked by `bias` ---
        head_ctx = []
        for hd in range(num_heads):
            c0 = hd * head_dim
            q = qkv_bf[:, c0:c0 + head_dim]                          # (B*L, D)
            k = qkv_bf[:, hidden + c0:hidden + c0 + head_dim]
            v = qkv_bf[:, 2 * hidden + c0:2 * hidden + c0 + head_dim]
            s = jax.lax.dot_general(
                q, k, (((1,), (1,)), ((), ())),
                preferred_element_type=jnp.float32) * scale          # (B*L, B*L)
            s = s + bias
            s = s - jnp.max(s, axis=-1, keepdims=True)
            p = jnp.exp(s)
            p = p * pl.reciprocal(jnp.sum(p, axis=-1, keepdims=True), approx=True)
            head_ctx.append(
                jnp.dot(p.astype(jnp.bfloat16), v,
                        preferred_element_type=jnp.float32))         # (B*L, D)
        ctx = jnp.concatenate(head_ctx, axis=-1)                     # (B*L, H)

        # --- output projection + residual + LayerNorm ---
        attn_out = _matmul_nt(ctx, wo_ref[layer]) + bo_ref[layer]
        h = _ln(attn_out + h, ln1_g_ref[layer], ln1_b_ref[layer], eps)

        # --- FFN (tanh gelu -> EUP) + residual + LayerNorm ---
        ff = _matmul_nt(h, w1_ref[layer]) + b1_ref[layer]
        ff = jax.nn.gelu(ff, approximate=True)
        ff = _matmul_nt(ff, w2_ref[layer]) + b2_ref[layer]
        h = _ln(ff + h, ln2_g_ref[layer], ln2_b_ref[layer], eps)

    # --- fused NER head: Linear(no bias) split into hidden + extra-feature
    #     matmuls (no in-kernel lane concat), then LayerNorm over the first
    #     n_valid lanes of the 128-lane padded tile. ---
    y = (jax.lax.dot_general(h.astype(jnp.bfloat16), nw_h_ref[...],
                             (((1,), (1,)), ((), ())),
                             preferred_element_type=jnp.float32)
         + jax.lax.dot_general(xfeat_ref[...].astype(jnp.bfloat16), nw_x_ref[...],
                               (((1,), (1,)), ((), ())),
                               preferred_element_type=jnp.float32))  # (B*L, 128)
    lane = jax.lax.broadcasted_iota(jnp.int32, y.shape, 1)
    valid = lane < n_valid
    inv_n = jnp.float32(1.0 / n_valid)
    mu = jnp.sum(jnp.where(valid, y, 0.0), axis=-1, keepdims=True) * inv_n
    d = jnp.where(valid, y - mu, 0.0)
    var = jnp.sum(d * d, axis=-1, keepdims=True) * inv_n
    logits_ref[...] = ((y - mu) * jax.lax.rsqrt(var + eps)) * ng_ref[...] + nb_ref[...]


def fused_forward(x_emb, attn_bias, extra_feats, params):
    def const_spec(shape):
        return pl.BlockSpec(shape, lambda i: (0,) * len(shape))

    kernel = functools.partial(
        _fused_kernel, num_layers=NUM_LAYERS, num_heads=NUM_HEADS,
        head_dim=HEAD_DIM, eps=LN_EPS, n_valid=NER_DICT_COUNT)

    return pl.pallas_call(
        kernel,
        grid=(1,),
        out_shape=jax.ShapeDtypeStruct((B * L, NER_OUT_PAD), jnp.float32),
        in_specs=[
            const_spec((B * L, H)),                       # summed embeddings
            const_spec((B * L, B * L)),                   # combined attention bias
            const_spec((1, H)), const_spec((1, H)),       # embedding LayerNorm
            const_spec((NUM_LAYERS, 3 * H, H)),           # fused QKV weight (stacked)
            const_spec((NUM_LAYERS, 1, 3 * H)),           # fused QKV bias
            const_spec((NUM_LAYERS, H, H)),               # attn output proj W
            const_spec((NUM_LAYERS, 1, H)),               # attn output proj b
            const_spec((NUM_LAYERS, 1, H)),               # LN1 gamma
            const_spec((NUM_LAYERS, 1, H)),               # LN1 beta
            const_spec((NUM_LAYERS, FFN, H)),             # FFN up W
            const_spec((NUM_LAYERS, 1, FFN)),             # FFN up b
            const_spec((NUM_LAYERS, H, FFN)),             # FFN down W
            const_spec((NUM_LAYERS, 1, H)),               # FFN down b
            const_spec((NUM_LAYERS, 1, H)),               # LN2 gamma
            const_spec((NUM_LAYERS, 1, H)),               # LN2 beta
            const_spec((B * L, NER_X_FEATURES)),          # extra NER features
            const_spec((NER_OUT_PAD, H)),                 # NER W (hidden part)
            const_spec((NER_OUT_PAD, NER_X_FEATURES)),    # NER W (extra part)
            const_spec((1, NER_OUT_PAD)),                 # NER LN gamma (padded)
            const_spec((1, NER_OUT_PAD)),                 # NER LN beta (padded)
        ],
        out_specs=const_spec((B * L, NER_OUT_PAD)),
        compiler_params=pltpu.CompilerParams(
            dimension_semantics=("arbitrary",)),
    )(x_emb, attn_bias,
      params["emb_ln_g"], params["emb_ln_b"],
      params["wqkv"], params["bqkv"], params["wo"], params["bo"],
      params["ln1_g"], params["ln1_b"], params["w1"], params["b1"],
      params["w2"], params["b2"], params["ln2_g"], params["ln2_b"],
      extra_feats,
      params["ner_w_h"], params["ner_w_x"],
      params["ner_ln_g"], params["ner_ln_b"])


# ----------------------------- parameters ------------------------------------
def init_params(key):
    (k_word, k_pos, k_type, k_ptag, k_ner,
     k_qkv, k_wo, k_w1, k_w2) = jax.random.split(key, 9)

    def normal(k, shape, scale=0.02):
        return scale * jax.random.normal(k, shape, jnp.float32)

    params = {
        "word_emb": normal(k_word, (VOCAB, H)).at[PAD_IDX].set(0.0),
        "pos_emb": normal(k_pos, (MAX_POS, H)).at[PAD_IDX].set(0.0),
        "type_emb": normal(k_type, (TYPE_VOCAB, H)),
        "emb_ln_g": jnp.ones((1, H), jnp.float32),
        "emb_ln_b": jnp.zeros((1, H), jnp.float32),
        # pos-tag embedding table of the NER model itself
        "pos_tag_emb": normal(k_ptag, (POS_TAGS_COUNT, POS_EMB_SIZE)),
        # --- stacked per-layer encoder weights (bf16 matmul operands) ---
        "wqkv": normal(k_qkv, (NUM_LAYERS, 3 * H, H)).astype(jnp.bfloat16),
        "bqkv": jnp.zeros((NUM_LAYERS, 1, 3 * H), jnp.float32),
        "wo": normal(k_wo, (NUM_LAYERS, H, H)).astype(jnp.bfloat16),
        "bo": jnp.zeros((NUM_LAYERS, 1, H), jnp.float32),
        "ln1_g": jnp.ones((NUM_LAYERS, 1, H), jnp.float32),
        "ln1_b": jnp.zeros((NUM_LAYERS, 1, H), jnp.float32),
        "w1": normal(k_w1, (NUM_LAYERS, FFN, H)).astype(jnp.bfloat16),
        "b1": jnp.zeros((NUM_LAYERS, 1, FFN), jnp.float32),
        "w2": normal(k_w2, (NUM_LAYERS, H, FFN)).astype(jnp.bfloat16),
        "b2": jnp.zeros((NUM_LAYERS, 1, H), jnp.float32),
        "ln2_g": jnp.ones((NUM_LAYERS, 1, H), jnp.float32),
        "ln2_b": jnp.zeros((NUM_LAYERS, 1, H), jnp.float32),
    }

    # NerHead: Linear(bias=False, in=H+32, out=9) + LayerNorm(9).
    # Weight split into hidden / extra-feature parts and zero-padded to 128
    # output rows (lane-dense head output tile).
    ner_full = normal(k_ner, (NER_DICT_COUNT, H + NER_X_FEATURES))
    nw_h = jnp.zeros((NER_OUT_PAD, H), jnp.float32).at[:NER_DICT_COUNT].set(
        ner_full[:, :H])
    nw_x = jnp.zeros((NER_OUT_PAD, NER_X_FEATURES), jnp.float32).at[:NER_DICT_COUNT].set(
        ner_full[:, H:])
    params["ner_w_h"] = nw_h.astype(jnp.bfloat16)
    params["ner_w_x"] = nw_x.astype(jnp.bfloat16)
    params["ner_ln_g"] = jnp.ones((1, NER_OUT_PAD), jnp.float32)
    params["ner_ln_b"] = jnp.zeros((1, NER_OUT_PAD), jnp.float32)
    return params


# ------------------------------- forward --------------------------------------
def roberta_ner_forward(params, input_ids, token_type_ids, attention_mask,
                        upcase_fracture, numbers_fracture, pos_tags):
    # --- roberta embeddings (gathers are JAX glue; LN runs in the fused kernel) ---
    tok_mask = (input_ids != PAD_IDX).astype(jnp.int32)
    position_ids = jnp.cumsum(tok_mask, axis=1) * tok_mask + PAD_IDX
    x_emb = (params["word_emb"][input_ids]
             + params["pos_emb"][position_ids]
             + params["type_emb"][token_type_ids]).reshape(B * L, H)
    x_emb = x_emb.astype(jnp.float32)

    # Combined additive attention bias (B*L, B*L): keys outside the query's
    # batch element or padded keys get -1e9 (attention is computed with both
    # batch rows packed into one score matmul inside the kernel).
    key_bias = ((1.0 - attention_mask.astype(jnp.float32)) * NEG_INF).reshape(-1)
    groups = jnp.arange(B * L, dtype=jnp.int32) // L
    same_batch = groups[:, None] == groups[None, :]
    attn_bias = jnp.where(same_batch, key_bias[None, :], jnp.float32(NEG_INF))

    # Extra NER-head features: [numbers, upcase, pos_tag_embedding]  (B*L, 32).
    pos_vector = params["pos_tag_emb"][pos_tags]                       # [B, L, 30]
    extra = jnp.concatenate(
        [numbers_fracture.reshape(-1, L, 1),
         upcase_fracture.reshape(-1, L, 1),
         pos_vector], axis=2).reshape(B * L, NER_X_FEATURES).astype(jnp.float32)

    # --- whole model in ONE pallas_call: encoder + feature fusion + NER head ---
    logits = fused_forward(x_emb, attn_bias, extra, params)            # [B*L, 128]

    # TODO(synk): the `labels is not None` branch (external loss_function + .cpu())
    # has no Pallas equivalent here; only the inference path is implemented.
    return logits[:, :NER_DICT_COUNT].reshape(B, L, NER_DICT_COUNT)


# --------------------------------- main ----------------------------------------
if __name__ == "__main__":
    root = jax.random.PRNGKey(0)
    pkey, dkey = jax.random.split(root)
    params = init_params(pkey)

    k1, k2, k3, k4 = jax.random.split(dkey, 4)
    input_ids = jax.random.randint(k1, (B, L), 2, VOCAB, dtype=jnp.int32)
    token_type_ids = jnp.zeros((B, L), jnp.int32)
    attention_mask = jnp.ones((B, L), jnp.int32)
    upcase_fracture = jax.random.uniform(k2, (B, L), jnp.float32)
    numbers_fracture = jax.random.uniform(k3, (B, L), jnp.float32)
    pos_tags = jax.random.randint(k4, (B, L), 0, POS_TAGS_COUNT, dtype=jnp.int32)

    fwd = jax.jit(roberta_ner_forward)
    out = fwd(params, input_ids, token_type_ids, attention_mask,
              upcase_fracture, numbers_fracture, pos_tags)
    out = jax.block_until_ready(out)
    assert out.shape == (B, L, NER_DICT_COUNT), out.shape
    assert bool(jnp.all(jnp.isfinite(out)))
    print("KERNEL_OK")
</pallas_src>

<mosaic_0001>
module attributes {stable_mosaic.version = 11 : i64} {
  func.func @_fused_kernel(%arg0: i32, %arg1: memref<16x128xf32, #tpu.memory_space<vmem>>, %arg2: memref<16x16xf32, #tpu.memory_space<vmem>>, %arg3: memref<1x128xf32, #tpu.memory_space<vmem>>, %arg4: memref<1x128xf32, #tpu.memory_space<vmem>>, %arg5: memref<2x384x128xbf16, #tpu.memory_space<vmem>>, %arg6: memref<2x1x384xf32, #tpu.memory_space<vmem>>, %arg7: memref<2x128x128xbf16, #tpu.memory_space<vmem>>, %arg8: memref<2x1x128xf32, #tpu.memory_space<vmem>>, %arg9: memref<2x1x128xf32, #tpu.memory_space<vmem>>, %arg10: memref<2x1x128xf32, #tpu.memory_space<vmem>>, %arg11: memref<2x256x128xbf16, #tpu.memory_space<vmem>>, %arg12: memref<2x1x256xf32, #tpu.memory_space<vmem>>, %arg13: memref<2x128x256xbf16, #tpu.memory_space<vmem>>, %arg14: memref<2x1x128xf32, #tpu.memory_space<vmem>>, %arg15: memref<2x1x128xf32, #tpu.memory_space<vmem>>, %arg16: memref<2x1x128xf32, #tpu.memory_space<vmem>>, %arg17: memref<16x32xf32, #tpu.memory_space<vmem>>, %arg18: memref<128x128xbf16, #tpu.memory_space<vmem>>, %arg19: memref<128x32xbf16, #tpu.memory_space<vmem>>, %arg20: memref<1x128xf32, #tpu.memory_space<vmem>>, %arg21: memref<1x128xf32, #tpu.memory_space<vmem>>, %arg22: memref<16x128xf32, #tpu.memory_space<vmem>>) attributes {dimension_semantics = [#tpu.dimension_semantics<arbitrary>], iteration_bounds = array<i64: 1>, scalar_prefetch = 0 : i64, scratch_operands = 0 : i64, tpu.core_type = #tpu.core_type<tc>, window_params = [{pipeline_mode = #tpu.pipeline_mode<synchronous>, transform_indices = @transform_0, window_bounds = array<i64: 16, 128>}, {pipeline_mode = #tpu.pipeline_mode<synchronous>, transform_indices = @transform_1, window_bounds = array<i64: 16, 16>}, {pipeline_mode = #tpu.pipeline_mode<synchronous>, transform_indices = @transform_2, window_bounds = array<i64: 1, 128>}, {pipeline_mode = #tpu.pipeline_mode<synchronous>, transform_indices = @transform_3, window_bounds = array<i64: 1, 128>}, {pipeline_mode = #tpu.pipeline_mode<synchronous>, transform_indices = @transform_4, window_bounds = array<i64: 2, 384, 128>}, {pipeline_mode = #tpu.pipeline_mode<synchronous>, transform_indices = @transform_5, window_bounds = array<i64: 2, 1, 384>}, {pipeline_mode = #tpu.pipeline_mode<synchronous>, transform_indices = @transform_6, window_bounds = array<i64: 2, 128, 128>}, {pipeline_mode = #tpu.pipeline_mode<synchronous>, transform_indices = @transform_7, window_bounds = array<i64: 2, 1, 128>}, {pipeline_mode = #tpu.pipeline_mode<synchronous>, transform_indices = @transform_8, window_bounds = array<i64: 2, 1, 128>}, {pipeline_mode = #tpu.pipeline_mode<synchronous>, transform_indices = @transform_9, window_bounds = array<i64: 2, 1, 128>}, {pipeline_mode = #tpu.pipeline_mode<synchronous>, transform_indices = @transform_10, window_bounds = array<i64: 2, 256, 128>}, {pipeline_mode = #tpu.pipeline_mode<synchronous>, transform_indices = @transform_11, window_bounds = array<i64: 2, 1, 256>}, {pipeline_mode = #tpu.pipeline_mode<synchronous>, transform_indices = @transform_12, window_bounds = array<i64: 2, 128, 256>}, {pipeline_mode = #tpu.pipeline_mode<synchronous>, transform_indices = @transform_13, window_bounds = array<i64: 2, 1, 128>}, {pipeline_mode = #tpu.pipeline_mode<synchronous>, transform_indices = @transform_14, window_bounds = array<i64: 2, 1, 128>}, {pipeline_mode = #tpu.pipeline_mode<synchronous>, transform_indices = @transform_15, window_bounds = array<i64: 2, 1, 128>}, {pipeline_mode = #tpu.pipeline_mode<synchronous>, transform_indices = @transform_16, window_bounds = array<i64: 16, 32>}, {pipeline_mode = #tpu.pipeline_mode<synchronous>, transform_indices = @transform_17, window_bounds = array<i64: 128, 128>}, {pipeline_mode = #tpu.pipeline_mode<synchronous>, transform_indices = @transform_18, window_bounds = array<i64: 128, 32>}, {pipeline_mode = #tpu.pipeline_mode<synchronous>, transform_indices = @transform_19, window_bounds = array<i64: 1, 128>}, {pipeline_mode = #tpu.pipeline_mode<synchronous>, transform_indices = @transform_20, window_bounds = array<i64: 1, 128>}, {pipeline_mode = #tpu.pipeline_mode<synchronous>, transform_indices = @transform_21, window_bounds = array<i64: 16, 128>}]} {
    %c0 = arith.constant 0 : index
    %c0_0 = arith.constant 0 : index
    %0 = vector.load %arg1[%c0, %c0_0] : memref<16x128xf32, #tpu.memory_space<vmem>>, vector<16x128xf32>
    %c0_1 = arith.constant 0 : index
    %c0_2 = arith.constant 0 : index
    %1 = vector.load %arg3[%c0_1, %c0_2] : memref<1x128xf32, #tpu.memory_space<vmem>>, vector<1x128xf32>
    %c0_3 = arith.constant 0 : index
    %c0_4 = arith.constant 0 : index
    %2 = vector.load %arg4[%c0_3, %c0_4] : memref<1x128xf32, #tpu.memory_space<vmem>>, vector<1x128xf32>
    %cst = arith.constant dense<0.000000e+00> : vector<16xf32>
    %3 = vector.multi_reduction <add>, %0, %cst [1] : vector<16x128xf32> to vector<16xf32>
    %4 = vector.shape_cast %3 : vector<16xf32> to vector<16x1xf32>
    %cst_5 = arith.constant 1.280000e+02 : f32
    %5 = vector.broadcast %cst_5 : f32 to vector<16x1xf32>
    %6 = arith.divf %4, %5 : vector<16x1xf32>
    %7 = vector.broadcast %6 : vector<16x1xf32> to vector<16x128xf32>
    %8 = arith.subf %0, %7 : vector<16x128xf32>
    %9 = arith.mulf %8, %8 : vector<16x128xf32>
    %cst_6 = arith.constant dense<0.000000e+00> : vector<16xf32>
    %10 = vector.multi_reduction <add>, %9, %cst_6 [1] : vector<16x128xf32> to vector<16xf32>
    %11 = vector.shape_cast %10 : vector<16xf32> to vector<16x1xf32>
    %cst_7 = arith.constant 1.280000e+02 : f32
    %12 = vector.broadcast %cst_7 : f32 to vector<16x1xf32>
    %13 = arith.divf %11, %12 : vector<16x1xf32>
    %14 = vector.broadcast %6 : vector<16x1xf32> to vector<16x128xf32>
    %15 = arith.subf %0, %14 : vector<16x128xf32>
    %cst_8 = arith.constant 9.99999974E-6 : f32
    %16 = vector.broadcast %cst_8 : f32 to vector<16x1xf32>
    %17 = arith.addf %13, %16 : vector<16x1xf32>
    %18 = math.rsqrt %17 : vector<16x1xf32>
    %19 = vector.broadcast %18 : vector<16x1xf32> to vector<16x128xf32>
    %20 = arith.mulf %15, %19 : vector<16x128xf32>
    %21 = vector.broadcast %1 : vector<1x128xf32> to vector<16x128xf32>
    %22 = arith.mulf %20, %21 : vector<16x128xf32>
    %23 = vector.broadcast %2 : vector<1x128xf32> to vector<16x128xf32>
    %24 = arith.addf %22, %23 : vector<16x128xf32>
    %c0_9 = arith.constant 0 : index
    %c0_10 = arith.constant 0 : index
    %25 = vector.load %arg2[%c0_9, %c0_10] : memref<16x16xf32, #tpu.memory_space<vmem>>, vector<16x16xf32>
    %c0_11 = arith.constant 0 : index
    %c0_12 = arith.constant 0 : index
    %c0_13 = arith.constant 0 : index
    %26 = vector.load %arg5[%c0_11, %c0_12, %c0_13] : memref<2x384x128xbf16, #tpu.memory_space<vmem>>, vector<1x384x128xbf16>
    %27 = vector.shape_cast %26 : vector<1x384x128xbf16> to vector<384x128xbf16>
    %28 = arith.truncf %24 : vector<16x128xf32> to vector<16x128xbf16>
    %cst_14 = arith.constant dense<0.000000e+00> : vector<16x384xf32>
    %29 = tpu.matmul %28, %27, %cst_14 {dimension_numbers = #tpu.dot_dimension_numbers<[1], [1], [0], [0], [0, 0, 1, 0], [], []>} : vector<16x128xbf16>, vector<384x128xbf16>, vector<16x384xf32> -> vector<16x384xf32>
    %c0_15 = arith.constant 0 : index
    %c0_16 = arith.constant 0 : index
    %c0_17 = arith.constant 0 : index
    %30 = vector.load %arg6[%c0_15, %c0_16, %c0_17] : memref<2x1x384xf32, #tpu.memory_space<vmem>>, vector<1x1x384xf32>
    %31 = vector.shape_cast %30 : vector<1x1x384xf32> to vector<1x384xf32>
    %32 = vector.broadcast %31 : vector<1x384xf32> to vector<16x384xf32>
    %33 = arith.addf %29, %32 : vector<16x384xf32>
    %34 = arith.truncf %33 : vector<16x384xf32> to vector<16x384xbf16>
    %35 = vector.extract_strided_slice %34 {offsets = [0, 0], sizes = [16, 32], strides = [1, 1]} : vector<16x384xbf16> to vector<16x32xbf16>
    %36 = vector.extract_strided_slice %34 {offsets = [0, 128], sizes = [16, 32], strides = [1, 1]} : vector<16x384xbf16> to vector<16x32xbf16>
    %37 = vector.extract_strided_slice %34 {offsets = [0, 256], sizes = [16, 32], strides = [1, 1]} : vector<16x384xbf16> to vector<16x32xbf16>
    %cst_18 = arith.constant dense<0.000000e+00> : vector<16x16xf32>
    %38 = tpu.matmul %35, %36, %cst_18 {dimension_numbers = #tpu.dot_dimension_numbers<[1], [1], [0], [0], [0, 0, 1, 0], [], []>} : vector<16x32xbf16>, vector<16x32xbf16>, vector<16x16xf32> -> vector<16x16xf32>
    %cst_19 = arith.constant 0.176776692 : f32
    %39 = vector.broadcast %cst_19 : f32 to vector<16x16xf32>
    %40 = arith.mulf %38, %39 : vector<16x16xf32>
    %41 = arith.addf %40, %25 : vector<16x16xf32>
    %cst_20 = arith.constant dense<0xFF800000> : vector<16xf32>
    %42 = vector.multi_reduction <maximumf>, %41, %cst_20 [1] : vector<16x16xf32> to vector<16xf32>
    %43 = vector.shape_cast %42 : vector<16xf32> to vector<16x1xf32>
    %44 = vector.broadcast %43 : vector<16x1xf32> to vector<16x16xf32>
    %45 = arith.subf %41, %44 : vector<16x16xf32>
    %46 = math.exp %45 : vector<16x16xf32>
    %cst_21 = arith.constant dense<0.000000e+00> : vector<16xf32>
    %47 = vector.multi_reduction <add>, %46, %cst_21 [1] : vector<16x16xf32> to vector<16xf32>
    %48 = vector.shape_cast %47 : vector<16xf32> to vector<16x1xf32>
    %49 = tpu.reciprocal %48 {approx = true} : vector<16x1xf32> -> vector<16x1xf32>
    %50 = vector.broadcast %49 : vector<16x1xf32> to vector<16x16xf32>
    %51 = arith.mulf %46, %50 : vector<16x16xf32>
    %52 = arith.truncf %51 : vector<16x16xf32> to vector<16x16xbf16>
    %cst_22 = arith.constant dense<0.000000e+00> : vector<16x32xf32>
    %53 = tpu.matmul %52, %37, %cst_22 {dimension_numbers = #tpu.dot_dimension_numbers<[1], [0], [0], [1], [0, 0, 1, 1], [], []>} : vector<16x16xbf16>, vector<16x32xbf16>, vector<16x32xf32> -> vector<16x32xf32>
    %54 = vector.extract_strided_slice %34 {offsets = [0, 32], sizes = [16, 32], strides = [1, 1]} : vector<16x384xbf16> to vector<16x32xbf16>
    %55 = vector.extract_strided_slice %34 {offsets = [0, 160], sizes = [16, 32], strides = [1, 1]} : vector<16x384xbf16> to vector<16x32xbf16>
    %56 = vector.extract_strided_slice %34 {offsets = [0, 288], sizes = [16, 32], strides = [1, 1]} : vector<16x384xbf16> to vector<16x32xbf16>
    %cst_23 = arith.constant dense<0.000000e+00> : vector<16x16xf32>
    %57 = tpu.matmul %54, %55, %cst_23 {dimension_numbers = #tpu.dot_dimension_numbers<[1], [1], [0], [0], [0, 0, 1, 0], [], []>} : vector<16x32xbf16>, vector<16x32xbf16>, vector<16x16xf32> -> vector<16x16xf32>
    %cst_24 = arith.constant 0.176776692 : f32
    %58 = vector.broadcast %cst_24 : f32 to vector<16x16xf32>
    %59 = arith.mulf %57, %58 : vector<16x16xf32>
    %60 = arith.addf %59, %25 : vector<16x16xf32>
    %cst_25 = arith.constant dense<0xFF800000> : vector<16xf32>
    %61 = vector.multi_reduction <maximumf>, %60, %cst_25 [1] : vector<16x16xf32> to vector<16xf32>
    %62 = vector.shape_cast %61 : vector<16xf32> to vector<16x1xf32>
    %63 = vector.broadcast %62 : vector<16x1xf32> to vector<16x16xf32>
    %64 = arith.subf %60, %63 : vector<16x16xf32>
    %65 = math.exp %64 : vector<16x16xf32>
    %cst_26 = arith.constant dense<0.000000e+00> : vector<16xf32>
    %66 = vector.multi_reduction <add>, %65, %cst_26 [1] : vector<16x16xf32> to vector<16xf32>
    %67 = vector.shape_cast %66 : vector<16xf32> to vector<16x1xf32>
    %68 = tpu.reciprocal %67 {approx = true} : vector<16x1xf32> -> vector<16x1xf32>
    %69 = vector.broadcast %68 : vector<16x1xf32> to vector<16x16xf32>
    %70 = arith.mulf %65, %69 : vector<16x16xf32>
    %71 = arith.truncf %70 : vector<16x16xf32> to vector<16x16xbf16>
    %cst_27 = arith.constant dense<0.000000e+00> : vector<16x32xf32>
    %72 = tpu.matmul %71, %56, %cst_27 {dimension_numbers = #tpu.dot_dimension_numbers<[1], [0], [0], [1], [0, 0, 1, 1], [], []>} : vector<16x16xbf16>, vector<16x32xbf16>, vector<16x32xf32> -> vector<16x32xf32>
    %73 = vector.extract_strided_slice %34 {offsets = [0, 64], sizes = [16, 32], strides = [1, 1]} : vector<16x384xbf16> to vector<16x32xbf16>
    %74 = vector.extract_strided_slice %34 {offsets = [0, 192], sizes = [16, 32], strides = [1, 1]} : vector<16x384xbf16> to vector<16x32xbf16>
    %75 = vector.extract_strided_slice %34 {offsets = [0, 320], sizes = [16, 32], strides = [1, 1]} : vector<16x384xbf16> to vector<16x32xbf16>
    %cst_28 = arith.constant dense<0.000000e+00> : vector<16x16xf32>
    %76 = tpu.matmul %73, %74, %cst_28 {dimension_numbers = #tpu.dot_dimension_numbers<[1], [1], [0], [0], [0, 0, 1, 0], [], []>} : vector<16x32xbf16>, vector<16x32xbf16>, vector<16x16xf32> -> vector<16x16xf32>
    %cst_29 = arith.constant 0.176776692 : f32
    %77 = vector.broadcast %cst_29 : f32 to vector<16x16xf32>
    %78 = arith.mulf %76, %77 : vector<16x16xf32>
    %79 = arith.addf %78, %25 : vector<16x16xf32>
    %cst_30 = arith.constant dense<0xFF800000> : vector<16xf32>
    %80 = vector.multi_reduction <maximumf>, %79, %cst_30 [1] : vector<16x16xf32> to vector<16xf32>
    %81 = vector.shape_cast %80 : vector<16xf32> to vector<16x1xf32>
    %82 = vector.broadcast %81 : vector<16x1xf32> to vector<16x16xf32>
    %83 = arith.subf %79, %82 : vector<16x16xf32>
    %84 = math.exp %83 : vector<16x16xf32>
    %cst_31 = arith.constant dense<0.000000e+00> : vector<16xf32>
    %85 = vector.multi_reduction <add>, %84, %cst_31 [1] : vector<16x16xf32> to vector<16xf32>
    %86 = vector.shape_cast %85 : vector<16xf32> to vector<16x1xf32>
    %87 = tpu.reciprocal %86 {approx = true} : vector<16x1xf32> -> vector<16x1xf32>
    %88 = vector.broadcast %87 : vector<16x1xf32> to vector<16x16xf32>
    %89 = arith.mulf %84, %88 : vector<16x16xf32>
    %90 = arith.truncf %89 : vector<16x16xf32> to vector<16x16xbf16>
    %cst_32 = arith.constant dense<0.000000e+00> : vector<16x32xf32>
    %91 = tpu.matmul %90, %75, %cst_32 {dimension_numbers = #tpu.dot_dimension_numbers<[1], [0], [0], [1], [0, 0, 1, 1], [], []>} : vector<16x16xbf16>, vector<16x32xbf16>, vector<16x32xf32> -> vector<16x32xf32>
    %92 = vector.extract_strided_slice %34 {offsets = [0, 96], sizes = [16, 32], strides = [1, 1]} : vector<16x384xbf16> to vector<16x32xbf16>
    %93 = vector.extract_strided_slice %34 {offsets = [0, 224], sizes = [16, 32], strides = [1, 1]} : vector<16x384xbf16> to vector<16x32xbf16>
    %94 = vector.extract_strided_slice %34 {offsets = [0, 352], sizes = [16, 32], strides = [1, 1]} : vector<16x384xbf16> to vector<16x32xbf16>
    %cst_33 = arith.constant dense<0.000000e+00> : vector<16x16xf32>
    %95 = tpu.matmul %92, %93, %cst_33 {dimension_numbers = #tpu.dot_dimension_numbers<[1], [1], [0], [0], [0, 0, 1, 0], [], []>} : vector<16x32xbf16>, vector<16x32xbf16>, vector<16x16xf32> -> vector<16x16xf32>
    %cst_34 = arith.constant 0.176776692 : f32
    %96 = vector.broadcast %cst_34 : f32 to vector<16x16xf32>
    %97 = arith.mulf %95, %96 : vector<16x16xf32>
    %98 = arith.addf %97, %25 : vector<16x16xf32>
    %cst_35 = arith.constant dense<0xFF800000> : vector<16xf32>
    %99 = vector.multi_reduction <maximumf>, %98, %cst_35 [1] : vector<16x16xf32> to vector<16xf32>
    %100 = vector.shape_cast %99 : vector<16xf32> to vector<16x1xf32>
    %101 = vector.broadcast %100 : vector<16x1xf32> to vector<16x16xf32>
    %102 = arith.subf %98, %101 : vector<16x16xf32>
    %103 = math.exp %102 : vector<16x16xf32>
    %cst_36 = arith.constant dense<0.000000e+00> : vector<16xf32>
    %104 = vector.multi_reduction <add>, %103, %cst_36 [1] : vector<16x16xf32> to vector<16xf32>
    %105 = vector.shape_cast %104 : vector<16xf32> to vector<16x1xf32>
    %106 = tpu.reciprocal %105 {approx = true} : vector<16x1xf32> -> vector<16x1xf32>
    %107 = vector.broadcast %106 : vector<16x1xf32> to vector<16x16xf32>
    %108 = arith.mulf %103, %107 : vector<16x16xf32>
    %109 = arith.truncf %108 : vector<16x16xf32> to vector<16x16xbf16>
    %cst_37 = arith.constant dense<0.000000e+00> : vector<16x32xf32>
    %110 = tpu.matmul %109, %94, %cst_37 {dimension_numbers = #tpu.dot_dimension_numbers<[1], [0], [0], [1], [0, 0, 1, 1], [], []>} : vector<16x16xbf16>, vector<16x32xbf16>, vector<16x32xf32> -> vector<16x32xf32>
    %111 = tpu.concatenate %53, %72, %91, %110 in 1 : vector<16x32xf32>, vector<16x32xf32>, vector<16x32xf32>, vector<16x32xf32> -> vector<16x128xf32>
    %c0_38 = arith.constant 0 : index
    %c0_39 = arith.constant 0 : index
    %c0_40 = arith.constant 0 : index
    %112 = vector.load %arg7[%c0_38, %c0_39, %c0_40] : memref<2x128x128xbf16, #tpu.memory_space<vmem>>, vector<1x128x128xbf16>
    %113 = vector.shape_cast %112 : vector<1x128x128xbf16> to vector<128x128xbf16>
    %114 = arith.truncf %111 : vector<16x128xf32> to vector<16x128xbf16>
    %cst_41 = arith.constant dense<0.000000e+00> : vector<16x128xf32>
    %115 = tpu.matmul %114, %113, %cst_41 {dimension_numbers = #tpu.dot_dimension_numbers<[1], [1], [0], [0], [0, 0, 1, 0], [], []>} : vector<16x128xbf16>, vector<128x128xbf16>, vector<16x128xf32> -> vector<16x128xf32>
    %c0_42 = arith.constant 0 : index
    %c0_43 = arith.constant 0 : index
    %c0_44 = arith.constant 0 : index
    %116 = vector.load %arg8[%c0_42, %c0_43, %c0_44] : memref<2x1x128xf32, #tpu.memory_space<vmem>>, vector<1x1x128xf32>
    %117 = vector.shape_cast %116 : vector<1x1x128xf32> to vector<1x128xf32>
    %118 = vector.broadcast %117 : vector<1x128xf32> to vector<16x128xf32>
    %119 = arith.addf %115, %118 : vector<16x128xf32>
    %120 = arith.addf %119, %24 : vector<16x128xf32>
    %c0_45 = arith.constant 0 : index
    %c0_46 = arith.constant 0 : index
    %c0_47 = arith.constant 0 : index
    %121 = vector.load %arg9[%c0_45, %c0_46, %c0_47] : memref<2x1x128xf32, #tpu.memory_space<vmem>>, vector<1x1x128xf32>
    %122 = vector.shape_cast %121 : vector<1x1x128xf32> to vector<1x128xf32>
    %c0_48 = arith.constant 0 : index
    %c0_49 = arith.constant 0 : index
    %c0_50 = arith.constant 0 : index
    %123 = vector.load %arg10[%c0_48, %c0_49, %c0_50] : memref<2x1x128xf32, #tpu.memory_space<vmem>>, vector<1x1x128xf32>
    %124 = vector.shape_cast %123 : vector<1x1x128xf32> to vector<1x128xf32>
    %cst_51 = arith.constant dense<0.000000e+00> : vector<16xf32>
    %125 = vector.multi_reduction <add>, %120, %cst_51 [1] : vector<16x128xf32> to vector<16xf32>
    %126 = vector.shape_cast %125 : vector<16xf32> to vector<16x1xf32>
    %cst_52 = arith.constant 1.280000e+02 : f32
    %127 = vector.broadcast %cst_52 : f32 to vector<16x1xf32>
    %128 = arith.divf %126, %127 : vector<16x1xf32>
    %129 = vector.broadcast %128 : vector<16x1xf32> to vector<16x128xf32>
    %130 = arith.subf %120, %129 : vector<16x128xf32>
    %131 = arith.mulf %130, %130 : vector<16x128xf32>
    %cst_53 = arith.constant dense<0.000000e+00> : vector<16xf32>
    %132 = vector.multi_reduction <add>, %131, %cst_53 [1] : vector<16x128xf32> to vector<16xf32>
    %133 = vector.shape_cast %132 : vector<16xf32> to vector<16x1xf32>
    %cst_54 = arith.constant 1.280000e+02 : f32
    %134 = vector.broadcast %cst_54 : f32 to vector<16x1xf32>
    %135 = arith.divf %133, %134 : vector<16x1xf32>
    %136 = vector.broadcast %128 : vector<16x1xf32> to vector<16x128xf32>
    %137 = arith.subf %120, %136 : vector<16x128xf32>
    %cst_55 = arith.constant 9.99999974E-6 : f32
    %138 = vector.broadcast %cst_55 : f32 to vector<16x1xf32>
    %139 = arith.addf %135, %138 : vector<16x1xf32>
    %140 = math.rsqrt %139 : vector<16x1xf32>
    %141 = vector.broadcast %140 : vector<16x1xf32> to vector<16x128xf32>
    %142 = arith.mulf %137, %141 : vector<16x128xf32>
    %143 = vector.broadcast %122 : vector<1x128xf32> to vector<16x128xf32>
    %144 = arith.mulf %142, %143 : vector<16x128xf32>
    %145 = vector.broadcast %124 : vector<1x128xf32> to vector<16x128xf32>
    %146 = arith.addf %144, %145 : vector<16x128xf32>
    %c0_56 = arith.constant 0 : index
    %c0_57 = arith.constant 0 : index
    %c0_58 = arith.constant 0 : index
    %147 = vector.load %arg11[%c0_56, %c0_57, %c0_58] : memref<2x256x128xbf16, #tpu.memory_space<vmem>>, vector<1x256x128xbf16>
    %148 = vector.shape_cast %147 : vector<1x256x128xbf16> to vector<256x128xbf16>
    %149 = arith.truncf %146 : vector<16x128xf32> to vector<16x128xbf16>
    %cst_59 = arith.constant dense<0.000000e+00> : vector<16x256xf32>
    %150 = tpu.matmul %149, %148, %cst_59 {dimension_numbers = #tpu.dot_dimension_numbers<[1], [1], [0], [0], [0, 0, 1, 0], [], []>} : vector<16x128xbf16>, vector<256x128xbf16>, vector<16x256xf32> -> vector<16x256xf32>
    %c0_60 = arith.constant 0 : index
    %c0_61 = arith.constant 0 : index
    %c0_62 = arith.constant 0 : index
    %151 = vector.load %arg12[%c0_60, %c0_61, %c0_62] : memref<2x1x256xf32, #tpu.memory_space<vmem>>, vector<1x1x256xf32>
    %152 = vector.shape_cast %151 : vector<1x1x256xf32> to vector<1x256xf32>
    %153 = vector.broadcast %152 : vector<1x256xf32> to vector<16x256xf32>
    %154 = arith.addf %150, %153 : vector<16x256xf32>
    %155 = arith.mulf %154, %154 : vector<16x256xf32>
    %156 = arith.mulf %154, %155 : vector<16x256xf32>
    %cst_63 = arith.constant 4.471500e-02 : f32
    %157 = vector.broadcast %cst_63 : f32 to vector<16x256xf32>
    %158 = arith.mulf %157, %156 : vector<16x256xf32>
    %159 = arith.addf %154, %158 : vector<16x256xf32>
    %cst_64 = arith.constant 0.797884583 : f32
    %160 = vector.broadcast %cst_64 : f32 to vector<16x256xf32>
    %161 = arith.mulf %160, %159 : vector<16x256xf32>
    %162 = math.tanh %161 : vector<16x256xf32>
    %cst_65 = arith.constant 1.000000e+00 : f32
    %163 = vector.broadcast %cst_65 : f32 to vector<16x256xf32>
    %164 = arith.addf %163, %162 : vector<16x256xf32>
    %cst_66 = arith.constant 5.000000e-01 : f32
    %165 = vector.broadcast %cst_66 : f32 to vector<16x256xf32>
    %166 = arith.mulf %165, %164 : vector<16x256xf32>
    %167 = arith.mulf %154, %166 : vector<16x256xf32>
    %c0_67 = arith.constant 0 : index
    %c0_68 = arith.constant 0 : index
    %c0_69 = arith.constant 0 : index
    %168 = vector.load %arg13[%c0_67, %c0_68, %c0_69] : memref<2x128x256xbf16, #tpu.memory_space<vmem>>, vector<1x128x256xbf16>
    %169 = vector.shape_cast %168 : vector<1x128x256xbf16> to vector<128x256xbf16>
    %170 = arith.truncf %167 : vector<16x256xf32> to vector<16x256xbf16>
    %cst_70 = arith.constant dense<0.000000e+00> : vector<16x128xf32>
    %171 = tpu.matmul %170, %169, %cst_70 {dimension_numbers = #tpu.dot_dimension_numbers<[1], [1], [0], [0], [0, 0, 1, 0], [], []>} : vector<16x256xbf16>, vector<128x256xbf16>, vector<16x128xf32> -> vector<16x128xf32>
    %c0_71 = arith.constant 0 : index
    %c0_72 = arith.constant 0 : index
    %c0_73 = arith.constant 0 : index
    %172 = vector.load %arg14[%c0_71, %c0_72, %c0_73] : memref<2x1x128xf32, #tpu.memory_space<vmem>>, vector<1x1x128xf32>
    %173 = vector.shape_cast %172 : vector<1x1x128xf32> to vector<1x128xf32>
    %174 = vector.broadcast %173 : vector<1x128xf32> to vector<16x128xf32>
    %175 = arith.addf %171, %174 : vector<16x128xf32>
    %176 = arith.addf %175, %146 : vector<16x128xf32>
    %c0_74 = arith.constant 0 : index
    %c0_75 = arith.constant 0 : index
    %c0_76 = arith.constant 0 : index
    %177 = vector.load %arg15[%c0_74, %c0_75, %c0_76] : memref<2x1x128xf32, #tpu.memory_space<vmem>>, vector<1x1x128xf32>
    %178 = vector.shape_cast %177 : vector<1x1x128xf32> to vector<1x128xf32>
    %c0_77 = arith.constant 0 : index
    %c0_78 = arith.constant 0 : index
    %c0_79 = arith.constant 0 : index
    %179 = vector.load %arg16[%c0_77, %c0_78, %c0_79] : memref<2x1x128xf32, #tpu.memory_space<vmem>>, vector<1x1x128xf32>
    %180 = vector.shape_cast %179 : vector<1x1x128xf32> to vector<1x128xf32>
    %cst_80 = arith.constant dense<0.000000e+00> : vector<16xf32>
    %181 = vector.multi_reduction <add>, %176, %cst_80 [1] : vector<16x128xf32> to vector<16xf32>
    %182 = vector.shape_cast %181 : vector<16xf32> to vector<16x1xf32>
    %cst_81 = arith.constant 1.280000e+02 : f32
    %183 = vector.broadcast %cst_81 : f32 to vector<16x1xf32>
    %184 = arith.divf %182, %183 : vector<16x1xf32>
    %185 = vector.broadcast %184 : vector<16x1xf32> to vector<16x128xf32>
    %186 = arith.subf %176, %185 : vector<16x128xf32>
    %187 = arith.mulf %186, %186 : vector<16x128xf32>
    %cst_82 = arith.constant dense<0.000000e+00> : vector<16xf32>
    %188 = vector.multi_reduction <add>, %187, %cst_82 [1] : vector<16x128xf32> to vector<16xf32>
    %189 = vector.shape_cast %188 : vector<16xf32> to vector<16x1xf32>
    %cst_83 = arith.constant 1.280000e+02 : f32
    %190 = vector.broadcast %cst_83 : f32 to vector<16x1xf32>
    %191 = arith.divf %189, %190 : vector<16x1xf32>
    %192 = vector.broadcast %184 : vector<16x1xf32> to vector<16x128xf32>
    %193 = arith.subf %176, %192 : vector<16x128xf32>
    %cst_84 = arith.constant 9.99999974E-6 : f32
    %194 = vector.broadcast %cst_84 : f32 to vector<16x1xf32>
    %195 = arith.addf %191, %194 : vector<16x1xf32>
    %196 = math.rsqrt %195 : vector<16x1xf32>
    %197 = vector.broadcast %196 : vector<16x1xf32> to vector<16x128xf32>
    %198 = arith.mulf %193, %197 : vector<16x128xf32>
    %199 = vector.broadcast %178 : vector<1x128xf32> to vector<16x128xf32>
    %200 = arith.mulf %198, %199 : vector<16x128xf32>
    %201 = vector.broadcast %180 : vector<1x128xf32> to vector<16x128xf32>
    %202 = arith.addf %200, %201 : vector<16x128xf32>
    %c1 = arith.constant 1 : index
    %c0_85 = arith.constant 0 : index
    %c0_86 = arith.constant 0 : index
    %203 = vector.load %arg5[%c1, %c0_85, %c0_86] : memref<2x384x128xbf16, #tpu.memory_space<vmem>>, vector<1x384x128xbf16>
    %204 = vector.shape_cast %203 : vector<1x384x128xbf16> to vector<384x128xbf16>
    %205 = arith.truncf %202 : vector<16x128xf32> to vector<16x128xbf16>
    %cst_87 = arith.constant dense<0.000000e+00> : vector<16x384xf32>
    %206 = tpu.matmul %205, %204, %cst_87 {dimension_numbers = #tpu.dot_dimension_numbers<[1], [1], [0], [0], [0, 0, 1, 0], [], []>} : vector<16x128xbf16>, vector<384x128xbf16>, vector<16x384xf32> -> vector<16x384xf32>
    %c1_88 = arith.constant 1 : index
    %c0_89 = arith.constant 0 : index
    %c0_90 = arith.constant 0 : index
    %207 = vector.load %arg6[%c1_88, %c0_89, %c0_90] : memref<2x1x384xf32, #tpu.memory_space<vmem>>, vector<1x1x384xf32>
    %208 = vector.shape_cast %207 : vector<1x1x384xf32> to vector<1x384xf32>
    %209 = vector.broadcast %208 : vector<1x384xf32> to vector<16x384xf32>
    %210 = arith.addf %206, %209 : vector<16x384xf32>
    %211 = arith.truncf %210 : vector<16x384xf32> to vector<16x384xbf16>
    %212 = vector.extract_strided_slice %211 {offsets = [0, 0], sizes = [16, 32], strides = [1, 1]} : vector<16x384xbf16> to vector<16x32xbf16>
    %213 = vector.extract_strided_slice %211 {offsets = [0, 128], sizes = [16, 32], strides = [1, 1]} : vector<16x384xbf16> to vector<16x32xbf16>
    %214 = vector.extract_strided_slice %211 {offsets = [0, 256], sizes = [16, 32], strides = [1, 1]} : vector<16x384xbf16> to vector<16x32xbf16>
    %cst_91 = arith.constant dense<0.000000e+00> : vector<16x16xf32>
    %215 = tpu.matmul %212, %213, %cst_91 {dimension_numbers = #tpu.dot_dimension_numbers<[1], [1], [0], [0], [0, 0, 1, 0], [], []>} : vector<16x32xbf16>, vector<16x32xbf16>, vector<16x16xf32> -> vector<16x16xf32>
    %cst_92 = arith.constant 0.176776692 : f32
    %216 = vector.broadcast %cst_92 : f32 to vector<16x16xf32>
    %217 = arith.mulf %215, %216 : vector<16x16xf32>
    %218 = arith.addf %217, %25 : vector<16x16xf32>
    %cst_93 = arith.constant dense<0xFF800000> : vector<16xf32>
    %219 = vector.multi_reduction <maximumf>, %218, %cst_93 [1] : vector<16x16xf32> to vector<16xf32>
    %220 = vector.shape_cast %219 : vector<16xf32> to vector<16x1xf32>
    %221 = vector.broadcast %220 : vector<16x1xf32> to vector<16x16xf32>
    %222 = arith.subf %218, %221 : vector<16x16xf32>
    %223 = math.exp %222 : vector<16x16xf32>
    %cst_94 = arith.constant dense<0.000000e+00> : vector<16xf32>
    %224 = vector.multi_reduction <add>, %223, %cst_94 [1] : vector<16x16xf32> to vector<16xf32>
    %225 = vector.shape_cast %224 : vector<16xf32> to vector<16x1xf32>
    %226 = tpu.reciprocal %225 {approx = true} : vector<16x1xf32> -> vector<16x1xf32>
    %227 = vector.broadcast %226 : vector<16x1xf32> to vector<16x16xf32>
    %228 = arith.mulf %223, %227 : vector<16x16xf32>
    %229 = arith.truncf %228 : vector<16x16xf32> to vector<16x16xbf16>
    %cst_95 = arith.constant dense<0.000000e+00> : vector<16x32xf32>
    %230 = tpu.matmul %229, %214, %cst_95 {dimension_numbers = #tpu.dot_dimension_numbers<[1], [0], [0], [1], [0, 0, 1, 1], [], []>} : vector<16x16xbf16>, vector<16x32xbf16>, vector<16x32xf32> -> vector<16x32xf32>
    %231 = vector.extract_strided_slice %211 {offsets = [0, 32], sizes = [16, 32], strides = [1, 1]} : vector<16x384xbf16> to vector<16x32xbf16>
    %232 = vector.extract_strided_slice %211 {offsets = [0, 160], sizes = [16, 32], strides = [1, 1]} : vector<16x384xbf16> to vector<16x32xbf16>
    %233 = vector.extract_strided_slice %211 {offsets = [0, 288], sizes = [16, 32], strides = [1, 1]} : vector<16x384xbf16> to vector<16x32xbf16>
    %cst_96 = arith.constant dense<0.000000e+00> : vector<16x16xf32>
    %234 = tpu.matmul %231, %232, %cst_96 {dimension_numbers = #tpu.dot_dimension_numbers<[1], [1], [0], [0], [0, 0, 1, 0], [], []>} : vector<16x32xbf16>, vector<16x32xbf16>, vector<16x16xf32> -> vector<16x16xf32>
    %cst_97 = arith.constant 0.176776692 : f32
    %235 = vector.broadcast %cst_97 : f32 to vector<16x16xf32>
    %236 = arith.mulf %234, %235 : vector<16x16xf32>
    %237 = arith.addf %236, %25 : vector<16x16xf32>
    %cst_98 = arith.constant dense<0xFF800000> : vector<16xf32>
    %238 = vector.multi_reduction <maximumf>, %237, %cst_98 [1] : vector<16x16xf32> to vector<16xf32>
    %239 = vector.shape_cast %238 : vector<16xf32> to vector<16x1xf32>
    %240 = vector.broadcast %239 : vector<16x1xf32> to vector<16x16xf32>
    %241 = arith.subf %237, %240 : vector<16x16xf32>
    %242 = math.exp %241 : vector<16x16xf32>
    %cst_99 = arith.constant dense<0.000000e+00> : vector<16xf32>
    %243 = vector.multi_reduction <add>, %242, %cst_99 [1] : vector<16x16xf32> to vector<16xf32>
    %244 = vector.shape_cast %243 : vector<16xf32> to vector<16x1xf32>
    %245 = tpu.reciprocal %244 {approx = true} : vector<16x1xf32> -> vector<16x1xf32>
    %246 = vector.broadcast %245 : vector<16x1xf32> to vector<16x16xf32>
    %247 = arith.mulf %242, %246 : vector<16x16xf32>
    %248 = arith.truncf %247 : vector<16x16xf32> to vector<16x16xbf16>
    %cst_100 = arith.constant dense<0.000000e+00> : vector<16x32xf32>
    %249 = tpu.matmul %248, %233, %cst_100 {dimension_numbers = #tpu.dot_dimension_numbers<[1], [0], [0], [1], [0, 0, 1, 1], [], []>} : vector<16x16xbf16>, vector<16x32xbf16>, vector<16x32xf32> -> vector<16x32xf32>
    %250 = vector.extract_strided_slice %211 {offsets = [0, 64], sizes = [16, 32], strides = [1, 1]} : vector<16x384xbf16> to vector<16x32xbf16>
    %251 = vector.extract_strided_slice %211 {offsets = [0, 192], sizes = [16, 32], strides = [1, 1]} : vector<16x384xbf16> to vector<16x32xbf16>
    %252 = vector.extract_strided_slice %211 {offsets = [0, 320], sizes = [16, 32], strides = [1, 1]} : vector<16x384xbf16> to vector<16x32xbf16>
    %cst_101 = arith.constant dense<0.000000e+00> : vector<16x16xf32>
    %253 = tpu.matmul %250, %251, %cst_101 {dimension_numbers = #tpu.dot_dimension_numbers<[1], [1], [0], [0], [0, 0, 1, 0], [], []>} : vector<16x32xbf16>, vector<16x32xbf16>, vector<16x16xf32> -> vector<16x16xf32>
    %cst_102 = arith.constant 0.176776692 : f32
    %254 = vector.broadcast %cst_102 : f32 to vector<16x16xf32>
    %255 = arith.mulf %253, %254 : vector<16x16xf32>
    %256 = arith.addf %255, %25 : vector<16x16xf32>
    %cst_103 = arith.constant dense<0xFF800000> : vector<16xf32>
    %257 = vector.multi_reduction <maximumf>, %256, %cst_103 [1] : vector<16x16xf32> to vector<16xf32>
    %258 = vector.shape_cast %257 : vector<16xf32> to vector<16x1xf32>
    %259 = vector.broadcast %258 : vector<16x1xf32> to vector<16x16xf32>
    %260 = arith.subf %256, %259 : vector<16x16xf32>
    %261 = math.exp %260 : vector<16x16xf32>
    %cst_104 = arith.constant dense<0.000000e+00> : vector<16xf32>
    %262 = vector.multi_reduction <add>, %261, %cst_104 [1] : vector<16x16xf32> to vector<16xf32>
    %263 = vector.shape_cast %262 : vector<16xf32> to vector<16x1xf32>
    %264 = tpu.reciprocal %263 {approx = true} : vector<16x1xf32> -> vector<16x1xf32>
    %265 = vector.broadcast %264 : vector<16x1xf32> to vector<16x16xf32>
    %266 = arith.mulf %261, %265 : vector<16x16xf32>
    %267 = arith.truncf %266 : vector<16x16xf32> to vector<16x16xbf16>
    %cst_105 = arith.constant dense<0.000000e+00> : vector<16x32xf32>
    %268 = tpu.matmul %267, %252, %cst_105 {dimension_numbers = #tpu.dot_dimension_numbers<[1], [0], [0], [1], [0, 0, 1, 1], [], []>} : vector<16x16xbf16>, vector<16x32xbf16>, vector<16x32xf32> -> vector<16x32xf32>
    %269 = vector.extract_strided_slice %211 {offsets = [0, 96], sizes = [16, 32], strides = [1, 1]} : vector<16x384xbf16> to vector<16x32xbf16>
    %270 = vector.extract_strided_slice %211 {offsets = [0, 224], sizes = [16, 32], strides = [1, 1]} : vector<16x384xbf16> to vector<16x32xbf16>
    %271 = vector.extract_strided_slice %211 {offsets = [0, 352], sizes = [16, 32], strides = [1, 1]} : vector<16x384xbf16> to vector<16x32xbf16>
    %cst_106 = arith.constant dense<0.000000e+00> : vector<16x16xf32>
    %272 = tpu.matmul %269, %270, %cst_106 {dimension_numbers = #tpu.dot_dimension_numbers<[1], [1], [0], [0], [0, 0, 1, 0], [], []>} : vector<16x32xbf16>, vector<16x32xbf16>, vector<16x16xf32> -> vector<16x16xf32>
    %cst_107 = arith.constant 0.176776692 : f32
    %273 = vector.broadcast %cst_107 : f32 to vector<16x16xf32>
    %274 = arith.mulf %272, %273 : vector<16x16xf32>
    %275 = arith.addf %274, %25 : vector<16x16xf32>
    %cst_108 = arith.constant dense<0xFF800000> : vector<16xf32>
    %276 = vector.multi_reduction <maximumf>, %275, %cst_108 [1] : vector<16x16xf32> to vector<16xf32>
    %277 = vector.shape_cast %276 : vector<16xf32> to vector<16x1xf32>
    %278 = vector.broadcast %277 : vector<16x1xf32> to vector<16x16xf32>
    %279 = arith.subf %275, %278 : vector<16x16xf32>
    %280 = math.exp %279 : vector<16x16xf32>
    %cst_109 = arith.constant dense<0.000000e+00> : vector<16xf32>
    %281 = vector.multi_reduction <add>, %280, %cst_109 [1] : vector<16x16xf32> to vector<16xf32>
    %282 = vector.shape_cast %281 : vector<16xf32> to vector<16x1xf32>
    %283 = tpu.reciprocal %282 {approx = true} : vector<16x1xf32> -> vector<16x1xf32>
    %284 = vector.broadcast %283 : vector<16x1xf32> to vector<16x16xf32>
    %285 = arith.mulf %280, %284 : vector<16x16xf32>
    %286 = arith.truncf %285 : vector<16x16xf32> to vector<16x16xbf16>
    %cst_110 = arith.constant dense<0.000000e+00> : vector<16x32xf32>
    %287 = tpu.matmul %286, %271, %cst_110 {dimension_numbers = #tpu.dot_dimension_numbers<[1], [0], [0], [1], [0, 0, 1, 1], [], []>} : vector<16x16xbf16>, vector<16x32xbf16>, vector<16x32xf32> -> vector<16x32xf32>
    %288 = tpu.concatenate %230, %249, %268, %287 in 1 : vector<16x32xf32>, vector<16x32xf32>, vector<16x32xf32>, vector<16x32xf32> -> vector<16x128xf32>
    %c1_111 = arith.constant 1 : index
    %c0_112 = arith.constant 0 : index
    %c0_113 = arith.constant 0 : index
    %289 = vector.load %arg7[%c1_111, %c0_112, %c0_113] : memref<2x128x128xbf16, #tpu.memory_space<vmem>>, vector<1x128x128xbf16>
    %290 = vector.shape_cast %289 : vector<1x128x128xbf16> to vector<128x128xbf16>
    %291 = arith.truncf %288 : vector<16x128xf32> to vector<16x128xbf16>
    %cst_114 = arith.constant dense<0.000000e+00> : vector<16x128xf32>
    %292 = tpu.matmul %291, %290, %cst_114 {dimension_numbers = #tpu.dot_dimension_numbers<[1], [1], [0], [0], [0, 0, 1, 0], [], []>} : vector<16x128xbf16>, vector<128x128xbf16>, vector<16x128xf32> -> vector<16x128xf32>
    %c1_115 = arith.constant 1 : index
    %c0_116 = arith.constant 0 : index
    %c0_117 = arith.constant 0 : index
    %293 = vector.load %arg8[%c1_115, %c0_116, %c0_117] : memref<2x1x128xf32, #tpu.memory_space<vmem>>, vector<1x1x128xf32>
    %294 = vector.shape_cast %293 : vector<1x1x128xf32> to vector<1x128xf32>
    %295 = vector.broadcast %294 : vector<1x128xf32> to vector<16x128xf32>
    %296 = arith.addf %292, %295 : vector<16x128xf32>
    %297 = arith.addf %296, %202 : vector<16x128xf32>
    %c1_118 = arith.constant 1 : index
    %c0_119 = arith.constant 0 : index
    %c0_120 = arith.constant 0 : index
    %298 = vector.load %arg9[%c1_118, %c0_119, %c0_120] : memref<2x1x128xf32, #tpu.memory_space<vmem>>, vector<1x1x128xf32>
    %299 = vector.shape_cast %298 : vector<1x1x128xf32> to vector<1x128xf32>
    %c1_121 = arith.constant 1 : index
    %c0_122 = arith.constant 0 : index
    %c0_123 = arith.constant 0 : index
    %300 = vector.load %arg10[%c1_121, %c0_122, %c0_123] : memref<2x1x128xf32, #tpu.memory_space<vmem>>, vector<1x1x128xf32>
    %301 = vector.shape_cast %300 : vector<1x1x128xf32> to vector<1x128xf32>
    %cst_124 = arith.constant dense<0.000000e+00> : vector<16xf32>
    %302 = vector.multi_reduction <add>, %297, %cst_124 [1] : vector<16x128xf32> to vector<16xf32>
    %303 = vector.shape_cast %302 : vector<16xf32> to vector<16x1xf32>
    %cst_125 = arith.constant 1.280000e+02 : f32
    %304 = vector.broadcast %cst_125 : f32 to vector<16x1xf32>
    %305 = arith.divf %303, %304 : vector<16x1xf32>
    %306 = vector.broadcast %305 : vector<16x1xf32> to vector<16x128xf32>
    %307 = arith.subf %297, %306 : vector<16x128xf32>
    %308 = arith.mulf %307, %307 : vector<16x128xf32>
    %cst_126 = arith.constant dense<0.000000e+00> : vector<16xf32>
    %309 = vector.multi_reduction <add>, %308, %cst_126 [1] : vector<16x128xf32> to vector<16xf32>
    %310 = vector.shape_cast %309 : vector<16xf32> to vector<16x1xf32>
    %cst_127 = arith.constant 1.280000e+02 : f32
    %311 = vector.broadcast %cst_127 : f32 to vector<16x1xf32>
    %312 = arith.divf %310, %311 : vector<16x1xf32>
    %313 = vector.broadcast %305 : vector<16x1xf32> to vector<16x128xf32>
    %314 = arith.subf %297, %313 : vector<16x128xf32>
    %cst_128 = arith.constant 9.99999974E-6 : f32
    %315 = vector.broadcast %cst_128 : f32 to vector<16x1xf32>
    %316 = arith.addf %312, %315 : vector<16x1xf32>
    %317 = math.rsqrt %316 : vector<16x1xf32>
    %318 = vector.broadcast %317 : vector<16x1xf32> to vector<16x128xf32>
    %319 = arith.mulf %314, %318 : vector<16x128xf32>
    %320 = vector.broadcast %299 : vector<1x128xf32> to vector<16x128xf32>
    %321 = arith.mulf %319, %320 : vector<16x128xf32>
    %322 = vector.broadcast %301 : vector<1x128xf32> to vector<16x128xf32>
    %323 = arith.addf %321, %322 : vector<16x128xf32>
    %c1_129 = arith.constant 1 : index
    %c0_130 = arith.constant 0 : index
    %c0_131 = arith.constant 0 : index
    %324 = vector.load %arg11[%c1_129, %c0_130, %c0_131] : memref<2x256x128xbf16, #tpu.memory_space<vmem>>, vector<1x256x128xbf16>
    %325 = vector.shape_cast %324 : vector<1x256x128xbf16> to vector<256x128xbf16>
    %326 = arith.truncf %323 : vector<16x128xf32> to vector<16x128xbf16>
    %cst_132 = arith.constant dense<0.000000e+00> : vector<16x256xf32>
    %327 = tpu.matmul %326, %325, %cst_132 {dimension_numbers = #tpu.dot_dimension_numbers<[1], [1], [0], [0], [0, 0, 1, 0], [], []>} : vector<16x128xbf16>, vector<256x128xbf16>, vector<16x256xf32> -> vector<16x256xf32>
    %c1_133 = arith.constant 1 : index
    %c0_134 = arith.constant 0 : index
    %c0_135 = arith.constant 0 : index
    %328 = vector.load %arg12[%c1_133, %c0_134, %c0_135] : memref<2x1x256xf32, #tpu.memory_space<vmem>>, vector<1x1x256xf32>
    %329 = vector.shape_cast %328 : vector<1x1x256xf32> to vector<1x256xf32>
    %330 = vector.broadcast %329 : vector<1x256xf32> to vector<16x256xf32>
    %331 = arith.addf %327, %330 : vector<16x256xf32>
    %332 = arith.mulf %331, %331 : vector<16x256xf32>
    %333 = arith.mulf %331, %332 : vector<16x256xf32>
    %cst_136 = arith.constant 4.471500e-02 : f32
    %334 = vector.broadcast %cst_136 : f32 to vector<16x256xf32>
    %335 = arith.mulf %334, %333 : vector<16x256xf32>
    %336 = arith.addf %331, %335 : vector<16x256xf32>
    %cst_137 = arith.constant 0.797884583 : f32
    %337 = vector.broadcast %cst_137 : f32 to vector<16x256xf32>
    %338 = arith.mulf %337, %336 : vector<16x256xf32>
    %339 = math.tanh %338 : vector<16x256xf32>
    %cst_138 = arith.constant 1.000000e+00 : f32
    %340 = vector.broadcast %cst_138 : f32 to vector<16x256xf32>
    %341 = arith.addf %340, %339 : vector<16x256xf32>
    %cst_139 = arith.constant 5.000000e-01 : f32
    %342 = vector.broadcast %cst_139 : f32 to vector<16x256xf32>
    %343 = arith.mulf %342, %341 : vector<16x256xf32>
    %344 = arith.mulf %331, %343 : vector<16x256xf32>
    %c1_140 = arith.constant 1 : index
    %c0_141 = arith.constant 0 : index
    %c0_142 = arith.constant 0 : index
    %345 = vector.load %arg13[%c1_140, %c0_141, %c0_142] : memref<2x128x256xbf16, #tpu.memory_space<vmem>>, vector<1x128x256xbf16>
    %346 = vector.shape_cast %345 : vector<1x128x256xbf16> to vector<128x256xbf16>
    %347 = arith.truncf %344 : vector<16x256xf32> to vector<16x256xbf16>
    %cst_143 = arith.constant dense<0.000000e+00> : vector<16x128xf32>
    %348 = tpu.matmul %347, %346, %cst_143 {dimension_numbers = #tpu.dot_dimension_numbers<[1], [1], [0], [0], [0, 0, 1, 0], [], []>} : vector<16x256xbf16>, vector<128x256xbf16>, vector<16x128xf32> -> vector<16x128xf32>
    %c1_144 = arith.constant 1 : index
    %c0_145 = arith.constant 0 : index
    %c0_146 = arith.constant 0 : index
    %349 = vector.load %arg14[%c1_144, %c0_145, %c0_146] : memref<2x1x128xf32, #tpu.memory_space<vmem>>, vector<1x1x128xf32>
    %350 = vector.shape_cast %349 : vector<1x1x128xf32> to vector<1x128xf32>
    %351 = vector.broadcast %350 : vector<1x128xf32> to vector<16x128xf32>
    %352 = arith.addf %348, %351 : vector<16x128xf32>
    %353 = arith.addf %352, %323 : vector<16x128xf32>
    %c1_147 = arith.constant 1 : index
    %c0_148 = arith.constant 0 : index
    %c0_149 = arith.constant 0 : index
    %354 = vector.load %arg15[%c1_147, %c0_148, %c0_149] : memref<2x1x128xf32, #tpu.memory_space<vmem>>, vector<1x1x128xf32>
    %355 = vector.shape_cast %354 : vector<1x1x128xf32> to vector<1x128xf32>
    %c1_150 = arith.constant 1 : index
    %c0_151 = arith.constant 0 : index
    %c0_152 = arith.constant 0 : index
    %356 = vector.load %arg16[%c1_150, %c0_151, %c0_152] : memref<2x1x128xf32, #tpu.memory_space<vmem>>, vector<1x1x128xf32>
    %357 = vector.shape_cast %356 : vector<1x1x128xf32> to vector<1x128xf32>
    %cst_153 = arith.constant dense<0.000000e+00> : vector<16xf32>
    %358 = vector.multi_reduction <add>, %353, %cst_153 [1] : vector<16x128xf32> to vector<16xf32>
    %359 = vector.shape_cast %358 : vector<16xf32> to vector<16x1xf32>
    %cst_154 = arith.constant 1.280000e+02 : f32
    %360 = vector.broadcast %cst_154 : f32 to vector<16x1xf32>
    %361 = arith.divf %359, %360 : vector<16x1xf32>
    %362 = vector.broadcast %361 : vector<16x1xf32> to vector<16x128xf32>
    %363 = arith.subf %353, %362 : vector<16x128xf32>
    %364 = arith.mulf %363, %363 : vector<16x128xf32>
    %cst_155 = arith.constant dense<0.000000e+00> : vector<16xf32>
    %365 = vector.multi_reduction <add>, %364, %cst_155 [1] : vector<16x128xf32> to vector<16xf32>
    %366 = vector.shape_cast %365 : vector<16xf32> to vector<16x1xf32>
    %cst_156 = arith.constant 1.280000e+02 : f32
    %367 = vector.broadcast %cst_156 : f32 to vector<16x1xf32>
    %368 = arith.divf %366, %367 : vector<16x1xf32>
    %369 = vector.broadcast %361 : vector<16x1xf32> to vector<16x128xf32>
    %370 = arith.subf %353, %369 : vector<16x128xf32>
    %cst_157 = arith.constant 9.99999974E-6 : f32
    %371 = vector.broadcast %cst_157 : f32 to vector<16x1xf32>
    %372 = arith.addf %368, %371 : vector<16x1xf32>
    %373 = math.rsqrt %372 : vector<16x1xf32>
    %374 = vector.broadcast %373 : vector<16x1xf32> to vector<16x128xf32>
    %375 = arith.mulf %370, %374 : vector<16x128xf32>
    %376 = vector.broadcast %355 : vector<1x128xf32> to vector<16x128xf32>
    %377 = arith.mulf %375, %376 : vector<16x128xf32>
    %378 = vector.broadcast %357 : vector<1x128xf32> to vector<16x128xf32>
    %379 = arith.addf %377, %378 : vector<16x128xf32>
    %380 = arith.truncf %379 : vector<16x128xf32> to vector<16x128xbf16>
    %c0_158 = arith.constant 0 : index
    %c0_159 = arith.constant 0 : index
    %381 = vector.load %arg18[%c0_158, %c0_159] : memref<128x128xbf16, #tpu.memory_space<vmem>>, vector<128x128xbf16>
    %cst_160 = arith.constant dense<0.000000e+00> : vector<16x128xf32>
    %382 = tpu.matmul %380, %381, %cst_160 {dimension_numbers = #tpu.dot_dimension_numbers<[1], [1], [0], [0], [0, 0, 1, 0], [], []>} : vector<16x128xbf16>, vector<128x128xbf16>, vector<16x128xf32> -> vector<16x128xf32>
    %c0_161 = arith.constant 0 : index
    %c0_162 = arith.constant 0 : index
    %383 = vector.load %arg17[%c0_161, %c0_162] : memref<16x32xf32, #tpu.memory_space<vmem>>, vector<16x32xf32>
    %384 = arith.truncf %383 : vector<16x32xf32> to vector<16x32xbf16>
    %c0_163 = arith.constant 0 : index
    %c0_164 = arith.constant 0 : index
    %385 = vector.load %arg19[%c0_163, %c0_164] : memref<128x32xbf16, #tpu.memory_space<vmem>>, vector<128x32xbf16>
    %cst_165 = arith.constant dense<0.000000e+00> : vector<16x128xf32>
    %386 = tpu.matmul %384, %385, %cst_165 {dimension_numbers = #tpu.dot_dimension_numbers<[1], [1], [0], [0], [0, 0, 1, 0], [], []>} : vector<16x32xbf16>, vector<128x32xbf16>, vector<16x128xf32> -> vector<16x128xf32>
    %387 = arith.addf %382, %386 : vector<16x128xf32>
    %388 = tpu.iota {dimensions = array<i32: 1>} : vector<16x128xi32>
    %c9_i32 = arith.constant 9 : i32
    %389 = vector.broadcast %c9_i32 : i32 to vector<16x128xi32>
    %390 = arith.cmpi slt, %388, %389 : vector<16x128xi32>
    %cst_166 = arith.constant 0.000000e+00 : f32
    %391 = vector.broadcast %cst_166 : f32 to vector<16x128xf32>
    %392 = arith.select %390, %387, %391 : vector<16x128xi1>, vector<16x128xf32>
    %cst_167 = arith.constant dense<0.000000e+00> : vector<16xf32>
    %393 = vector.multi_reduction <add>, %392, %cst_167 [1] : vector<16x128xf32> to vector<16xf32>
    %394 = vector.shape_cast %393 : vector<16xf32> to vector<16x1xf32>
    %cst_168 = arith.constant 0.111111112 : f32
    %395 = vector.broadcast %cst_168 : f32 to vector<16x1xf32>
    %396 = arith.mulf %394, %395 : vector<16x1xf32>
    %397 = vector.broadcast %396 : vector<16x1xf32> to vector<16x128xf32>
    %398 = arith.subf %387, %397 : vector<16x128xf32>
    %cst_169 = arith.constant 0.000000e+00 : f32
    %399 = vector.broadcast %cst_169 : f32 to vector<16x128xf32>
    %400 = arith.select %390, %398, %399 : vector<16x128xi1>, vector<16x128xf32>
    %401 = arith.mulf %400, %400 : vector<16x128xf32>
    %cst_170 = arith.constant dense<0.000000e+00> : vector<16xf32>
    %402 = vector.multi_reduction <add>, %401, %cst_170 [1] : vector<16x128xf32> to vector<16xf32>
    %403 = vector.shape_cast %402 : vector<16xf32> to vector<16x1xf32>
    %cst_171 = arith.constant 0.111111112 : f32
    %404 = vector.broadcast %cst_171 : f32 to vector<16x1xf32>
    %405 = arith.mulf %403, %404 : vector<16x1xf32>
    %406 = vector.broadcast %396 : vector<16x1xf32> to vector<16x128xf32>
    %407 = arith.subf %387, %406 : vector<16x128xf32>
    %cst_172 = arith.constant 9.99999974E-6 : f32
    %408 = vector.broadcast %cst_172 : f32 to vector<16x1xf32>
    %409 = arith.addf %405, %408 : vector<16x1xf32>
    %410 = math.rsqrt %409 : vector<16x1xf32>
    %411 = vector.broadcast %410 : vector<16x1xf32> to vector<16x128xf32>
    %412 = arith.mulf %407, %411 : vector<16x128xf32>
    %c0_173 = arith.constant 0 : index
    %c0_174 = arith.constant 0 : index
    %413 = vector.load %arg20[%c0_173, %c0_174] : memref<1x128xf32, #tpu.memory_space<vmem>>, vector<1x128xf32>
    %414 = vector.broadcast %413 : vector<1x128xf32> to vector<16x128xf32>
    %415 = arith.mulf %412, %414 : vector<16x128xf32>
    %c0_175 = arith.constant 0 : index
    %c0_176 = arith.constant 0 : index
    %416 = vector.load %arg21[%c0_175, %c0_176] : memref<1x128xf32, #tpu.memory_space<vmem>>, vector<1x128xf32>
    %417 = vector.broadcast %416 : vector<1x128xf32> to vector<16x128xf32>
    %418 = arith.addf %415, %417 : vector<16x128xf32>
    %c0_177 = arith.constant 0 : index
    %c0_178 = arith.constant 0 : index
    %419 = vector.load %arg22[%c0_177, %c0_178] : memref<16x128xf32, #tpu.memory_space<vmem>>, vector<16x128xf32>
    tpu.vector_store %arg22[%c0_177, %c0_178], %418 {strides = array<i32>} : memref<16x128xf32, #tpu.memory_space<vmem>>, vector<16x128xf32>,
    return
  }
  func.func @transform_0(%arg0: i32) -> (i32, i32) {
    %c0_i32 = arith.constant 0 : i32
    %c0_i32_0 = arith.constant 0 : i32
    %c0_i32_1 = arith.constant 0 : i32
    return %c0_i32, %c0_i32_0 : i32, i32
  }
  func.func @transform_1(%arg0: i32) -> (i32, i32) {
    %c0_i32 = arith.constant 0 : i32
    %c0_i32_0 = arith.constant 0 : i32
    %c0_i32_1 = arith.constant 0 : i32
    return %c0_i32, %c0_i32_0 : i32, i32
  }
  func.func @transform_2(%arg0: i32) -> (i32, i32) {
    %c0_i32 = arith.constant 0 : i32
    %c0_i32_0 = arith.constant 0 : i32
    %c0_i32_1 = arith.constant 0 : i32
    return %c0_i32, %c0_i32_0 : i32, i32
  }
  func.func @transform_3(%arg0: i32) -> (i32, i32) {
    %c0_i32 = arith.constant 0 : i32
    %c0_i32_0 = arith.constant 0 : i32
    %c0_i32_1 = arith.constant 0 : i32
    return %c0_i32, %c0_i32_0 : i32, i32
  }
  func.func @transform_4(%arg0: i32) -> (i32, i32, i32) {
    %c0_i32 = arith.constant 0 : i32
    %c0_i32_0 = arith.constant 0 : i32
    %c0_i32_1 = arith.constant 0 : i32
    %c0_i32_2 = arith.constant 0 : i32
    return %c0_i32, %c0_i32_0, %c0_i32_1 : i32, i32, i32
  }
  func.func @transform_5(%arg0: i32) -> (i32, i32, i32) {
    %c0_i32 = arith.constant 0 : i32
    %c0_i32_0 = arith.constant 0 : i32
    %c0_i32_1 = arith.constant 0 : i32
    %c0_i32_2 = arith.constant 0 : i32
    return %c0_i32, %c0_i32_0, %c0_i32_1 : i32, i32, i32
  }
  func.func @transform_6(%arg0: i32) -> (i32, i32, i32) {
    %c0_i32 = arith.constant 0 : i32
    %c0_i32_0 = arith.constant 0 : i32
    %c0_i32_1 = arith.constant 0 : i32
    %c0_i32_2 = arith.constant 0 : i32
    return %c0_i32, %c0_i32_0, %c0_i32_1 : i32, i32, i32
  }
  func.func @transform_7(%arg0: i32) -> (i32, i32, i32) {
    %c0_i32 = arith.constant 0 : i32
    %c0_i32_0 = arith.constant 0 : i32
    %c0_i32_1 = arith.constant 0 : i32
    %c0_i32_2 = arith.constant 0 : i32
    return %c0_i32, %c0_i32_0, %c0_i32_1 : i32, i32, i32
  }
  func.func @transform_8(%arg0: i32) -> (i32, i32, i32) {
    %c0_i32 = arith.constant 0 : i32
    %c0_i32_0 = arith.constant 0 : i32
    %c0_i32_1 = arith.constant 0 : i32
    %c0_i32_2 = arith.constant 0 : i32
    return %c0_i32, %c0_i32_0, %c0_i32_1 : i32, i32, i32
  }
  func.func @transform_9(%arg0: i32) -> (i32, i32, i32) {
    %c0_i32 = arith.constant 0 : i32
    %c0_i32_0 = arith.constant 0 : i32
    %c0_i32_1 = arith.constant 0 : i32
    %c0_i32_2 = arith.constant 0 : i32
    return %c0_i32, %c0_i32_0, %c0_i32_1 : i32, i32, i32
  }
  func.func @transform_10(%arg0: i32) -> (i32, i32, i32) {
    %c0_i32 = arith.constant 0 : i32
    %c0_i32_0 = arith.constant 0 : i32
    %c0_i32_1 = arith.constant 0 : i32
    %c0_i32_2 = arith.constant 0 : i32
    return %c0_i32, %c0_i32_0, %c0_i32_1 : i32, i32, i32
  }
  func.func @transform_11(%arg0: i32) -> (i32, i32, i32) {
    %c0_i32 = arith.constant 0 : i32
    %c0_i32_0 = arith.constant 0 : i32
    %c0_i32_1 = arith.constant 0 : i32
    %c0_i32_2 = arith.constant 0 : i32
    return %c0_i32, %c0_i32_0, %c0_i32_1 : i32, i32, i32
  }
  func.func @transform_12(%arg0: i32) -> (i32, i32, i32) {
    %c0_i32 = arith.constant 0 : i32
    %c0_i32_0 = arith.constant 0 : i32
    %c0_i32_1 = arith.constant 0 : i32
    %c0_i32_2 = arith.constant 0 : i32
    return %c0_i32, %c0_i32_0, %c0_i32_1 : i32, i32, i32
  }
  func.func @transform_13(%arg0: i32) -> (i32, i32, i32) {
    %c0_i32 = arith.constant 0 : i32
    %c0_i32_0 = arith.constant 0 : i32
    %c0_i32_1 = arith.constant 0 : i32
    %c0_i32_2 = arith.constant 0 : i32
    return %c0_i32, %c0_i32_0, %c0_i32_1 : i32, i32, i32
  }
  func.func @transform_14(%arg0: i32) -> (i32, i32, i32) {
    %c0_i32 = arith.constant 0 : i32
    %c0_i32_0 = arith.constant 0 : i32
    %c0_i32_1 = arith.constant 0 : i32
    %c0_i32_2 = arith.constant 0 : i32
    return %c0_i32, %c0_i32_0, %c0_i32_1 : i32, i32, i32
  }
  func.func @transform_15(%arg0: i32) -> (i32, i32, i32) {
    %c0_i32 = arith.constant 0 : i32
    %c0_i32_0 = arith.constant 0 : i32
    %c0_i32_1 = arith.constant 0 : i32
    %c0_i32_2 = arith.constant 0 : i32
    return %c0_i32, %c0_i32_0, %c0_i32_1 : i32, i32, i32
  }
  func.func @transform_16(%arg0: i32) -> (i32, i32) {
    %c0_i32 = arith.constant 0 : i32
    %c0_i32_0 = arith.constant 0 : i32
    %c0_i32_1 = arith.constant 0 : i32
    return %c0_i32, %c0_i32_0 : i32, i32
  }
  func.func @transform_17(%arg0: i32) -> (i32, i32) {
    %c0_i32 = arith.constant 0 : i32
    %c0_i32_0 = arith.constant 0 : i32
    %c0_i32_1 = arith.constant 0 : i32
    return %c0_i32, %c0_i32_0 : i32, i32
  }
  func.func @transform_18(%arg0: i32) -> (i32, i32) {
    %c0_i32 = arith.constant 0 : i32
    %c0_i32_0 = arith.constant 0 : i32
    %c0_i32_1 = arith.constant 0 : i32
    return %c0_i32, %c0_i32_0 : i32, i32
  }
  func.func @transform_19(%arg0: i32) -> (i32, i32) {
    %c0_i32 = arith.constant 0 : i32
    %c0_i32_0 = arith.constant 0 : i32
    %c0_i32_1 = arith.constant 0 : i32
    return %c0_i32, %c0_i32_0 : i32, i32
  }
  func.func @transform_20(%arg0: i32) -> (i32, i32) {
    %c0_i32 = arith.constant 0 : i32
    %c0_i32_0 = arith.constant 0 : i32
    %c0_i32_1 = arith.constant 0 : i32
    return %c0_i32, %c0_i32_0 : i32, i32
  }
  func.func @transform_21(%arg0: i32) -> (i32, i32) {
    %c0_i32 = arith.constant 0 : i32
    %c0_i32_0 = arith.constant 0 : i32
    %c0_i32_1 = arith.constant 0 : i32
    return %c0_i32, %c0_i32_0 : i32, i32
  }
}

</mosaic_0001>

<bundles_post_ra>
// kernel: roberta_ner_forward.1
= control target key start
LH: loop header
LB: loop body
LE: loop exit
PB: predicated region body
PF: predicated region fallthrough
CT: control target
= control target key end

     0   :  { %s5250_s0 = inlined_call_operand.vmem [shape: f32[16,128], index: 0, kind: input, shape index: {}]   ;;  %s5251_s1 = inlined_call_operand.vmem [shape: f32[16,16], index: 1, kind: input, shape index: {}]   ;;  %s5252_s2 = inlined_call_operand.vmem [shape: f32[1,128], index: 2, kind: input, shape index: {}]   ;;  %s5253_s3 = inlined_call_operand.hbm [shape: f32[1,128], index: 3, kind: input, shape index: {}]   ;;  %s5254_s4 = inlined_call_operand.vmem [shape: bf16[2,384,128], index: 4, kind: input, shape index: {}]   ;;  %s5255_s5 = inlined_call_operand.vmem [shape: f32[2,1,384], index: 5, kind: input, shape index: {}]   ;;  %s5256_s6 = inlined_call_operand.vmem [shape: bf16[2,128,128], index: 6, kind: input, shape index: {}]   ;;  %s5257_s7 = inlined_call_operand.hbm [shape: f32[2,1,128], index: 7, kind: input, shape index: {}]   ;;  %s5258_s8 = inlined_call_operand.vmem [shape: f32[2,1,128], index: 8, kind: input, shape index: {}]   ;;  %s5259_s9 = inlined_call_operand.vmem [shape: f32[2,1,128], index: 9, kind: input, shape index: {}]   ;;  %s5260_s10 = inlined_call_operand.vmem [shape: bf16[2,256,128], index: 10, kind: input, shape index: {}]   ;;  %s5261_s11 = inlined_call_operand.vmem [shape: f32[2,1,256], index: 11, kind: input, shape index: {}]   ;;  %s5262_s12 = inlined_call_operand.hbm [shape: bf16[2,128,256], index: 12, kind: input, shape index: {}]   ;;  %s5263_s13 = inlined_call_operand.hbm [shape: f32[2,1,128], index: 13, kind: input, shape index: {}]   ;;  %s5264_s14 = inlined_call_operand.vmem [shape: f32[2,1,128], index: 14, kind: input, shape index: {}]   ;;  %s5265_s15 = inlined_call_operand.vmem [shape: f32[2,1,128], index: 15, kind: input, shape index: {}]   ;;  %s5266_s16 = inlined_call_operand.vmem [shape: f32[16,32], index: 16, kind: input, shape index: {}]   ;;  %s5267_s17 = inlined_call_operand.vmem [shape: bf16[128,128], index: 17, kind: input, shape index: {}]   ;;  %s5268_s18 = inlined_call_operand.vmem [shape: bf16[128,32], index: 18, kind: input, shape index: {}]   ;;  %s5269_s19 = inlined_call_operand.vmem [shape: f32[1,128], index: 19, kind: input, shape index: {}]   ;;  %s5270_s20 = inlined_call_operand.vmem [shape: f32[1,128], index: 20, kind: input, shape index: {}]   ;;  %s5271_s21 = inlined_call_operand.vmem [shape: f32[16,128], index: 21, kind: output, shape index: {}]  }
   0x1   :  { %5278 = sst [smem:[#allocation12_spill]] %s5250_s0 }
   0x2   :  { %5279 = sst [smem:[#allocation13_spill]] %s5251_s1 }
   0x3   :  { %5280 = sst [smem:[#allocation14_spill]] %s5252_s2 }
   0x4   :  { %5281 = sst [smem:[#allocation15_spill]] %s5253_s3 }
   0x5   :  { %5282 = sst [smem:[#allocation16_spill]] %s5254_s4 }
   0x6   :  { %5283 = sst [smem:[#allocation17_spill]] %s5255_s5 }
   0x7   :  { %5284 = sst [smem:[#allocation18_spill]] %s5270_s20 }
   0x8   :  { %5285 = sst [smem:[#allocation19_spill]] %s5271_s21 }
   0x9   :  { %26 = vsyncpa [#allocation3], 0 }
   0xa   :  { %27 = vsyncpa [#allocation5], 0 }
   0xb   :  { %28 = vsyncpa [#allocation8], 0  ;;  %s4304_s2 = smov [#allocation4]   ;;  %s4210_s3 = scalar_lea.hbm %s5257_s7, 32 }
   0xc   :  { %s56_s25 = sshll.u32 %s4304_s2, 4  ;;  %p4211_p0 = scmp.ne.s32.totalorder %s5257_s7, %s4210_s3  ;;  %s57_s25 = int_to_ptr.vmem [resolvable:$true] %s56_s25 }
   0xd   :  { %p4214_p1 = scmp.lt.u32.totalorder %s4210_s3, %s5257_s7 }
   0xf   :  { %p4216_p2 = pnand %p4214_p1, %p4211_p0 }
  0x11   :  { %4219 = shalt.err (!%p4216_p2)
}
  0x12   :  { %s4220_s30 = scalar_lea.vmem %s57_s25, 32  ;;  %p4225_p4 = scmp.lt.s32.totalorder %s57_s25, %s57_s25 }
  0x13   :  { %p4221_p3 = scmp.ne.s32.totalorder %s57_s25, %s4220_s30  ;;  %p4226_p5 = scmp.lt.s32.totalorder %s4220_s30, %s4220_s30 }
  0x15   :  { %p4227_p6 = por %p4226_p5, %p4225_p4 }
  0x17   :  { %p4228_p7 = pnand %p4227_p6, %p4221_p3 }
  0x19   :  { %4231 = shalt.err (!%p4228_p7)
}
  0x1a   :  { %s4305_s5 = smov 16   ;;  %s4306_s22 = smov 1  }
  0x1b   :  { %62 = dma.hbm_to_vmem [thread:$0]  %s5257_s7, 32, %s57_s25, [#allocation5], %s4305_s5, %s4305_s5, %s4306_s22  }
  0x1c   :  { %s4307_s24 = smov [#allocation2]   ;;  %s4308_s26 = smov [#allocation6]  }
  0x1d   :  { %s41_s2 = sshll.u32 %s4307_s24, 4  ;;  %s76_s27 = sshll.u32 %s4308_s26, 4  ;;  %s42_s2 = int_to_ptr.vmem [resolvable:$true] %s41_s2  ;;  %s77_s27 = int_to_ptr.vmem [resolvable:$true] %s76_s27 }
  0x1e   :  { %s5286_s29 = sld [smem:[#allocation15_spill]] }
  0x24   :  { %s4232_s0 = scalar_lea.hbm %s5286_s29, 16 }
  0x25   :  { %p4233_p8 = scmp.ne.s32.totalorder %s5286_s29, %s4232_s0  ;;  %p4236_p9 = scmp.lt.u32.totalorder %s4232_s0, %s5286_s29 }
  0x27   :  { %p4238_p10 = pnand %p4236_p9, %p4233_p8 }
  0x29   :  { %4241 = shalt.err (!%p4238_p10)
}
  0x2a   :  { %s4242_s7 = scalar_lea.vmem %s42_s2, 16  ;;  %s4246_s25 = scalar_lea.vmem %s42_s2, 32 }
  0x2b   :  { %p4243_p11 = scmp.ne.s32.totalorder %s42_s2, %s4242_s7  ;;  %p4247_p12 = scmp.lt.s32.totalorder %s42_s2, %s42_s2 }
  0x2c   :  { %p4248_p13 = scmp.lt.s32.totalorder %s4246_s25, %s4242_s7 }
  0x2e   :  { %p4249_p0 = por %p4248_p13, %p4247_p12 }
  0x30   :  { %p4250_p1 = pnand %p4249_p0, %p4243_p11 }
  0x32   :  { %4253 = shalt.err (!%p4250_p1)
}
  0x33   :  { %44 = dma.hbm_to_vmem [thread:$0]  %s5286_s29, 16, %s42_s2, [#allocation3]  }
  0x34   :  { %s4254_s20 = scalar_lea.hbm %s5262_s12, 4096 }
  0x35   :  { %p4255_p2 = scmp.ne.s32.totalorder %s5262_s12, %s4254_s20  ;;  %p4258_p3 = scmp.lt.u32.totalorder %s4254_s20, %s5262_s12 }
  0x37   :  { %p4260_p4 = pnand %p4258_p3, %p4255_p2 }
  0x39   :  { %4263 = shalt.err (!%p4260_p4)
}
  0x3a   :  { %s4264_s4 = scalar_lea.vmem %s77_s27, 4096  ;;  %p4269_p6 = scmp.lt.s32.totalorder %s77_s27, %s77_s27 }
  0x3b   :  { %p4265_p5 = scmp.ne.s32.totalorder %s77_s27, %s4264_s4  ;;  %p4270_p7 = scmp.lt.s32.totalorder %s4264_s4, %s4264_s4 }
  0x3d   :  { %p4271_p8 = por %p4270_p7, %p4269_p6 }
  0x3f   :  { %p4272_p9 = pnand %p4271_p8, %p4265_p5 }
  0x41   :  { %4275 = shalt.err (!%p4272_p9)
}
  0x42   :  { %s4309_s2 = smov 128   ;;  %s4310_s29 = smov 8  }
  0x43   :  { %82 = dma.hbm_to_vmem [thread:$0]  %s5262_s12, 4096, %s77_s27, [#allocation5], %s4309_s2, %s4309_s2, %s4310_s29  }
  0x44   :  { %s4311_s25 = smov [#allocation7]   ;;  %s4276_s26 = scalar_lea.hbm %s5263_s13, 32 }
  0x45   :  { %s88_s23 = sshll.u32 %s4311_s25, 4  ;;  %p4277_p10 = scmp.ne.s32.totalorder %s5263_s13, %s4276_s26  ;;  %s89_s23 = int_to_ptr.vmem [resolvable:$true] %s88_s23 }
  0x46   :  { %p4280_p11 = scmp.lt.u32.totalorder %s4276_s26, %s5263_s13 }
  0x48   :  { %p4282_p12 = pnand %p4280_p11, %p4277_p10 }
  0x4a   :  { %4285 = shalt.err (!%p4282_p12)
}
  0x4b   :  { %s4286_s0 = scalar_lea.vmem %s89_s23, 32  ;;  %p4291_p0 = scmp.lt.s32.totalorder %s89_s23, %s89_s23 }
  0x4c   :  { %p4287_p13 = scmp.ne.s32.totalorder %s89_s23, %s4286_s0  ;;  %p4292_p1 = scmp.lt.s32.totalorder %s4286_s0, %s4286_s0 }
  0x4e   :  { %p4293_p2 = por %p4292_p1, %p4291_p0 }
  0x50   :  { %p4294_p3 = pnand %p4293_p2, %p4287_p13 }
  0x52   :  { %4297 = shalt.err (!%p4294_p3)
}
  0x53   :  { %94 = dma.hbm_to_vmem [thread:$0]  %s5263_s13, 32, %s89_s23, [#allocation8], %s4305_s5, %s4305_s5, %s4306_s22  }
  0x54   :  { %4298 = dma.done.wait [#allocation3], 16  }
  0x55   :  { %4299 = vsyncadd [#allocation3], 4294967280 }
  0x56   :  { %4300 = dma.done.wait [#allocation5], 4128  }
  0x57   :  { %4301 = vsyncadd [#allocation5], 4294963168 }
  0x58   :  { %4302 = dma.done.wait [#allocation8], 32  }
  0x59   :  { %4303 = vsyncadd [#allocation8], 4294967264  ;;  %s5287_s29 = sld [smem:[#allocation12_spill]]  ;;  %s5288_s24 = sld [smem:[#allocation16_spill]]  ;;  %v4312_v5 = vmov 0.0   ;;  %vm4313_vm0 = vmmov 0   ;;  %v218_v52 = vlaneseq }
  0x5a   :  { %3681 = vmatprep.subr.bf16.mxu1 %v4312_v5  ;;  %3697 = vmatprep.mubr.msk.bf16.mxu1 %vm4313_vm0, %v4312_v5  ;;  %s5289_s12 = sld [smem:[#allocation14_spill]]  ;;  %v3245_v47 = vld [vmem:[#allocation2] ss:$0 sm:$0xff]  ;;  %s5290_s2 = sld [smem:[#allocation17_spill]]  ;;  %vm464_vm1 = vcmask 261120   ;;  %vm516_vm2 = vcmask 130048  }
  0x5b   :  { %v4582_v53 = vshrl.u32 %v218_v52, 7  ;;  %s5291_s7 = sld [smem:[#allocation13_spill]]  ;;  %s4314_s13 = smov 96   ;;  %vm988_vm3 = vcmask 523264   ;;  %vm991_vm4 = vcmask 785408  }
  0x5c   :  { %s4315_s5 = smov 64   ;;  %s4316_s22 = smov 32  }
  0x5d   :  { %v228_v54 = vsub.s32 2, %v4582_v53  ;;  %v4589_v56 = vsub.s32 0, %v4582_v53  ;;  %v4592_v57 = vsub.s32 1, %v4582_v53  ;;  %s5292_s25 = sld [smem:[#allocation18_spill]]  ;;  %s5293_s1 = sld [smem:[#allocation19_spill]] }
  0x5f   :  { %v122_v0 = vld [vmem:[%s5287_s29] sm:$0xff]  ;;  %v123_v1 = vld [vmem:[%s5287_s29 + $0x8] sm:$0xff]  ;;  %v3950_v9 = vld [vmem:[%s5288_s24 + $0x50] sm:$0xff]  }
  0x60   :  { %126 = vadd.xlane.f32.xlu0 %v122_v0  ;;  %v3944_v2 = vld [vmem:[%s5288_s24 + $0x40] sm:$0xff]   ;;  %v3947_v6 = vld [vmem:[%s5288_s24 + $0x48] sm:$0xff]   ;;  %v3951_v10 = vld [vmem:[%s5288_s24 + $0x90] sm:$0xff]  }
  0x61   :  { %v3945_v3 = vld [vmem:[%s5288_s24 + $0x80] sm:$0xff]   ;;  %3523 = vmatprep.subr.bf16.mxu0 %v3944_v2  ;;  %v3948_v7 = vld [vmem:[%s5288_s24 + $0x88] sm:$0xff]   ;;  %v3952_v11 = vld [vmem:[%s5288_s24 + $0x10] sm:$0xff]  }
  0x62   :  { %v3946_v4 = vld [vmem:[%s5288_s24] sm:$0xff]   ;;  %3682 = vmatpush3.bf16.xpose.msra.mxu1 %v3945_v3  ;;  %v3949_v8 = vld [vmem:[%s5288_s24 + $0x8] sm:$0xff]   ;;  %v3953_v12 = vld [vmem:[%s5288_s24 + $0x58] sm:$0xff]  }
  0x63   :  { %3524 = vmatpush3.bf16.xpose.msra.mxu0 %v3946_v4  ;;  %3683 = vmatprep.subr.bf16.mxu1 %v4312_v5  ;;  %v3954_v13 = vld [vmem:[%s5288_s24 + $0x98] sm:$0xff]   ;;  %v3956_v15 = vld [vmem:[%s5288_s24 + $0x60] sm:$0xff]   ;;  %v3959_v26 = vld [vmem:[%s5288_s24 + $0x68] sm:$0xff]  }
  0x64   :  { %128 = vadd.xlane.f32.xlu0 %v123_v1  ;;  %3525 = vmatprep.subr.bf16.mxu0 %v3947_v6  ;;  %v3955_v14 = vld [vmem:[%s5288_s24 + $0x18] sm:$0xff]   ;;  %v3957_v16 = vld [vmem:[%s5288_s24 + $0xa0] sm:$0xff]   ;;  %v3960_v27 = vld [vmem:[%s5288_s24 + $0xa8] sm:$0xff]  }
  0x65   :  { %v3958_v17 = vld [vmem:[%s5288_s24 + $0x20] sm:$0xff]   ;;  %v3961_v28 = vld [vmem:[%s5288_s24 + $0x28] sm:$0xff]   ;;  %v3962_v29 = vld [vmem:[%s5288_s24 + $0x70] sm:$0xff]  }
  0x66   :  { %v3963_v30 = vld [vmem:[%s5288_s24 + $0xb0] sm:$0xff]   ;;  %v3965_v32 = vld [vmem:[%s5288_s24 + $0x78] sm:$0xff]   ;;  %v3244_v43 = vld [vmem:[%s5289_s12] ss:$0 sm:$0xff] }
  0x67   :  { %v3964_v31 = vld [vmem:[%s5288_s24 + $0x30] sm:$0xff]   ;;  %v3966_v33 = vld [vmem:[%s5288_s24 + $0xb8] sm:$0xff]   ;;  %v216_v55 = vld [vmem:[%s5290_s2] sm:$0x7] }
  0x68   :  { %v3967_v34 = vld [vmem:[%s5288_s24 + $0x38] sm:$0xff]   ;;  %v229_v58 = vrot.slane %v216_v55, %v228_v54  ;;  %v221_v60 = vrot.slane %v216_v55, %v4589_v56  ;;  %v225_v63 = vrot.slane %v216_v55, %v4592_v57 }
  0x6a   :  { %3684 = vmatpush3.bf16.xpose.msra.mxu1 %v3948_v7 }
  0x6b   :  { %3526 = vmatpush3.bf16.xpose.msra.mxu0 %v3949_v8  ;;  %3685 = vmatprep.subr.bf16.mxu1 %v4312_v5 }
  0x6c   :  { %3527 = vmatprep.subr.bf16.mxu0 %v3950_v9 }
  0x72   :  { %3686 = vmatpush3.bf16.xpose.msra.mxu1 %v3951_v10 }
  0x73   :  { %3528 = vmatpush3.bf16.xpose.msra.mxu0 %v3952_v11  ;;  %3687 = vmatprep.subr.bf16.mxu1 %v4312_v5 }
  0x74   :  { %3529 = vmatprep.subr.bf16.mxu0 %v3953_v12 }
  0x7a   :  { %3688 = vmatpush3.bf16.xpose.msra.mxu1 %v3954_v13 }
  0x7b   :  { %3530 = vmatpush3.bf16.xpose.msra.mxu0 %v3955_v14  ;;  %3689 = vmatprep.subr.bf16.mxu1 %v4312_v5 }
  0x7c   :  { %3531 = vmatprep.subr.bf16.mxu0 %v3956_v15 }
  0x82   :  { %3690 = vmatpush3.bf16.xpose.msra.mxu1 %v3957_v16 }
  0x83   :  { %3532 = vmatpush3.bf16.xpose.msra.mxu0 %v3958_v17  ;;  %3691 = vmatprep.subr.bf16.mxu1 %v4312_v5  ;;  %v4616_v17 = vld [vmem:[%s5291_s7] sm:$0xff] }
  0x84   :  { %3533 = vmatprep.subr.bf16.mxu0 %v3959_v26 }
  0x8a   :  { %3692 = vmatpush3.bf16.xpose.msra.mxu1 %v3960_v27 }
  0x8b   :  { %3534 = vmatpush3.bf16.xpose.msra.mxu0 %v3961_v28  ;;  %3693 = vmatprep.subr.bf16.mxu1 %v4312_v5 }
  0x8c   :  { %3535 = vmatprep.subr.bf16.mxu0 %v3962_v29 }
  0x92   :  { %3694 = vmatpush3.bf16.xpose.msra.mxu1 %v3963_v30 }
  0x93   :  { %3536 = vmatpush3.bf16.xpose.msra.mxu0 %v3964_v31  ;;  %3695 = vmatprep.subr.bf16.mxu1 %v4312_v5 }
  0x94   :  { %3537 = vmatprep.subr.bf16.mxu0 %v3965_v32 }
  0x9a   :  { %3696 = vmatpush3.bf16.xpose.msra.mxu1 %v3966_v33 }
  0x9b   :  { %3538 = vmatpush3.bf16.xpose.msra.mxu0 %v3967_v34 }
  0x9c   :  { %3701 = vmatprep.subr.bf16.mxu0 %v4312_v5 }
  0xed   :  { %v127_v18 = vpop.xlane.xlu0 %126 }
  0xee   :  { %v131_v19 = vmul.f32 0.0078125, %v127_v18 }
  0xf0   :  { %v133_v20 = vsub.f32 %v122_v0, %v131_v19 }
  0xf1   :  { %v129_v21 = vpop.xlane.xlu0 %128 }
  0xf2   :  { %v132_v22 = vmul.f32 0.0078125, %v129_v21  ;;  %v135_v23 = vmul.f32 %v133_v20, %v133_v20  ;;  %v4621_v21 = vld [vmem:[%s5291_s7 + $0x8] sm:$0xff] }
  0xf4   :  { %v134_v24 = vsub.f32 %v123_v1, %v132_v22  ;;  %137 = vadd.xlane.f32.xlu1 %v135_v23 }
  0xf6   :  { %v136_v25 = vmul.f32 %v134_v24, %v134_v24 }
  0xf8   :  { %139 = vadd.xlane.f32.xlu1 %v136_v25 }
 0x181   :  { %v138_v35 = vpop.xlane.xlu1 %137 }
 0x182   :  { %v141_v36 = vmul.f32 0.0078125, %v138_v35 }
 0x184   :  { %v143_v37 = vadd.f32 1e-05, %v141_v36 }
 0x185   :  { %v140_v38 = vpop.xlane.xlu1 %139 }
 0x186   :  { %4104 = vrsqrt.f32 %v143_v37  ;;  %v142_v39 = vmul.f32 0.0078125, %v140_v38 }
 0x188   :  { %v144_v40 = vadd.f32 1e-05, %v142_v39 }
 0x18a   :  { %4106 = vrsqrt.f32 %v144_v40 }
 0x190   :  { %v4105_v41 = vpop.eup %4104 }
 0x191   :  { %v147_v42 = vmul.f32 %v4105_v41, %v133_v20 }
 0x193   :  { %v155_v46 = vmul.f32 %v3244_v43, %v147_v42 }
 0x194   :  { %v4107_v44 = vpop.eup %4106 }
 0x195   :  { %v148_v45 = vmul.f32 %v4107_v44, %v134_v24  ;;  %v4573_v49 = vadd.f32 %v3245_v47, %v155_v46 }
 0x197   :  { %v156_v48 = vmul.f32 %v3244_v43, %v148_v45 }
 0x199   :  { %v4575_v50 = vadd.f32 %v3245_v47, %v156_v48 }
 0x19b   :  { %v215_v51 = vpack.c.bf16 %v4575_v50, %v4573_v49 }
 0x19d   :  { %3539 = vmatprep.mubr.bf16.mxu0 %v215_v51  ;;  %3698 = vmatmul.mubr.bf16.vlgmr.msra.gmra.mrb[0].mxu1 %v215_v51 }
 0x19e   :  { %3540 = vmatmul.mubr.bf16.vlgmr.msra.gmra.mrb[0].mxu0 %v215_v51 }
 0x19f   :  { %3703 = vmatprep.mubr.msk.bf16.mxu0 %vm4313_vm0, %v4312_v5 }
 0x270   :  { %v454_v59 = vpop.f32.mrb[0].mxu1 }
 0x271   :  { %v411_v61 = vpop.f32.mrb[0].mxu0  ;;  %v3699_v62 = vpop.f32.mrb[1].mxu1  ;;  %v455_v2 = vadd.f32 %v454_v59, %v229_v58 }
 0x272   :  { %v413_v0 = vpop.f32.mrb[1].mxu0  ;;  %v457_v1 = vpop.f32.mrb[2].mxu1  ;;  %v412_v7 = vadd.f32 %v411_v61, %v221_v60 }
 0x273   :  { %v458_v3 = vadd.f32 %v457_v1, %v229_v58  ;;  %v415_v4 = vpop.f32.mrb[2].mxu0  ;;  %v3700_v6 = vpop.f32.mrb[3].mxu1  ;;  %v414_v10 = vadd.f32 %v413_v0, %v225_v63 }
 0x274   :  { %v416_v8 = vadd.f32 %v415_v4, %v221_v60  ;;  %v417_v9 = vpop.f32.mrb[3].mxu0 }
 0x275   :  { %v4598_v11 = vpack.c.bf16 %v458_v3, %v455_v2  ;;  %v418_v12 = vadd.f32 %v417_v9, %v225_v63 }
 0x276   :  { %v4600_v13 = vpack.c.bf16 %v416_v8, %v412_v7 }
 0x277   :  { %v4602_v14 = vpack.c.bf16 %v418_v12, %v414_v10 }
 0x279   :  { %v469_v15 = vsel %vm464_vm1, %v4602_v14, 0 }
 0x27a   :  { %3702 = vmatpush3.bf16.xpose.msra.mxu0 %v469_v15 }
 0x27b   :  { %3707 = vmatprep.subr.bf16.mxu0 %v4312_v5 }
 0x281   :  { %3704 = vmatmul.mubr.msk.bf16.vlgmr.msra.gmra.mrb[4].mxu0 %vm464_vm1, %v4600_v13 }
 0x282   :  { %3708 = vmatpush3.bf16.msra.mxu0 %v4598_v11  ;;  %3709 = vmatprep.mubr.msk.bf16.mxu0 %vm4313_vm0, %v4312_v5 }
 0x283   :  { %3713 = vmatprep.subr.bf16.mxu0 %v4312_v5 }
 0x354   :  { %v505_v16 = vpop.f32.mrb[4].mxu0 }
 0x355   :  { %v512_v18 = vmul.f32 0.17677669, %v505_v16  ;;  %v3705_v19 = vpop.f32.mrb[5].mxu0 }
 0x356   :  { %v508_v20 = vpop.f32.mrb[6].mxu0 }
 0x357   :  { %v513_v22 = vmul.f32 0.17677669, %v508_v20  ;;  %v3706_v23 = vpop.f32.mrb[7].mxu0  ;;  %v514_v24 = vadd.f32 %v512_v18, %v4616_v17 }
 0x359   :  { %v517_v25 = vsel %vm516_vm2, %v514_v24, -inf  ;;  %v515_v26 = vadd.f32 %v513_v22, %v4621_v21 }
 0x35a   :  { %518 = vmax.xlane.f32.xlu0 %v517_v25 }
 0x35b   :  { %v520_v27 = vsel %vm516_vm2, %v515_v26, -inf }
 0x35c   :  { %521 = vmax.xlane.f32.xlu1 %v520_v27 }
 0x3e7   :  { %v519_v28 = vpop.xlane.xlu0 %518 }
 0x3e8   :  { %v523_v29 = vsub.f32 %v514_v24, %v519_v28 }
 0x3e9   :  { %v522_v30 = vpop.xlane.xlu1 %521 }
 0x3ea   :  { %v525_v31 = vmul.f32 1.442695, %v523_v29  ;;  %v524_v32 = vsub.f32 %v515_v26, %v522_v30 }
 0x3ec   :  { %4108 = vpow2.f32 %v525_v31  ;;  %v527_v33 = vmul.f32 1.442695, %v524_v32 }
 0x3ee   :  { %4110 = vpow2.f32 %v527_v33 }
 0x3f6   :  { %v4109_v34 = vpop.eup %4108 }
 0x3f7   :  { %v529_v35 = vsel %vm516_vm2, %v4109_v34, 0.0 }
 0x3f8   :  { %v4111_v36 = vpop.eup %4110  ;;  %530 = vadd.xlane.f32.xlu0 %v529_v35 }
 0x3f9   :  { %v532_v37 = vsel %vm516_vm2, %v4111_v36, 0.0 }
 0x3fa   :  { %533 = vadd.xlane.f32.xlu1 %v532_v37 }
 0x40b   :  { %585 = vrot.lane.b32.xlu1 %v4600_v13, %s4314_s13 }
 0x40e   :  { %588 = vrot.lane.b32.xlu0 %v4602_v14, %s4314_s13 }
 0x485   :  { %v531_v38 = vpop.xlane.xlu0 %530 }
 0x486   :  { %4112 = vrcp.f32 %v531_v38 }
 0x487   :  { %v534_v39 = vpop.xlane.xlu1 %533 }
 0x488   :  { %4114 = vrcp.f32 %v534_v39 }
 0x489   :  { %v589_v44 = vpop.permute.xlu0 %588 }
 0x48a   :  { %v594_v46 = vsel %vm464_vm1, %v589_v44, 0 }
 0x48b   :  { %v586_v47 = vpop.permute.xlu1 %585 }
 0x490   :  { %v4113_v40 = vpop.eup %4112 }
 0x491   :  { %v537_v42 = vmul.f32 %v4113_v40, %v4109_v34 }
 0x492   :  { %v4115_v41 = vpop.eup %4114 }
 0x493   :  { %v538_v43 = vmul.f32 %v4115_v41, %v4111_v36 }
 0x495   :  { %v539_v45 = vpack.c.bf16 %v538_v43, %v537_v42 }
 0x497   :  { %3710 = vmatmul.mubr.msk.bf16.vlgmr.msra.gmra.mrb[8].mxu0 %vm516_vm2, %v539_v45 }
 0x498   :  { %3714 = vmatpush3.bf16.xpose.msra.mxu0 %v594_v46  ;;  %3715 = vmatprep.mubr.msk.bf16.mxu0 %vm4313_vm0, %v4312_v5 }
 0x499   :  { %3719 = vmatprep.subr.bf16.mxu0 %v4312_v5 }
 0x49f   :  { %3716 = vmatmul.mubr.msk.bf16.vlgmr.msra.gmra.mrb[12].mxu0 %vm464_vm1, %v586_v47 }
 0x4a0   :  { %3721 = vmatprep.mubr.msk.bf16.mxu0 %vm4313_vm0, %v4312_v5 }
 0x56a   :  { %v4641_v48 = vpop.f32.mrb[8].mxu0 }
 0x56b   :  { %v3711_v51 = vpop.f32.mrb[9].mxu0 }
 0x56c   :  { %v4643_v55 = vpop.f32.mrb[10].mxu0 }
 0x56d   :  { %v3712_v58 = vpop.f32.mrb[11].mxu0 }
 0x572   :  { %v630_v59 = vpop.f32.mrb[12].mxu0 }
 0x573   :  { %v637_v60 = vmul.f32 0.17677669, %v630_v59  ;;  %v3717_v61 = vpop.f32.mrb[13].mxu0 }
 0x574   :  { %v633_v62 = vpop.f32.mrb[14].mxu0 }
 0x575   :  { %v638_v63 = vmul.f32 0.17677669, %v633_v62  ;;  %v3718_v0 = vpop.f32.mrb[15].mxu0  ;;  %v639_v1 = vadd.f32 %v637_v60, %v4616_v17 }
 0x577   :  { %v641_v2 = vsel %vm516_vm2, %v639_v1, -inf  ;;  %v640_v3 = vadd.f32 %v638_v63, %v4621_v21 }
 0x578   :  { %642 = vmax.xlane.f32.xlu1 %v641_v2 }
 0x579   :  { %v644_v4 = vsel %vm516_vm2, %v640_v3, -inf }
 0x57a   :  { %645 = vmax.xlane.f32.xlu0 %v644_v4 }
 0x605   :  { %v643_v6 = vpop.xlane.xlu1 %642 }
 0x606   :  { %v647_v7 = vsub.f32 %v639_v1, %v643_v6 }
 0x607   :  { %v646_v8 = vpop.xlane.xlu0 %645 }
 0x608   :  { %v649_v9 = vmul.f32 1.442695, %v647_v7  ;;  %v648_v10 = vsub.f32 %v640_v3, %v646_v8 }
 0x60a   :  { %4116 = vpow2.f32 %v649_v9  ;;  %v651_v12 = vmul.f32 1.442695, %v648_v10 }
 0x60c   :  { %4118 = vpow2.f32 %v651_v12 }
 0x614   :  { %v4117_v15 = vpop.eup %4116 }
 0x615   :  { %v653_v16 = vsel %vm516_vm2, %v4117_v15, 0.0 }
 0x616   :  { %v4119_v18 = vpop.eup %4118  ;;  %654 = vadd.xlane.f32.xlu0 %v653_v16 }
 0x617   :  { %v656_v19 = vsel %vm516_vm2, %v4119_v18, 0.0 }
 0x618   :  { %657 = vadd.xlane.f32.xlu1 %v656_v19 }
 0x629   :  { %714 = vrot.lane.b32.xlu1 %v4602_v14, %s4315_s5 }
 0x62c   :  { %665 = vrot.lane.b32.xlu0 %v4598_v11, %s4314_s13 }
 0x62d   :  { %712 = vrot.lane.b32.xlu1 %v4600_v13, %s4315_s5 }
 0x6a3   :  { %v655_v20 = vpop.xlane.xlu0 %654 }
 0x6a4   :  { %4120 = vrcp.f32 %v655_v20 }
 0x6a5   :  { %v658_v22 = vpop.xlane.xlu1 %657 }
 0x6a6   :  { %4122 = vrcp.f32 %v658_v22 }
 0x6a7   :  { %v666_v23 = vpop.permute.xlu0 %665 }
 0x6a8   :  { %3720 = vmatpush3.bf16.msra.mxu0 %v666_v23 }
 0x6a9   :  { %3725 = vmatprep.subr.bf16.mxu0 %v4312_v5  ;;  %v715_v28 = vpop.permute.xlu1 %714 }
 0x6aa   :  { %v720_v30 = vsel %vm464_vm1, %v715_v28, 0 }
 0x6ad   :  { %v713_v31 = vpop.permute.xlu1 %712 }
 0x6ae   :  { %v4121_v24 = vpop.eup %4120 }
 0x6af   :  { %v661_v26 = vmul.f32 %v4121_v24, %v4117_v15 }
 0x6b0   :  { %v4123_v25 = vpop.eup %4122 }
 0x6b1   :  { %v662_v27 = vmul.f32 %v4123_v25, %v4119_v18 }
 0x6b3   :  { %v663_v29 = vpack.c.bf16 %v662_v27, %v661_v26 }
 0x6b5   :  { %3722 = vmatmul.mubr.msk.bf16.vlgmr.msra.gmra.mrb[16].mxu0 %vm516_vm2, %v663_v29 }
 0x6b6   :  { %3726 = vmatpush3.bf16.xpose.msra.mxu0 %v720_v30  ;;  %3727 = vmatprep.mubr.msk.bf16.mxu0 %vm4313_vm0, %v4312_v5 }
 0x6b7   :  { %3731 = vmatprep.subr.bf16.mxu0 %v4312_v5 }
 0x6bd   :  { %3728 = vmatmul.mubr.msk.bf16.vlgmr.msra.gmra.mrb[20].mxu0 %vm464_vm1, %v713_v31 }
 0x6be   :  { %3733 = vmatprep.mubr.msk.bf16.mxu0 %vm4313_vm0, %v4312_v5 }
 0x788   :  { %v4666_v32 = vpop.f32.mrb[16].mxu0 }
 0x789   :  { %v3723_v33 = vpop.f32.mrb[17].mxu0 }
 0x78a   :  { %v4668_v34 = vpop.f32.mrb[18].mxu0 }
 0x78b   :  { %v3914_v35 = vpack.i.bf16 %v4668_v34, %v4666_v32  ;;  %v3724_v36 = vpop.f32.mrb[19].mxu0  ;;  %v3969_v32 = vld [vmem:[%s5256_s6 + $0x8] sm:$0xff]   ;;  %v3970_v34 = vld [vmem:[%s5256_s6 + $0x10] sm:$0xff]  }
 0x790   :  { %v756_v37 = vpop.f32.mrb[20].mxu0 }
 0x791   :  { %v763_v38 = vmul.f32 0.17677669, %v756_v37  ;;  %v3729_v39 = vpop.f32.mrb[21].mxu0 }
 0x792   :  { %v759_v40 = vpop.f32.mrb[22].mxu0 }
 0x793   :  { %v764_v41 = vmul.f32 0.17677669, %v759_v40  ;;  %v3730_v42 = vpop.f32.mrb[23].mxu0  ;;  %v765_v43 = vadd.f32 %v763_v38, %v4616_v17 }
 0x795   :  { %v767_v44 = vsel %vm516_vm2, %v765_v43, -inf  ;;  %v766_v45 = vadd.f32 %v764_v41, %v4621_v21 }
 0x796   :  { %768 = vmax.xlane.f32.xlu1 %v767_v44 }
 0x797   :  { %v770_v46 = vsel %vm516_vm2, %v766_v45, -inf }
 0x798   :  { %771 = vmax.xlane.f32.xlu0 %v770_v46 }
 0x7a7   :  { %790 = vrot.lane.b32.xlu1 %v4598_v11, %s4315_s5 }
 0x7ab   :  { %837 = vrot.lane.b32.xlu1 %v4600_v13, %s4316_s22 }
 0x823   :  { %v769_v47 = vpop.xlane.xlu1 %768 }
 0x824   :  { %v773_v51 = vsub.f32 %v765_v43, %v769_v47 }
 0x825   :  { %v772_v58 = vpop.xlane.xlu0 %771 }
 0x826   :  { %v775_v59 = vmul.f32 1.442695, %v773_v51  ;;  %v774_v60 = vsub.f32 %v766_v45, %v772_v58 }
 0x827   :  { %v791_v61 = vpop.permute.xlu1 %790 }
 0x828   :  { %4124 = vpow2.f32 %v775_v59  ;;  %v777_v62 = vmul.f32 1.442695, %v774_v60  ;;  %3732 = vmatpush3.bf16.msra.mxu0 %v791_v61  ;;  %v3972_v60 = vld [vmem:[%s5256_s6 + $0x20] sm:$0xff]   ;;  %v3973_v61 = vld [vmem:[%s5256_s6 + $0x28] sm:$0xff]  }
 0x829   :  { %3737 = vmatprep.subr.bf16.mxu0 %v4312_v5 }
 0x82a   :  { %4126 = vpow2.f32 %v777_v62  ;;  %v3974_v62 = vld [vmem:[%s5256_s6 + $0x30] sm:$0xff]  }
 0x832   :  { %v4125_v63 = vpop.eup %4124 }
 0x833   :  { %v779_v0 = vsel %vm516_vm2, %v4125_v63, 0.0 }
 0x834   :  { %v4127_v1 = vpop.eup %4126  ;;  %780 = vadd.xlane.f32.xlu0 %v779_v0 }
 0x835   :  { %v782_v2 = vsel %vm516_vm2, %v4127_v1, 0.0 }
 0x838   :  { %783 = vadd.xlane.f32.xlu0 %v782_v2 }
 0x84e   :  { %839 = vrot.lane.b32.xlu0 %v4602_v14, %s4316_s22  ;;  %v838_v14 = vpop.permute.xlu1 %837 }
 0x8c1   :  { %v781_v13 = vpop.xlane.xlu0 %780 }
 0x8c2   :  { %4128 = vrcp.f32 %v781_v13 }
 0x8c5   :  { %v784_v3 = vpop.xlane.xlu0 %783 }
 0x8c6   :  { %4130 = vrcp.f32 %v784_v3 }
 0x8c9   :  { %v840_v9 = vpop.permute.xlu0 %839 }
 0x8ca   :  { %v845_v12 = vsel %vm464_vm1, %v840_v9, 0 }
 0x8cc   :  { %v4129_v4 = vpop.eup %4128 }
 0x8cd   :  { %v787_v7 = vmul.f32 %v4129_v4, %v4125_v63  ;;  %v3975_v63 = vld [vmem:[%s5256_s6 + $0x38] sm:$0xff]  }
 0x8d0   :  { %v4131_v6 = vpop.eup %4130 }
 0x8d1   :  { %v788_v8 = vmul.f32 %v4131_v6, %v4127_v1 }
 0x8d3   :  { %v789_v10 = vpack.c.bf16 %v788_v8, %v787_v7 }
 0x8d5   :  { %3734 = vmatmul.mubr.msk.bf16.vlgmr.msra.gmra.mrb[24].mxu0 %vm516_vm2, %v789_v10 }
 0x8d6   :  { %3738 = vmatpush3.bf16.xpose.msra.mxu0 %v845_v12  ;;  %3739 = vmatprep.mubr.msk.bf16.mxu0 %vm4313_vm0, %v4312_v5 }
 0x8d7   :  { %3743 = vmatprep.subr.bf16.mxu0 %v4312_v5 }
 0x8dd   :  { %3740 = vmatmul.mubr.msk.bf16.vlgmr.msra.gmra.mrb[28].mxu0 %vm464_vm1, %v838_v14 }
 0x8de   :  { %3745 = vmatprep.mubr.msk.bf16.mxu0 %vm4313_vm0, %v4312_v5 }
 0x9a8   :  { %v830_v15 = vpop.f32.mrb[24].mxu0 }
 0x9a9   :  { %v3735_v16 = vpop.f32.mrb[25].mxu0 }
 0x9aa   :  { %v833_v18 = vpop.f32.mrb[26].mxu0 }
 0x9ab   :  { %v3919_v19 = vpack.i.bf16 %v833_v18, %v830_v15  ;;  %v3736_v20 = vpop.f32.mrb[27].mxu0 }
 0x9b0   :  { %v881_v22 = vpop.f32.mrb[28].mxu0 }
 0x9b1   :  { %v888_v23 = vmul.f32 0.17677669, %v881_v22  ;;  %v3741_v24 = vpop.f32.mrb[29].mxu0 }
 0x9b2   :  { %v884_v25 = vpop.f32.mrb[30].mxu0 }
 0x9b3   :  { %v889_v26 = vmul.f32 0.17677669, %v884_v25  ;;  %v3742_v27 = vpop.f32.mrb[31].mxu0  ;;  %v890_v28 = vadd.f32 %v888_v23, %v4616_v17  ;;  %v3278_v25 = vld [vmem:[#allocation4] ss:$0 sm:$0xff] }
 0x9b5   :  { %v892_v29 = vsel %vm516_vm2, %v890_v28, -inf  ;;  %v891_v30 = vadd.f32 %v889_v26, %v4621_v21 }
 0x9b6   :  { %893 = vmax.xlane.f32.xlu1 %v892_v29 }
 0x9b7   :  { %v895_v31 = vsel %vm516_vm2, %v891_v30, -inf }
 0x9b8   :  { %896 = vmax.xlane.f32.xlu0 %v895_v31 }
 0xa43   :  { %v894_v33 = vpop.xlane.xlu1 %893 }
 0xa44   :  { %v898_v36 = vsub.f32 %v890_v28, %v894_v33  ;;  %v3976_v33 = vld [vmem:[%s5260_s10 + $0x40] sm:$0xff]  }
 0xa45   :  { %v897_v37 = vpop.xlane.xlu0 %896  ;;  %3575 = vmatprep.subr.bf16.mxu1 %v3976_v33 }
 0xa46   :  { %v900_v38 = vmul.f32 1.442695, %v898_v36  ;;  %v899_v39 = vsub.f32 %v891_v30, %v897_v37  ;;  %v3977_v36 = vld [vmem:[%s5260_s10] sm:$0xff]   ;;  %v3978_v37 = vld [vmem:[%s5260_s10 + $0x48] sm:$0xff]  }
 0xa47   :  { %3576 = vmatpush3.bf16.xpose.msra.mxu1 %v3977_v36 }
 0xa48   :  { %4132 = vpow2.f32 %v900_v38  ;;  %v902_v40 = vmul.f32 1.442695, %v899_v39  ;;  %3577 = vmatprep.subr.bf16.mxu1 %v3978_v37  ;;  %v3981_v38 = vld [vmem:[%s5260_s10 + $0x10] sm:$0xff]   ;;  %v3982_v39 = vld [vmem:[%s5260_s10 + $0x58] sm:$0xff]  }
 0xa4a   :  { %4134 = vpow2.f32 %v902_v40  ;;  %v3983_v40 = vld [vmem:[%s5260_s10 + $0x18] sm:$0xff]  }
 0xa52   :  { %v4133_v41 = vpop.eup %4132 }
 0xa53   :  { %v904_v42 = vsel %vm516_vm2, %v4133_v41, 0.0 }
 0xa54   :  { %v4135_v17 = vpop.eup %4134  ;;  %905 = vadd.xlane.f32.xlu0 %v904_v42  ;;  %v3985_v42 = vld [vmem:[%s5260_s10 + $0x20] sm:$0xff]  }
 0xa55   :  { %v907_v43 = vsel %vm516_vm2, %v4135_v17, 0.0 }
 0xa56   :  { %908 = vadd.xlane.f32.xlu1 %v907_v43 }
 0xa67   :  { %3915 = vrot.lane.b32.xlu1 %v3914_v35, %s4316_s22  ;;  %v3971_v35 = vld [vmem:[%s5256_s6 + $0x18] sm:$0xff]  }
 0xa6a   :  { %915 = vrot.lane.b32.xlu0 %v4598_v11, %s4316_s22  ;;  %v3968_v11 = vld [vmem:[%s5256_s6] sm:$0xff]  }
 0xa6b   :  { %3920 = vrot.lane.b32.xlu1 %v3919_v19, %s4315_s5 }
 0xae1   :  { %v906_v21 = vpop.xlane.xlu0 %905 }
 0xae2   :  { %4136 = vrcp.f32 %v906_v21 }
 0xae3   :  { %v909_v44 = vpop.xlane.xlu1 %908 }
 0xae4   :  { %4138 = vrcp.f32 %v909_v44 }
 0xae5   :  { %v916_v45 = vpop.permute.xlu0 %915 }
 0xae6   :  { %3744 = vmatpush3.bf16.msra.mxu0 %v916_v45 }
 0xae7   :  { %3749 = vmatprep.subr.bf16.mxu0 %v4312_v5  ;;  %v3916_v4 = vpop.permute.xlu1 %3915 }
 0xae8   :  { %v3918_v7 = vunpack.i.h.bf16 %v3916_v4  ;;  %v3917_v8 = vunpack.i.l.bf16 %v3916_v4 }
 0xaea   :  { %v987_v14 = vsel %vm464_vm1, %v4643_v55, %v3918_v7  ;;  %v986_v15 = vsel %vm464_vm1, %v4641_v48, %v3917_v8 }
 0xaeb   :  { %v3921_v6 = vpop.permute.xlu1 %3920 }
 0xaec   :  { %v4137_v46 = vpop.eup %4136  ;;  %v3923_v9 = vunpack.i.h.bf16 %v3921_v6  ;;  %v3922_v10 = vunpack.i.l.bf16 %v3921_v6 }
 0xaed   :  { %v912_v51 = vmul.f32 %v4137_v46, %v4133_v41  ;;  %v3984_v41 = vld [vmem:[%s5260_s10 + $0x60] sm:$0xff]  }
 0xaee   :  { %v4139_v47 = vpop.eup %4138  ;;  %v989_v19 = vsel %vm988_vm3, %v986_v15, %v3922_v10  ;;  %v990_v20 = vsel %vm988_vm3, %v987_v14, %v3923_v9  ;;  %v3287_v14 = vld [vmem:[%s5258_s8] ss:$0 sm:$0xff] }
 0xaef   :  { %v913_v58 = vmul.f32 %v4139_v47, %v4135_v17 }
 0xaf1   :  { %v914_v59 = vpack.c.bf16 %v913_v58, %v912_v51  ;;  %v3986_v58 = vld [vmem:[%s5260_s10 + $0x68] sm:$0xff]  }
 0xaf3   :  { %3746 = vmatmul.mubr.msk.bf16.vlgmr.msra.gmra.mrb[32].mxu0 %vm516_vm2, %v914_v59  ;;  %v3987_v59 = vld [vmem:[%s5260_s10 + $0x28] sm:$0xff]  }
 0xaf4   :  { %3765 = vmatprep.mubr.msk.bf16.mxu0 %vm4313_vm0, %v4312_v5  ;;  %3750 = vmatpush3.bf16.xpose.msra.mxu0 %v3968_v11  ;;  %v3988_v11 = vld [vmem:[%s5260_s10 + $0x70] sm:$0xff]  }
 0xaf5   :  { %3751 = vmatprep.subr.bf16.mxu0 %v4312_v5 }
 0xafc   :  { %3752 = vmatpush3.bf16.xpose.msra.mxu0 %v3969_v32  ;;  %v3989_v32 = vld [vmem:[%s5260_s10 + $0x30] sm:$0xff]  }
 0xafd   :  { %3753 = vmatprep.subr.bf16.mxu0 %v4312_v5 }
 0xb04   :  { %3754 = vmatpush3.bf16.xpose.msra.mxu0 %v3970_v34  ;;  %v3990_v34 = vld [vmem:[%s5260_s10 + $0x78] sm:$0xff]  }
 0xb05   :  { %3755 = vmatprep.subr.bf16.mxu0 %v4312_v5 }
 0xb0c   :  { %3756 = vmatpush3.bf16.xpose.msra.mxu0 %v3971_v35  ;;  %v3991_v35 = vld [vmem:[%s5260_s10 + $0x38] sm:$0xff]  }
 0xb0d   :  { %3757 = vmatprep.subr.bf16.mxu0 %v4312_v5 }
 0xb14   :  { %3758 = vmatpush3.bf16.xpose.msra.mxu0 %v3972_v60  ;;  %v3992_v60 = vld [vmem:[#allocation6] ss:$8 sps:$4 sm:$0xff]  }
 0xb15   :  { %3759 = vmatprep.subr.bf16.mxu0 %v4312_v5 }
 0xb1c   :  { %3760 = vmatpush3.bf16.xpose.msra.mxu0 %v3973_v61  ;;  %v3994_v61 = vld [vmem:[#allocation6 + $0x4] ss:$8 sps:$4 sm:$0xff]  }
 0xb1d   :  { %3761 = vmatprep.subr.bf16.mxu0 %v4312_v5 }
 0xb24   :  { %3762 = vmatpush3.bf16.xpose.msra.mxu0 %v3974_v62  ;;  %v3997_v62 = vld [vmem:[#allocation6 + $0x14] ss:$8 sps:$4 sm:$0xff]  }
 0xb25   :  { %3763 = vmatprep.subr.bf16.mxu0 %v4312_v5 }
 0xb2c   :  { %3764 = vmatpush3.bf16.xpose.msra.mxu0 %v3975_v63  ;;  %v3995_v63 = vld [vmem:[#allocation6 + $0x10] ss:$8 sps:$4 sm:$0xff]  }
 0xb2d   :  { %1474 = vmatprep.subr.bf16.mxu0 %v3994_v61 }
 0xbc6   :  { %v955_v0 = vpop.f32.mrb[32].mxu0 }
 0xbc7   :  { %v3747_v1 = vpop.f32.mrb[33].mxu0 }
 0xbc8   :  { %v958_v2 = vpop.f32.mrb[34].mxu0  ;;  %v3998_v1 = vld [vmem:[#allocation6 + $0x20] ss:$8 sps:$4 sm:$0xff]  }
 0xbc9   :  { %v3924_v13 = vpack.i.bf16 %v958_v2, %v955_v0  ;;  %v3748_v3 = vpop.f32.mrb[35].mxu0  ;;  %v4000_v0 = vld [vmem:[#allocation6 + $0x24] ss:$8 sps:$4 sm:$0xff]   ;;  %v4003_v2 = vld [vmem:[#allocation6 + $0x34] ss:$8 sps:$4 sm:$0xff]  }
 0xbcb   :  { %3925 = vrot.lane.b32.xlu1 %v3924_v13, %s4314_s13  ;;  %v4001_v13 = vld [vmem:[#allocation6 + $0x30] ss:$8 sps:$4 sm:$0xff]  }
 0xc3d   :  { %v3926_v12 = vpop.permute.xlu1 %3925 }
 0xc3e   :  { %v3928_v16 = vunpack.i.h.bf16 %v3926_v12  ;;  %v3927_v18 = vunpack.i.l.bf16 %v3926_v12 }
 0xc40   :  { %v993_v22 = vsel %vm991_vm4, %v990_v20, %v3928_v16  ;;  %v992_v23 = vsel %vm991_vm4, %v989_v19, %v3927_v18  ;;  %v3288_v19 = vld [vmem:[%s5259_s9] ss:$0 sm:$0xff] }
 0xc41   :  { %v1010_v24 = vpack.c.bf16 %v993_v22, %v992_v23 }
 0xc43   :  { %3766 = vmatmul.mubr.bf16.vlgmr.msra.gmra.mrb[36].mxu0 %v1010_v24 }
 0xc44   :  { %1475 = vmatpush1.bf16.xpose.msra.mxu0 %v3992_v60 }
 0xc45   :  { %1476 = vmatprep.subr.bf16.mxu0 %v3997_v62 }
 0xc4c   :  { %1477 = vmatpush1.bf16.xpose.msra.mxu0 %v3995_v63 }
 0xc4d   :  { %1478 = vmatprep.subr.bf16.mxu0 %v4000_v0 }
 0xc54   :  { %1479 = vmatpush1.bf16.xpose.msra.mxu0 %v3998_v1 }
 0xc55   :  { %1480 = vmatprep.subr.bf16.mxu0 %v4003_v2 }
 0xc5c   :  { %1481 = vmatpush1.bf16.xpose.msra.mxu0 %v4001_v13 }
 0xd16   :  { %v1100_v26 = vpop.f32.mrb[36].mxu0 }
 0xd17   :  { %v1101_v27 = vadd.f32 %v3278_v25, %v1100_v26  ;;  %v3767_v28 = vpop.f32.mrb[37].mxu0  ;;  %v4004_v26 = vld [vmem:[#allocation6 + $0x40] ss:$8 sps:$4 sm:$0xff]  }
 0xd18   :  { %v1103_v55 = vpop.f32.mrb[38].mxu0  ;;  %v4007_v28 = vld [vmem:[#allocation6 + $0x50] ss:$8 sps:$4 sm:$0xff]  }
 0xd19   :  { %v1104_v29 = vadd.f32 %v3278_v25, %v1103_v55  ;;  %v3768_v30 = vpop.f32.mrb[39].mxu0  ;;  %v1107_v48 = vadd.f32 %v1101_v27, %v4573_v49  ;;  %v3979_v49 = vld [vmem:[%s5260_s10 + $0x8] sm:$0xff]   ;;  %v4009_v27 = vld [vmem:[#allocation6 + $0x54] ss:$8 sps:$4 sm:$0xff]  }
 0xd1a   :  { %3578 = vmatpush3.bf16.xpose.msra.mxu1 %v3979_v49  ;;  %v4006_v25 = vld [vmem:[#allocation6 + $0x44] ss:$8 sps:$4 sm:$0xff]   ;;  %v4015_v30 = vld [vmem:[#allocation6 + $0x74] ss:$8 sps:$4 sm:$0xff]  }
 0xd1b   :  { %1111 = vadd.xlane.f32.xlu0 %v1107_v48  ;;  %v1108_v31 = vadd.f32 %v1104_v29, %v4575_v50  ;;  %v3980_v50 = vld [vmem:[%s5260_s10 + $0x50] sm:$0xff]   ;;  %1482 = vmatprep.subr.bf16.mxu0 %v4006_v25  ;;  %v4010_v29 = vld [vmem:[#allocation6 + $0x60] ss:$8 sps:$4 sm:$0xff]  }
 0xd1c   :  { %3579 = vmatprep.subr.bf16.mxu1 %v3980_v50  ;;  %1483 = vmatpush1.bf16.xpose.msra.mxu0 %v4004_v26  ;;  %v4012_v55 = vld [vmem:[#allocation6 + $0x64] ss:$8 sps:$4 sm:$0xff]   ;;  %v3305_v26 = vld [vmem:[#allocation7] ss:$0 sm:$0xff] }
 0xd1d   :  { %1113 = vadd.xlane.f32.xlu1 %v1108_v31  ;;  %1484 = vmatprep.subr.bf16.mxu0 %v4009_v27 }
 0xd22   :  { %3580 = vmatpush3.bf16.xpose.msra.mxu1 %v3981_v38 }
 0xd23   :  { %3581 = vmatprep.subr.bf16.mxu1 %v3982_v39 }
 0xd24   :  { %1485 = vmatpush1.bf16.xpose.msra.mxu0 %v4007_v28 }
 0xd25   :  { %1486 = vmatprep.subr.bf16.mxu0 %v4012_v55 }
 0xd2a   :  { %3582 = vmatpush3.bf16.xpose.msra.mxu1 %v3983_v40 }
 0xd2b   :  { %3583 = vmatprep.subr.bf16.mxu1 %v3984_v41 }
 0xd2c   :  { %1487 = vmatpush1.bf16.xpose.msra.mxu0 %v4010_v29 }
 0xd2d   :  { %1488 = vmatprep.subr.bf16.mxu0 %v4015_v30 }
 0xd32   :  { %3584 = vmatpush3.bf16.xpose.msra.mxu1 %v3985_v42 }
 0xd33   :  { %3585 = vmatprep.subr.bf16.mxu1 %v3986_v58 }
 0xd3a   :  { %3586 = vmatpush3.bf16.xpose.msra.mxu1 %v3987_v59 }
 0xd3b   :  { %3587 = vmatprep.subr.bf16.mxu1 %v3988_v11 }
 0xd42   :  { %3588 = vmatpush3.bf16.xpose.msra.mxu1 %v3989_v32 }
 0xd43   :  { %3589 = vmatprep.subr.bf16.mxu1 %v3990_v34 }
 0xd4a   :  { %3590 = vmatpush3.bf16.xpose.msra.mxu1 %v3991_v35 }
 0xda8   :  { %v1112_v17 = vpop.xlane.xlu0 %1111 }
 0xda9   :  { %v1115_v43 = vmul.f32 0.0078125, %v1112_v17 }
 0xdaa   :  { %v1114_v21 = vpop.xlane.xlu1 %1113 }
 0xdab   :  { %v1117_v44 = vsub.f32 %v1107_v48, %v1115_v43  ;;  %v1116_v45 = vmul.f32 0.0078125, %v1114_v21  ;;  %v4013_v48 = vld [vmem:[#allocation6 + $0x70] ss:$8 sps:$4 sm:$0xff]  }
 0xdac   :  { %1489 = vmatpush1.bf16.xpose.msra.mxu0 %v4013_v48 }
 0xdad   :  { %v1118_v46 = vsub.f32 %v1108_v31, %v1116_v45  ;;  %v1119_v47 = vmul.f32 %v1117_v44, %v1117_v44  ;;  %3769 = vmatprep.subr.bf16.mxu0 %v4312_v5  ;;  %v1182_v31 = vld [vmem:[%s5261_s11] sm:$0x3] }
 0xdae   :  { %v1187_v33 = vrot.slane %v1182_v31, %v4589_v56  ;;  %v1191_v36 = vrot.slane %v1182_v31, %v4592_v57 }
 0xdaf   :  { %1121 = vadd.xlane.f32.xlu0 %v1119_v47  ;;  %v1120_v51 = vmul.f32 %v1118_v46, %v1118_v46 }
 0xdb3   :  { %1123 = vadd.xlane.f32.xlu0 %v1120_v51 }
 0xe3c   :  { %v1122_v3 = vpop.xlane.xlu0 %1121 }
 0xe3d   :  { %v1125_v4 = vmul.f32 0.0078125, %v1122_v3 }
 0xe3f   :  { %v1127_v6 = vadd.f32 1e-05, %v1125_v4 }
 0xe40   :  { %v1124_v7 = vpop.xlane.xlu0 %1123 }
 0xe41   :  { %4140 = vrsqrt.f32 %v1127_v6  ;;  %v1126_v8 = vmul.f32 0.0078125, %v1124_v7 }
 0xe43   :  { %v1128_v9 = vadd.f32 1e-05, %v1126_v8 }
 0xe45   :  { %4142 = vrsqrt.f32 %v1128_v9 }
 0xe4b   :  { %v4141_v10 = vpop.eup %4140 }
 0xe4c   :  { %v1131_v12 = vmul.f32 %v4141_v10, %v1117_v44 }
 0xe4e   :  { %v1139_v18 = vmul.f32 %v3287_v14, %v1131_v12 }
 0xe4f   :  { %v4143_v15 = vpop.eup %4142 }
 0xe50   :  { %v1132_v16 = vmul.f32 %v4143_v15, %v1118_v46  ;;  %v4806_v22 = vadd.f32 %v3288_v19, %v1139_v18 }
 0xe52   :  { %v1140_v20 = vmul.f32 %v3287_v14, %v1132_v16 }
 0xe54   :  { %v4808_v23 = vadd.f32 %v3288_v19, %v1140_v20 }
 0xe56   :  { %v1181_v24 = vpack.c.bf16 %v4808_v23, %v4806_v22 }
 0xe58   :  { %3591 = vmatprep.mubr.bf16.mxu1 %v1181_v24 }
 0xe59   :  { %3592 = vmatmul.mubr.bf16.vlgmr.msra.gmra.mrb[4].mxu1 %v1181_v24 }
 0xf2c   :  { %v1324_v37 = vpop.f32.mrb[4].mxu1 }
 0xf2d   :  { %v1325_v49 = vadd.f32 %v1324_v37, %v1187_v33  ;;  %v1326_v50 = vpop.f32.mrb[5].mxu1  ;;  %v4017_v37 = vld [vmem:[%s5288_s24 + $0x140] sm:$0xff]  }
 0xf2e   :  { %v1327_v38 = vadd.f32 %v1326_v50, %v1191_v36  ;;  %v1328_v39 = vpop.f32.mrb[6].mxu1  ;;  %v4021_v50 = vld [vmem:[%s5288_s24 + $0xc8] sm:$0xff]  }
 0xf2f   :  { %v1333_v40 = vmul.f32 %v1325_v49, %v1325_v49  ;;  %v1329_v41 = vadd.f32 %v1328_v39, %v1187_v33  ;;  %v1330_v42 = vpop.f32.mrb[7].mxu1  ;;  %v4023_v39 = vld [vmem:[%s5288_s24 + $0x150] sm:$0xff]  }
 0xf30   :  { %v1334_v17 = vmul.f32 %v1327_v38, %v1327_v38  ;;  %v1331_v43 = vadd.f32 %v1330_v42, %v1191_v36  ;;  %v4016_v36 = vld [vmem:[%s5288_s24 + $0x100] sm:$0xff]   ;;  %v4026_v42 = vld [vmem:[%s5288_s24 + $0x158] sm:$0xff]  }
 0xf31   :  { %v1337_v21 = vmul.f32 %v1333_v40, %v1325_v49  ;;  %v1335_v44 = vmul.f32 %v1329_v41, %v1329_v41  ;;  %3593 = vmatprep.subr.bf16.mxu1 %v4016_v36  ;;  %v4024_v40 = vld [vmem:[%s5288_s24 + $0xd0] sm:$0xff]  }
 0xf32   :  { %v1338_v45 = vmul.f32 %v1334_v17, %v1327_v38  ;;  %v1336_v46 = vmul.f32 %v1331_v43, %v1331_v43  ;;  %v4027_v17 = vld [vmem:[%s5288_s24 + $0xd8] sm:$0xff]  }
 0xf33   :  { %v1341_v47 = vmul.f32 0.044715, %v1337_v21  ;;  %v1339_v51 = vmul.f32 %v1335_v44, %v1329_v41  ;;  %v4029_v21 = vld [vmem:[%s5288_s24 + $0x160] sm:$0xff]  }
 0xf34   :  { %v1342_v58 = vmul.f32 0.044715, %v1338_v45  ;;  %v1340_v59 = vmul.f32 %v1336_v46, %v1331_v43  ;;  %v4030_v44 = vld [vmem:[%s5288_s24 + $0xe0] sm:$0xff]  }
 0xf35   :  { %v1345_v11 = vadd.f32 %v1341_v47, %v1325_v49  ;;  %v1343_v32 = vmul.f32 0.044715, %v1339_v51 }
 0xf36   :  { %v1346_v34 = vadd.f32 %v1342_v58, %v1327_v38  ;;  %v1344_v35 = vmul.f32 0.044715, %v1340_v59 }
 0xf37   :  { %v1349_v60 = vmul.f32 0.7978846, %v1345_v11  ;;  %v1347_v61 = vadd.f32 %v1343_v32, %v1329_v41 }
 0xf38   :  { %v1350_v62 = vmul.f32 0.7978846, %v1346_v34  ;;  %v1348_v63 = vadd.f32 %v1344_v35, %v1331_v43  ;;  %v4031_v34 = vld [vmem:[%s5288_s24 + $0x128] sm:$0xff]  }
 0xf39   :  { %4144 = vtanh.f32 %v1349_v60  ;;  %v1351_v0 = vmul.f32 0.7978846, %v1347_v61  ;;  %v4032_v35 = vld [vmem:[%s5288_s24 + $0x168] sm:$0xff]   ;;  %v4034_v61 = vld [vmem:[%s5288_s24 + $0x130] sm:$0xff]  }
 0xf3a   :  { %4146 = vtanh.f32 %v1350_v62  ;;  %v1352_v1 = vmul.f32 0.7978846, %v1348_v63  ;;  %v4033_v60 = vld [vmem:[%s5288_s24 + $0xe8] sm:$0xff]   ;;  %v4035_v62 = vld [vmem:[%s5288_s24 + $0x170] sm:$0xff]  }
 0xf3b   :  { %4148 = vtanh.f32 %v1351_v0  ;;  %v4036_v63 = vld [vmem:[%s5288_s24 + $0xf0] sm:$0xff]   ;;  %v4037_v0 = vld [vmem:[%s5288_s24 + $0x138] sm:$0xff]  }
 0xf3c   :  { %4150 = vtanh.f32 %v1352_v1  ;;  %v4038_v1 = vld [vmem:[%s5288_s24 + $0x178] sm:$0xff]  }
 0xf43   :  { %v4145_v2 = vpop.eup %4144 }
 0xf44   :  { %v4147_v13 = vpop.eup %4146  ;;  %v1357_v3 = vadd.f32 1.0, %v4145_v2  ;;  %v4039_v2 = vld [vmem:[%s5288_s24 + $0xf8] sm:$0xff]  }
 0xf45   :  { %v4149_v4 = vpop.eup %4148  ;;  %v1358_v6 = vadd.f32 1.0, %v4147_v13 }
 0xf46   :  { %v4151_v7 = vpop.eup %4150  ;;  %v1361_v8 = vmul.f32 0.5, %v1357_v3  ;;  %v1359_v9 = vadd.f32 1.0, %v4149_v4 }
 0xf47   :  { %v1360_v10 = vadd.f32 1.0, %v4151_v7  ;;  %v1362_v12 = vmul.f32 0.5, %v1358_v6 }
 0xf48   :  { %v1363_v14 = vmul.f32 0.5, %v1359_v9  ;;  %v1365_v16 = vmul.f32 %v1361_v8, %v1325_v49  ;;  %v4018_v49 = vld [vmem:[%s5288_s24 + $0xc0] sm:$0xff]  }
 0xf49   :  { %v1364_v15 = vmul.f32 0.5, %v1360_v10  ;;  %v1366_v19 = vmul.f32 %v1362_v12, %v1327_v38  ;;  %3594 = vmatpush3.bf16.xpose.msra.mxu1 %v4018_v49  ;;  %v4022_v38 = vld [vmem:[%s5288_s24 + $0x110] sm:$0xff]   ;;  %v3322_v10 = vld [vmem:[%s5264_s14] ss:$0 sm:$0xff] }
 0xf4a   :  { %v1367_v18 = vmul.f32 %v1363_v14, %v1329_v41  ;;  %v4025_v41 = vld [vmem:[%s5288_s24 + $0x118] sm:$0xff]  }
 0xf4b   :  { %v1368_v20 = vmul.f32 %v1364_v15, %v1331_v43  ;;  %v4028_v43 = vld [vmem:[%s5288_s24 + $0x120] sm:$0xff]  }
 0xf4c   :  { %v1385_v24 = vpack.c.bf16 %v1367_v18, %v1365_v16  ;;  %v3323_v18 = vld [vmem:[%s5265_s15] ss:$0 sm:$0xff] }
 0xf4d   :  { %v1386_v25 = vpack.c.bf16 %v1368_v20, %v1366_v19 }
 0xf4f   :  { %1506 = vmatprep.mubr.bf16.mxu0 %v1386_v25 }
 0xf50   :  { %1507 = vmatmul.mubr.bf16.vlgmr.msra.gmra.mrb[40].mxu0 %v1385_v24 }
 0xf51   :  { %3785 = vmatprep.mubr.msk.bf16.mxu0 %vm4313_vm0, %v4312_v5  ;;  %3770 = vmatpush3.bf16.xpose.msra.mxu0 %v4017_v37 }
 0xf52   :  { %3771 = vmatprep.subr.bf16.mxu0 %v4312_v5 }
0x1023   :  { %v1508_v27 = vpop.f32.mrb[40].mxu0 }
0x1024   :  { %v1509_v28 = vadd.f32 %v3305_v26, %v1508_v27  ;;  %v1510_v55 = vpop.f32.mrb[41].mxu0 }
0x1025   :  { %v1511_v29 = vpop.f32.mrb[42].mxu0 }
0x1026   :  { %v1512_v30 = vadd.f32 %v3305_v26, %v1511_v29  ;;  %v1513_v48 = vpop.f32.mrb[43].mxu0  ;;  %v1515_v31 = vadd.f32 %v1509_v28, %v4806_v22  ;;  %v4019_v22 = vld [vmem:[%s5288_s24 + $0x108] sm:$0xff]   ;;  %v3372_v26 = vld [vmem:[%s5290_s2 + $0x3] sm:$0x7] }
0x1027   :  { %3595 = vmatprep.subr.bf16.mxu1 %v4019_v22  ;;  %v1621_v27 = vrot.slane %v3372_v26, %v228_v54  ;;  %v1613_v55 = vrot.slane %v3372_v26, %v4589_v56  ;;  %v1617_v48 = vrot.slane %v3372_v26, %v4592_v57 }
0x1028   :  { %1519 = vadd.xlane.f32.xlu0 %v1515_v31  ;;  %v1516_v33 = vadd.f32 %v1512_v30, %v4808_v23  ;;  %v4020_v23 = vld [vmem:[%s5288_s24 + $0x148] sm:$0xff]   ;;  %3596 = vmatpush3.bf16.xpose.msra.mxu1 %v4021_v50 }
0x1029   :  { %3772 = vmatpush3.bf16.xpose.msra.mxu0 %v4020_v23  ;;  %3597 = vmatprep.subr.bf16.mxu1 %v4022_v38 }
0x102a   :  { %1521 = vadd.xlane.f32.xlu1 %v1516_v33  ;;  %3773 = vmatprep.subr.bf16.mxu0 %v4312_v5 }
0x1030   :  { %3598 = vmatpush3.bf16.xpose.msra.mxu1 %v4024_v40 }
0x1031   :  { %3774 = vmatpush3.bf16.xpose.msra.mxu0 %v4023_v39  ;;  %3599 = vmatprep.subr.bf16.mxu1 %v4025_v41 }
0x1032   :  { %3775 = vmatprep.subr.bf16.mxu0 %v4312_v5 }
0x1038   :  { %3600 = vmatpush3.bf16.xpose.msra.mxu1 %v4027_v17 }
0x1039   :  { %3776 = vmatpush3.bf16.xpose.msra.mxu0 %v4026_v42  ;;  %3601 = vmatprep.subr.bf16.mxu1 %v4028_v43 }
0x103a   :  { %3777 = vmatprep.subr.bf16.mxu0 %v4312_v5 }
0x1040   :  { %3602 = vmatpush3.bf16.xpose.msra.mxu1 %v4030_v44 }
0x1041   :  { %3778 = vmatpush3.bf16.xpose.msra.mxu0 %v4029_v21  ;;  %3603 = vmatprep.subr.bf16.mxu1 %v4031_v34 }
0x1042   :  { %3779 = vmatprep.subr.bf16.mxu0 %v4312_v5 }
0x1048   :  { %3604 = vmatpush3.bf16.xpose.msra.mxu1 %v4033_v60 }
0x1049   :  { %3780 = vmatpush3.bf16.xpose.msra.mxu0 %v4032_v35  ;;  %3605 = vmatprep.subr.bf16.mxu1 %v4034_v61 }
0x104a   :  { %3781 = vmatprep.subr.bf16.mxu0 %v4312_v5 }
0x1050   :  { %3606 = vmatpush3.bf16.xpose.msra.mxu1 %v4036_v63 }
0x1051   :  { %3782 = vmatpush3.bf16.xpose.msra.mxu0 %v4035_v62  ;;  %3607 = vmatprep.subr.bf16.mxu1 %v4037_v0 }
0x1052   :  { %3783 = vmatprep.subr.bf16.mxu0 %v4312_v5 }
0x1058   :  { %3608 = vmatpush3.bf16.xpose.msra.mxu1 %v4039_v2 }
0x1059   :  { %3784 = vmatpush3.bf16.xpose.msra.mxu0 %v4038_v1  ;;  %3789 = vmatprep.subr.bf16.mxu1 %v4312_v5 }
0x105a   :  { %3837 = vmatprep.subr.bf16.mxu0 %v4312_v5 }
0x10b5   :  { %v1520_v45 = vpop.xlane.xlu0 %1519 }
0x10b6   :  { %v1523_v46 = vmul.f32 0.0078125, %v1520_v45 }
0x10b7   :  { %v1522_v47 = vpop.xlane.xlu1 %1521 }
0x10b8   :  { %v1525_v51 = vsub.f32 %v1515_v31, %v1523_v46  ;;  %v1524_v58 = vmul.f32 0.0078125, %v1522_v47  ;;  %v4944_v47 = vld [vmem:[%s5291_s7] sm:$0xff] }
0x10ba   :  { %v1526_v59 = vsub.f32 %v1516_v33, %v1524_v58  ;;  %v1527_v11 = vmul.f32 %v1525_v51, %v1525_v51 }
0x10bc   :  { %1529 = vadd.xlane.f32.xlu0 %v1527_v11  ;;  %v1528_v32 = vmul.f32 %v1526_v59, %v1526_v59 }
0x10be   :  { %1531 = vadd.xlane.f32.xlu1 %v1528_v32 }
0x1149   :  { %v1530_v13 = vpop.xlane.xlu0 %1529 }
0x114a   :  { %v1533_v3 = vmul.f32 0.0078125, %v1530_v13 }
0x114b   :  { %v1532_v4 = vpop.xlane.xlu1 %1531 }
0x114c   :  { %v1535_v6 = vadd.f32 1e-05, %v1533_v3  ;;  %v1534_v7 = vmul.f32 0.0078125, %v1532_v4 }
0x114e   :  { %4152 = vrsqrt.f32 %v1535_v6  ;;  %v1536_v8 = vadd.f32 1e-05, %v1534_v7 }
0x1150   :  { %4154 = vrsqrt.f32 %v1536_v8 }
0x1158   :  { %v4153_v9 = vpop.eup %4152 }
0x1159   :  { %v1539_v12 = vmul.f32 %v4153_v9, %v1525_v51 }
0x115a   :  { %v4155_v14 = vpop.eup %4154 }
0x115b   :  { %v1540_v15 = vmul.f32 %v4155_v14, %v1526_v59  ;;  %v1547_v16 = vmul.f32 %v3322_v10, %v1539_v12  ;;  %v4951_v59 = vld [vmem:[%s5291_s7 + $0x8] sm:$0xff] }
0x115d   :  { %v1548_v19 = vmul.f32 %v3322_v10, %v1540_v15  ;;  %v4909_v20 = vadd.f32 %v3323_v18, %v1547_v16 }
0x115f   :  { %v4911_v24 = vadd.f32 %v3323_v18, %v1548_v19 }
0x1161   :  { %v1606_v25 = vpack.c.bf16 %v4911_v24, %v4909_v20 }
0x1163   :  { %3609 = vmatprep.mubr.bf16.mxu1 %v1606_v25  ;;  %3786 = vmatmul.mubr.bf16.vlgmr.msra.gmra.mrb[44].mxu0 %v1606_v25 }
0x1164   :  { %3610 = vmatmul.mubr.bf16.vlgmr.msra.gmra.mrb[8].mxu1 %v1606_v25  ;;  %3853 = vmatprep.mubr.msk.bf16.mxu0 %vm4313_vm0, %v4312_v5 }
0x1165   :  { %3791 = vmatprep.mubr.msk.bf16.mxu1 %vm4313_vm0, %v4312_v5 }
0x1236   :  { %v1846_v28 = vpop.f32.mrb[44].mxu0 }
0x1237   :  { %v1803_v29 = vpop.f32.mrb[8].mxu1  ;;  %v3787_v30 = vpop.f32.mrb[45].mxu0  ;;  %v1847_v36 = vadd.f32 %v1846_v28, %v1621_v27 }
0x1238   :  { %v1805_v31 = vpop.f32.mrb[9].mxu1  ;;  %v1849_v33 = vpop.f32.mrb[46].mxu0  ;;  %v1804_v23 = vadd.f32 %v1803_v29, %v1613_v55 }
0x1239   :  { %v1850_v37 = vadd.f32 %v1849_v33, %v1621_v27  ;;  %v1807_v49 = vpop.f32.mrb[10].mxu1  ;;  %v3788_v22 = vpop.f32.mrb[47].mxu0  ;;  %v1806_v39 = vadd.f32 %v1805_v31, %v1617_v48 }
0x123a   :  { %v1808_v50 = vadd.f32 %v1807_v49, %v1613_v55  ;;  %v1809_v38 = vpop.f32.mrb[11].mxu1 }
0x123b   :  { %v4926_v40 = vpack.c.bf16 %v1850_v37, %v1847_v36  ;;  %v1810_v53 = vadd.f32 %v1809_v38, %v1617_v48 }
0x123c   :  { %v4928_v54 = vpack.c.bf16 %v1808_v50, %v1804_v23 }
0x123d   :  { %v4930_v41 = vpack.c.bf16 %v1810_v53, %v1806_v39 }
0x123f   :  { %v1860_v42 = vsel %vm464_vm1, %v4930_v41, 0 }
0x1240   :  { %3790 = vmatpush3.bf16.xpose.msra.mxu1 %v1860_v42 }
0x1241   :  { %3795 = vmatprep.subr.bf16.mxu1 %v4312_v5 }
0x1247   :  { %3792 = vmatmul.mubr.msk.bf16.vlgmr.msra.gmra.mrb[12].mxu1 %vm464_vm1, %v4928_v54 }
0x1248   :  { %3796 = vmatpush3.bf16.msra.mxu1 %v4926_v40  ;;  %3797 = vmatprep.mubr.msk.bf16.mxu1 %vm4313_vm0, %v4312_v5 }
0x1249   :  { %3801 = vmatprep.subr.bf16.mxu1 %v4312_v5 }
0x131a   :  { %v1896_v17 = vpop.f32.mrb[12].mxu1 }
0x131b   :  { %v1903_v43 = vmul.f32 0.17677669, %v1896_v17  ;;  %v3793_v21 = vpop.f32.mrb[13].mxu1 }
0x131c   :  { %v1899_v44 = vpop.f32.mrb[14].mxu1 }
0x131d   :  { %v1904_v45 = vmul.f32 0.17677669, %v1899_v44  ;;  %v3794_v46 = vpop.f32.mrb[15].mxu1  ;;  %v1905_v51 = vadd.f32 %v4944_v47, %v1903_v43 }
0x131f   :  { %v1907_v58 = vsel %vm516_vm2, %v1905_v51, -inf  ;;  %v1906_v11 = vadd.f32 %v4951_v59, %v1904_v45 }
0x1320   :  { %1908 = vmax.xlane.f32.xlu0 %v1907_v58 }
0x1321   :  { %v1910_v32 = vsel %vm516_vm2, %v1906_v11, -inf }
0x1322   :  { %1911 = vmax.xlane.f32.xlu1 %v1910_v32 }
0x13ad   :  { %v1909_v34 = vpop.xlane.xlu0 %1908 }
0x13ae   :  { %v1913_v35 = vsub.f32 %v1905_v51, %v1909_v34 }
0x13af   :  { %v1912_v60 = vpop.xlane.xlu1 %1911 }
0x13b0   :  { %v1915_v61 = vmul.f32 1.442695, %v1913_v35  ;;  %v1914_v62 = vsub.f32 %v1906_v11, %v1912_v60 }
0x13b2   :  { %4156 = vpow2.f32 %v1915_v61  ;;  %v1917_v63 = vmul.f32 1.442695, %v1914_v62 }
0x13b4   :  { %4158 = vpow2.f32 %v1917_v63 }
0x13bc   :  { %v4157_v0 = vpop.eup %4156 }
0x13bd   :  { %v1919_v1 = vsel %vm516_vm2, %v4157_v0, 0.0 }
0x13be   :  { %v4159_v2 = vpop.eup %4158  ;;  %1920 = vadd.xlane.f32.xlu0 %v1919_v1 }
0x13bf   :  { %v1922_v13 = vsel %vm516_vm2, %v4159_v2, 0.0 }
0x13c0   :  { %1923 = vadd.xlane.f32.xlu1 %v1922_v13 }
0x13d1   :  { %1975 = vrot.lane.b32.xlu1 %v4928_v54, %s4314_s13 }
0x13d4   :  { %1978 = vrot.lane.b32.xlu0 %v4930_v41, %s4314_s13 }
0x144b   :  { %v1921_v3 = vpop.xlane.xlu0 %1920 }
0x144c   :  { %4160 = vrcp.f32 %v1921_v3 }
0x144d   :  { %v1924_v4 = vpop.xlane.xlu1 %1923 }
0x144e   :  { %4162 = vrcp.f32 %v1924_v4 }
0x144f   :  { %v1979_v10 = vpop.permute.xlu0 %1978 }
0x1450   :  { %v1984_v14 = vsel %vm464_vm1, %v1979_v10, 0 }
0x1451   :  { %v1976_v15 = vpop.permute.xlu1 %1975 }
0x1456   :  { %v4161_v6 = vpop.eup %4160 }
0x1457   :  { %v1927_v8 = vmul.f32 %v4161_v6, %v4157_v0 }
0x1458   :  { %v4163_v7 = vpop.eup %4162 }
0x1459   :  { %v1928_v9 = vmul.f32 %v4163_v7, %v4159_v2 }
0x145b   :  { %v1929_v12 = vpack.c.bf16 %v1928_v9, %v1927_v8 }
0x145d   :  { %3798 = vmatmul.mubr.msk.bf16.vlgmr.msra.gmra.mrb[16].mxu1 %vm516_vm2, %v1929_v12 }
0x145e   :  { %3802 = vmatpush3.bf16.xpose.msra.mxu1 %v1984_v14  ;;  %3803 = vmatprep.mubr.msk.bf16.mxu1 %vm4313_vm0, %v4312_v5 }
0x145f   :  { %3807 = vmatprep.subr.bf16.mxu1 %v4312_v5 }
0x1465   :  { %3804 = vmatmul.mubr.msk.bf16.vlgmr.msra.gmra.mrb[20].mxu1 %vm464_vm1, %v1976_v15 }
0x1466   :  { %3809 = vmatprep.mubr.msk.bf16.mxu1 %vm4313_vm0, %v4312_v5 }
0x1530   :  { %v4969_v16 = vpop.f32.mrb[16].mxu1 }
0x1531   :  { %v3799_v18 = vpop.f32.mrb[17].mxu1 }
0x1532   :  { %v4971_v19 = vpop.f32.mrb[18].mxu1 }
0x1533   :  { %v3800_v25 = vpop.f32.mrb[19].mxu1 }
0x1538   :  { %v2020_v26 = vpop.f32.mrb[20].mxu1 }
0x1539   :  { %v2027_v27 = vmul.f32 0.17677669, %v2020_v26  ;;  %v3805_v28 = vpop.f32.mrb[21].mxu1 }
0x153a   :  { %v2023_v55 = vpop.f32.mrb[22].mxu1 }
0x153b   :  { %v2028_v29 = vmul.f32 0.17677669, %v2023_v55  ;;  %v3806_v30 = vpop.f32.mrb[23].mxu1  ;;  %v2029_v48 = vadd.f32 %v4944_v47, %v2027_v27 }
0x153d   :  { %v2031_v31 = vsel %vm516_vm2, %v2029_v48, -inf  ;;  %v2030_v33 = vadd.f32 %v4951_v59, %v2028_v29 }
0x153e   :  { %2032 = vmax.xlane.f32.xlu1 %v2031_v31 }
0x153f   :  { %v2034_v36 = vsel %vm516_vm2, %v2030_v33, -inf }
0x1540   :  { %2035 = vmax.xlane.f32.xlu0 %v2034_v36 }
0x15cb   :  { %v2033_v37 = vpop.xlane.xlu1 %2032 }
0x15cc   :  { %v2037_v49 = vsub.f32 %v2029_v48, %v2033_v37 }
0x15cd   :  { %v2036_v22 = vpop.xlane.xlu0 %2035 }
0x15ce   :  { %v2039_v23 = vmul.f32 1.442695, %v2037_v49  ;;  %v2038_v50 = vsub.f32 %v2030_v33, %v2036_v22 }
0x15d0   :  { %4164 = vpow2.f32 %v2039_v23  ;;  %v2041_v38 = vmul.f32 1.442695, %v2038_v50 }
0x15d2   :  { %4166 = vpow2.f32 %v2041_v38 }
0x15da   :  { %v4165_v39 = vpop.eup %4164 }
0x15db   :  { %v2043_v53 = vsel %vm516_vm2, %v4165_v39, 0.0 }
0x15dc   :  { %v4167_v42 = vpop.eup %4166  ;;  %2044 = vadd.xlane.f32.xlu0 %v2043_v53 }
0x15dd   :  { %v2046_v17 = vsel %vm516_vm2, %v4167_v42, 0.0 }
0x15de   :  { %2047 = vadd.xlane.f32.xlu1 %v2046_v17 }
0x15ef   :  { %2104 = vrot.lane.b32.xlu1 %v4930_v41, %s4315_s5 }
0x15f2   :  { %2055 = vrot.lane.b32.xlu0 %v4926_v40, %s4314_s13 }
0x15f3   :  { %2102 = vrot.lane.b32.xlu1 %v4928_v54, %s4315_s5 }
0x1669   :  { %v2045_v43 = vpop.xlane.xlu0 %2044 }
0x166a   :  { %4168 = vrcp.f32 %v2045_v43 }
0x166b   :  { %v2048_v21 = vpop.xlane.xlu1 %2047 }
0x166c   :  { %4170 = vrcp.f32 %v2048_v21 }
0x166d   :  { %v2056_v44 = vpop.permute.xlu0 %2055 }
0x166e   :  { %3808 = vmatpush3.bf16.msra.mxu1 %v2056_v44 }
0x166f   :  { %3813 = vmatprep.subr.bf16.mxu1 %v4312_v5  ;;  %v2105_v11 = vpop.permute.xlu1 %2104 }
0x1670   :  { %v2110_v34 = vsel %vm464_vm1, %v2105_v11, 0 }
0x1673   :  { %v2103_v35 = vpop.permute.xlu1 %2102 }
0x1674   :  { %v4169_v45 = vpop.eup %4168 }
0x1675   :  { %v2051_v51 = vmul.f32 %v4169_v45, %v4165_v39 }
0x1676   :  { %v4171_v46 = vpop.eup %4170 }
0x1677   :  { %v2052_v58 = vmul.f32 %v4171_v46, %v4167_v42 }
0x1679   :  { %v2053_v32 = vpack.c.bf16 %v2052_v58, %v2051_v51 }
0x167b   :  { %3810 = vmatmul.mubr.msk.bf16.vlgmr.msra.gmra.mrb[24].mxu1 %vm516_vm2, %v2053_v32 }
0x167c   :  { %3814 = vmatpush3.bf16.xpose.msra.mxu1 %v2110_v34  ;;  %3815 = vmatprep.mubr.msk.bf16.mxu1 %vm4313_vm0, %v4312_v5 }
0x167d   :  { %3819 = vmatprep.subr.bf16.mxu1 %v4312_v5 }
0x1683   :  { %3816 = vmatmul.mubr.msk.bf16.vlgmr.msra.gmra.mrb[28].mxu1 %vm464_vm1, %v2103_v35 }
0x1684   :  { %3821 = vmatprep.mubr.msk.bf16.mxu1 %vm4313_vm0, %v4312_v5 }
0x174e   :  { %v4994_v60 = vpop.f32.mrb[24].mxu1 }
0x174f   :  { %v3811_v61 = vpop.f32.mrb[25].mxu1 }
0x1750   :  { %v4996_v62 = vpop.f32.mrb[26].mxu1 }
0x1751   :  { %v3929_v63 = vpack.i.bf16 %v4996_v62, %v4994_v60  ;;  %v3812_v0 = vpop.f32.mrb[27].mxu1  ;;  %v4040_v60 = vld [vmem:[%s5256_s6 + $0x40] sm:$0xff]   ;;  %v4042_v62 = vld [vmem:[%s5256_s6 + $0x50] sm:$0xff]  }
0x1752   :  { %3838 = vmatpush3.bf16.xpose.msra.mxu0 %v4040_v60  ;;  %v4062_v60 = vld [vmem:[%s5260_s10 + $0xf8] sm:$0xff]  }
0x1753   :  { %3839 = vmatprep.subr.bf16.mxu0 %v4312_v5 }
0x1756   :  { %v2146_v1 = vpop.f32.mrb[28].mxu1 }
0x1757   :  { %v2153_v2 = vmul.f32 0.17677669, %v2146_v1  ;;  %v3817_v13 = vpop.f32.mrb[29].mxu1 }
0x1758   :  { %v2149_v3 = vpop.f32.mrb[30].mxu1 }
0x1759   :  { %v2154_v4 = vmul.f32 0.17677669, %v2149_v3  ;;  %v3818_v6 = vpop.f32.mrb[31].mxu1  ;;  %v2155_v7 = vadd.f32 %v4944_v47, %v2153_v2 }
0x175b   :  { %v2157_v8 = vsel %vm516_vm2, %v2155_v7, -inf  ;;  %v2156_v9 = vadd.f32 %v4951_v59, %v2154_v4 }
0x175c   :  { %2158 = vmax.xlane.f32.xlu1 %v2157_v8 }
0x175d   :  { %v2160_v10 = vsel %vm516_vm2, %v2156_v9, -inf }
0x175e   :  { %2161 = vmax.xlane.f32.xlu0 %v2160_v10 }
0x176d   :  { %2180 = vrot.lane.b32.xlu1 %v4926_v40, %s4315_s5 }
0x1771   :  { %2227 = vrot.lane.b32.xlu1 %v4928_v54, %s4316_s22 }
0x17e9   :  { %v2159_v12 = vpop.xlane.xlu1 %2158 }
0x17ea   :  { %v2163_v14 = vsub.f32 %v2155_v7, %v2159_v12 }
0x17eb   :  { %v2162_v15 = vpop.xlane.xlu0 %2161 }
0x17ec   :  { %v2165_v18 = vmul.f32 1.442695, %v2163_v14  ;;  %v2164_v25 = vsub.f32 %v2156_v9, %v2162_v15  ;;  %v4044_v15 = vld [vmem:[%s5256_s6 + $0x60] sm:$0xff]  }
0x17ed   :  { %v2181_v26 = vpop.permute.xlu1 %2180 }
0x17ee   :  { %4172 = vpow2.f32 %v2165_v18  ;;  %v2167_v27 = vmul.f32 1.442695, %v2164_v25  ;;  %3820 = vmatpush3.bf16.msra.mxu1 %v2181_v26  ;;  %v4045_v18 = vld [vmem:[%s5256_s6 + $0x68] sm:$0xff]   ;;  %v4046_v25 = vld [vmem:[%s5256_s6 + $0x70] sm:$0xff]   ;;  %v4047_v26 = vld [vmem:[%s5256_s6 + $0x78] sm:$0xff]  }
0x17ef   :  { %3825 = vmatprep.subr.bf16.mxu1 %v4312_v5 }
0x17f0   :  { %4174 = vpow2.f32 %v2167_v27 }
0x17f8   :  { %v4173_v28 = vpop.eup %4172 }
0x17f9   :  { %v2169_v55 = vsel %vm516_vm2, %v4173_v28, 0.0 }
0x17fa   :  { %v4175_v29 = vpop.eup %4174  ;;  %2170 = vadd.xlane.f32.xlu0 %v2169_v55 }
0x17fb   :  { %v2172_v30 = vsel %vm516_vm2, %v4175_v29, 0.0 }
0x17fe   :  { %2173 = vadd.xlane.f32.xlu0 %v2172_v30 }
0x1814   :  { %2229 = vrot.lane.b32.xlu0 %v4930_v41, %s4316_s22  ;;  %v2228_v41 = vpop.permute.xlu1 %2227 }
0x1887   :  { %v2171_v54 = vpop.xlane.xlu0 %2170 }
0x1888   :  { %4176 = vrcp.f32 %v2171_v54 }
0x188b   :  { %v2174_v48 = vpop.xlane.xlu0 %2173 }
0x188c   :  { %4178 = vrcp.f32 %v2174_v48 }
0x188f   :  { %v2230_v49 = vpop.permute.xlu0 %2229 }
0x1890   :  { %v2235_v23 = vsel %vm464_vm1, %v2230_v49, 0 }
0x1892   :  { %v4177_v31 = vpop.eup %4176 }
0x1893   :  { %v2177_v36 = vmul.f32 %v4177_v31, %v4173_v28 }
0x1896   :  { %v4179_v33 = vpop.eup %4178 }
0x1897   :  { %v2178_v37 = vmul.f32 %v4179_v33, %v4175_v29 }
0x1899   :  { %v2179_v22 = vpack.c.bf16 %v2178_v37, %v2177_v36 }
0x189b   :  { %3822 = vmatmul.mubr.msk.bf16.vlgmr.msra.gmra.mrb[32].mxu1 %vm516_vm2, %v2179_v22 }
0x189c   :  { %3826 = vmatpush3.bf16.xpose.msra.mxu1 %v2235_v23  ;;  %3827 = vmatprep.mubr.msk.bf16.mxu1 %vm4313_vm0, %v4312_v5 }
0x189d   :  { %3831 = vmatprep.subr.bf16.mxu1 %v4312_v5 }
0x18a3   :  { %3828 = vmatmul.mubr.msk.bf16.vlgmr.msra.gmra.mrb[36].mxu1 %vm464_vm1, %v2228_v41 }
0x18a4   :  { %3833 = vmatprep.mubr.msk.bf16.mxu1 %vm4313_vm0, %v4312_v5 }
0x196e   :  { %v2220_v50 = vpop.f32.mrb[32].mxu1 }
0x196f   :  { %v3823_v38 = vpop.f32.mrb[33].mxu1 }
0x1970   :  { %v2223_v39 = vpop.f32.mrb[34].mxu1 }
0x1971   :  { %v3934_v53 = vpack.i.bf16 %v2223_v39, %v2220_v50  ;;  %v3824_v42 = vpop.f32.mrb[35].mxu1 }
0x1976   :  { %v2271_v17 = vpop.f32.mrb[36].mxu1 }
0x1977   :  { %v2278_v43 = vmul.f32 0.17677669, %v2271_v17  ;;  %v3829_v21 = vpop.f32.mrb[37].mxu1 }
0x1978   :  { %v2274_v44 = vpop.f32.mrb[38].mxu1 }
0x1979   :  { %v2279_v45 = vmul.f32 0.17677669, %v2274_v44  ;;  %v3830_v46 = vpop.f32.mrb[39].mxu1  ;;  %v2280_v51 = vadd.f32 %v4944_v47, %v2278_v43  ;;  %v3421_v43 = vld [vmem:[#allocation4 + $0x1] ss:$0 sm:$0xff] }
0x197b   :  { %v2282_v58 = vsel %vm516_vm2, %v2280_v51, -inf  ;;  %v2281_v11 = vadd.f32 %v4951_v59, %v2279_v45 }
0x197c   :  { %2283 = vmax.xlane.f32.xlu1 %v2282_v58 }
0x197d   :  { %v2285_v32 = vsel %vm516_vm2, %v2281_v11, -inf }
0x197e   :  { %2286 = vmax.xlane.f32.xlu0 %v2285_v32  ;;  %v4049_v32 = vld [vmem:[%s5260_s10 + $0x80] sm:$0xff]  }
0x1a09   :  { %v2284_v34 = vpop.xlane.xlu1 %2283 }
0x1a0a   :  { %v2288_v35 = vsub.f32 %v2280_v51, %v2284_v34  ;;  %v4050_v34 = vld [vmem:[%s5260_s10 + $0xc8] sm:$0xff]  }
0x1a0b   :  { %v2287_v61 = vpop.xlane.xlu0 %2286 }
0x1a0c   :  { %v2290_v0 = vmul.f32 1.442695, %v2288_v35  ;;  %v2289_v1 = vsub.f32 %v2281_v11, %v2287_v61  ;;  %v4048_v11 = vld [vmem:[%s5260_s10 + $0xc0] sm:$0xff]   ;;  %v4053_v35 = vld [vmem:[%s5260_s10 + $0x90] sm:$0xff]   ;;  %v4054_v61 = vld [vmem:[%s5260_s10 + $0xd8] sm:$0xff]  }
0x1a0e   :  { %4180 = vpow2.f32 %v2290_v0  ;;  %v2292_v2 = vmul.f32 1.442695, %v2289_v1  ;;  %v4055_v0 = vld [vmem:[%s5260_s10 + $0x98] sm:$0xff]   ;;  %v4056_v1 = vld [vmem:[%s5260_s10 + $0xe0] sm:$0xff]  }
0x1a10   :  { %4182 = vpow2.f32 %v2292_v2  ;;  %v4057_v2 = vld [vmem:[%s5260_s10 + $0xa0] sm:$0xff]  }
0x1a18   :  { %v4181_v13 = vpop.eup %4180 }
0x1a19   :  { %v2294_v3 = vsel %vm516_vm2, %v4181_v13, 0.0 }
0x1a1a   :  { %v4183_v47 = vpop.eup %4182  ;;  %2295 = vadd.xlane.f32.xlu0 %v2294_v3 }
0x1a1b   :  { %v2297_v4 = vsel %vm516_vm2, %v4183_v47, 0.0 }
0x1a1c   :  { %2298 = vadd.xlane.f32.xlu1 %v2297_v4 }
0x1a2d   :  { %3930 = vrot.lane.b32.xlu1 %v3929_v63, %s4316_s22  ;;  %v4043_v63 = vld [vmem:[%s5256_s6 + $0x58] sm:$0xff]  }
0x1a30   :  { %2305 = vrot.lane.b32.xlu0 %v4926_v40, %s4316_s22  ;;  %v4041_v40 = vld [vmem:[%s5256_s6 + $0x48] sm:$0xff]  }
0x1a31   :  { %3935 = vrot.lane.b32.xlu1 %v3934_v53, %s4315_s5  ;;  %3840 = vmatpush3.bf16.xpose.msra.mxu0 %v4041_v40  ;;  %v4063_v40 = vld [vmem:[%s5260_s10 + $0xb8] sm:$0xff]  }
0x1a32   :  { %3841 = vmatprep.subr.bf16.mxu0 %v4312_v5 }
0x1a39   :  { %3842 = vmatpush3.bf16.xpose.msra.mxu0 %v4042_v62  ;;  %v4064_v62 = vld [vmem:[#allocation6 + $0x80] ss:$8 sps:$4 sm:$0xff]  }
0x1a3a   :  { %3843 = vmatprep.subr.bf16.mxu0 %v4312_v5 }
0x1a41   :  { %3844 = vmatpush3.bf16.xpose.msra.mxu0 %v4043_v63  ;;  %v4066_v63 = vld [vmem:[#allocation6 + $0x84] ss:$8 sps:$4 sm:$0xff]  }
0x1a42   :  { %3845 = vmatprep.subr.bf16.mxu0 %v4312_v5 }
0x1a49   :  { %3846 = vmatpush3.bf16.xpose.msra.mxu0 %v4044_v15  ;;  %v4069_v15 = vld [vmem:[#allocation6 + $0x94] ss:$8 sps:$4 sm:$0xff]  }
0x1a4a   :  { %3847 = vmatprep.subr.bf16.mxu0 %v4312_v5 }
0x1a51   :  { %3848 = vmatpush3.bf16.xpose.msra.mxu0 %v4045_v18  ;;  %v4067_v18 = vld [vmem:[#allocation6 + $0x90] ss:$8 sps:$4 sm:$0xff]  }
0x1a52   :  { %3849 = vmatprep.subr.bf16.mxu0 %v4312_v5 }
0x1a59   :  { %3850 = vmatpush3.bf16.xpose.msra.mxu0 %v4046_v25  ;;  %v4072_v25 = vld [vmem:[#allocation6 + $0xa4] ss:$8 sps:$4 sm:$0xff]  }
0x1a5a   :  { %3851 = vmatprep.subr.bf16.mxu0 %v4312_v5 }
0x1a61   :  { %3852 = vmatpush3.bf16.xpose.msra.mxu0 %v4047_v26  ;;  %v4070_v26 = vld [vmem:[#allocation6 + $0xa0] ss:$8 sps:$4 sm:$0xff]  }
0x1a62   :  { %2870 = vmatprep.subr.bf16.mxu0 %v4066_v63 }
0x1aa7   :  { %v2296_v59 = vpop.xlane.xlu0 %2295 }
0x1aa8   :  { %4184 = vrcp.f32 %v2296_v59 }
0x1aa9   :  { %v2299_v6 = vpop.xlane.xlu1 %2298 }
0x1aaa   :  { %4186 = vrcp.f32 %v2299_v6 }
0x1aab   :  { %v2306_v7 = vpop.permute.xlu0 %2305 }
0x1aac   :  { %3832 = vmatpush3.bf16.msra.mxu1 %v2306_v7 }
0x1aad   :  { %v3931_v54 = vpop.permute.xlu1 %3930  ;;  %3645 = vmatprep.subr.bf16.mxu1 %v4048_v11 }
0x1aae   :  { %v3933_v31 = vunpack.i.h.bf16 %v3931_v54  ;;  %v3932_v33 = vunpack.i.l.bf16 %v3931_v54 }
0x1ab0   :  { %v2377_v22 = vsel %vm464_vm1, %v4971_v19, %v3933_v31  ;;  %v2376_v23 = vsel %vm464_vm1, %v4969_v16, %v3932_v33 }
0x1ab1   :  { %v3936_v48 = vpop.permute.xlu1 %3935 }
0x1ab2   :  { %v4185_v8 = vpop.eup %4184  ;;  %v3938_v36 = vunpack.i.h.bf16 %v3936_v48  ;;  %v3937_v37 = vunpack.i.l.bf16 %v3936_v48 }
0x1ab3   :  { %v2302_v10 = vmul.f32 %v4185_v8, %v4181_v13 }
0x1ab4   :  { %v4187_v9 = vpop.eup %4186  ;;  %v2378_v38 = vsel %vm988_vm3, %v2376_v23, %v3937_v37  ;;  %v2379_v39 = vsel %vm988_vm3, %v2377_v22, %v3938_v36  ;;  %v3432_v37 = vld [vmem:[%s5258_s8 + $0x1] ss:$0 sm:$0xff] }
0x1ab5   :  { %v2303_v12 = vmul.f32 %v4187_v9, %v4183_v47  ;;  %v4058_v9 = vld [vmem:[%s5260_s10 + $0xe8] sm:$0xff]  }
0x1ab7   :  { %v2304_v14 = vpack.c.bf16 %v2303_v12, %v2302_v10  ;;  %v4059_v10 = vld [vmem:[%s5260_s10 + $0xa8] sm:$0xff]   ;;  %v4060_v12 = vld [vmem:[%s5260_s10 + $0xf0] sm:$0xff]  }
0x1ab9   :  { %3834 = vmatmul.mubr.msk.bf16.vlgmr.msra.gmra.mrb[40].mxu1 %vm516_vm2, %v2304_v14  ;;  %v4061_v14 = vld [vmem:[%s5260_s10 + $0xb0] sm:$0xff]  }
0x1aba   :  { %3646 = vmatpush3.bf16.xpose.msra.mxu1 %v4049_v32 }
0x1abb   :  { %3647 = vmatprep.subr.bf16.mxu1 %v4050_v34 }
0x1b8c   :  { %v2345_v27 = vpop.f32.mrb[40].mxu1 }
0x1b8d   :  { %v3835_v28 = vpop.f32.mrb[41].mxu1 }
0x1b8e   :  { %v2348_v55 = vpop.f32.mrb[42].mxu1  ;;  %v4073_v28 = vld [vmem:[#allocation6 + $0xb0] ss:$8 sps:$4 sm:$0xff]  }
0x1b8f   :  { %v3939_v29 = vpack.i.bf16 %v2348_v55, %v2345_v27  ;;  %v3836_v30 = vpop.f32.mrb[43].mxu1  ;;  %v4075_v27 = vld [vmem:[#allocation6 + $0xb4] ss:$8 sps:$4 sm:$0xff]  }
0x1b91   :  { %3940 = vrot.lane.b32.xlu1 %v3939_v29, %s4314_s13 }
0x1c03   :  { %v3941_v49 = vpop.permute.xlu1 %3940 }
0x1c04   :  { %v3943_v41 = vunpack.i.h.bf16 %v3941_v49  ;;  %v3942_v50 = vunpack.i.l.bf16 %v3941_v49 }
0x1c06   :  { %v2381_v53 = vsel %vm991_vm4, %v2379_v39, %v3943_v41  ;;  %v2380_v42 = vsel %vm991_vm4, %v2378_v38, %v3942_v50  ;;  %v3433_v41 = vld [vmem:[%s5259_s9 + $0x1] ss:$0 sm:$0xff] }
0x1c07   :  { %v2399_v17 = vpack.c.bf16 %v2381_v53, %v2380_v42  ;;  %v4078_v42 = vld [vmem:[#allocation6 + $0xc4] ss:$8 sps:$4 sm:$0xff]  }
0x1c09   :  { %3854 = vmatmul.mubr.bf16.vlgmr.msra.gmra.mrb[48].mxu0 %v2399_v17  ;;  %v4076_v17 = vld [vmem:[#allocation6 + $0xc0] ss:$8 sps:$4 sm:$0xff]  }
0x1c0a   :  { %2871 = vmatpush1.bf16.xpose.msra.mxu0 %v4064_v62 }
0x1c0b   :  { %2872 = vmatprep.subr.bf16.mxu0 %v4069_v15 }
0x1c12   :  { %2873 = vmatpush1.bf16.xpose.msra.mxu0 %v4067_v18 }
0x1c13   :  { %2874 = vmatprep.subr.bf16.mxu0 %v4072_v25 }
0x1c1a   :  { %2875 = vmatpush1.bf16.xpose.msra.mxu0 %v4070_v26 }
0x1c1b   :  { %2876 = vmatprep.subr.bf16.mxu0 %v4075_v27 }
0x1c22   :  { %2877 = vmatpush1.bf16.xpose.msra.mxu0 %v4073_v28 }
0x1c23   :  { %2878 = vmatprep.subr.bf16.mxu0 %v4078_v42 }
0x1c2a   :  { %2879 = vmatpush1.bf16.xpose.msra.mxu0 %v4076_v17 }
0x1cdc   :  { %v2490_v21 = vpop.f32.mrb[48].mxu0 }
0x1cdd   :  { %v2491_v44 = vadd.f32 %v3421_v43, %v2490_v21  ;;  %v3855_v45 = vpop.f32.mrb[49].mxu0  ;;  %v4079_v21 = vld [vmem:[#allocation6 + $0xd0] ss:$8 sps:$4 sm:$0xff]  }
0x1cde   :  { %v2493_v19 = vpop.f32.mrb[50].mxu0  ;;  %v4082_v45 = vld [vmem:[#allocation6 + $0xe0] ss:$8 sps:$4 sm:$0xff]  }
0x1cdf   :  { %v2494_v46 = vadd.f32 %v3421_v43, %v2493_v19  ;;  %v3856_v51 = vpop.f32.mrb[51].mxu0  ;;  %v2497_v16 = vadd.f32 %v2491_v44, %v4909_v20  ;;  %v4051_v20 = vld [vmem:[%s5260_s10 + $0x88] sm:$0xff]   ;;  %v4081_v43 = vld [vmem:[#allocation6 + $0xd4] ss:$8 sps:$4 sm:$0xff]  }
0x1ce0   :  { %3648 = vmatpush3.bf16.xpose.msra.mxu1 %v4051_v20  ;;  %2880 = vmatprep.subr.bf16.mxu0 %v4081_v43  ;;  %v4084_v44 = vld [vmem:[#allocation6 + $0xe4] ss:$8 sps:$4 sm:$0xff]   ;;  %v4087_v19 = vld [vmem:[#allocation6 + $0xf4] ss:$8 sps:$4 sm:$0xff]  }
0x1ce1   :  { %2503 = vadd.xlane.f32.xlu0 %v2497_v16  ;;  %v2498_v58 = vadd.f32 %v2494_v46, %v4911_v24  ;;  %v4052_v24 = vld [vmem:[%s5260_s10 + $0xd0] sm:$0xff]   ;;  %2881 = vmatpush1.bf16.xpose.msra.mxu0 %v4079_v21  ;;  %v3466_v51 = vld [vmem:[%s5261_s11 + $0x2] sm:$0x3] }
0x1ce2   :  { %3649 = vmatprep.subr.bf16.mxu1 %v4052_v24  ;;  %2882 = vmatprep.subr.bf16.mxu0 %v4084_v44  ;;  %v4085_v46 = vld [vmem:[#allocation6 + $0xf0] ss:$8 sps:$4 sm:$0xff]  }
0x1ce3   :  { %2505 = vadd.xlane.f32.xlu1 %v2498_v58 }
0x1ce8   :  { %3650 = vmatpush3.bf16.xpose.msra.mxu1 %v4053_v35 }
0x1ce9   :  { %3651 = vmatprep.subr.bf16.mxu1 %v4054_v61  ;;  %2883 = vmatpush1.bf16.xpose.msra.mxu0 %v4082_v45 }
0x1cea   :  { %2884 = vmatprep.subr.bf16.mxu0 %v4087_v19  ;;  %v4088_v19 = vld [vmem:[%s5268_s18] sm:$0xff]  }
0x1cf0   :  { %3652 = vmatpush3.bf16.xpose.msra.mxu1 %v4055_v0 }
0x1cf1   :  { %3653 = vmatprep.subr.bf16.mxu1 %v4056_v1  ;;  %2885 = vmatpush1.bf16.xpose.msra.mxu0 %v4085_v46  ;;  %v3035_v46 = vsel %vm464_vm1, %v4088_v19, 0 }
0x1cf8   :  { %3654 = vmatpush3.bf16.xpose.msra.mxu1 %v4057_v2 }
0x1cf9   :  { %3655 = vmatprep.subr.bf16.mxu1 %v4058_v9 }
0x1d00   :  { %3656 = vmatpush3.bf16.xpose.msra.mxu1 %v4059_v10 }
0x1d01   :  { %3657 = vmatprep.subr.bf16.mxu1 %v4060_v12 }
0x1d08   :  { %3658 = vmatpush3.bf16.xpose.msra.mxu1 %v4061_v14 }
0x1d09   :  { %3659 = vmatprep.subr.bf16.mxu1 %v4062_v60 }
0x1d10   :  { %3660 = vmatpush3.bf16.xpose.msra.mxu1 %v4063_v40 }
0x1d11   :  { %3857 = vmatprep.subr.bf16.mxu1 %v4312_v5 }
0x1d6e   :  { %v2504_v13 = vpop.xlane.xlu0 %2503 }
0x1d6f   :  { %v2507_v3 = vmul.f32 0.0078125, %v2504_v13 }
0x1d70   :  { %v2506_v47 = vpop.xlane.xlu1 %2505 }
0x1d71   :  { %v2509_v4 = vsub.f32 %v2497_v16, %v2507_v3  ;;  %v2508_v59 = vmul.f32 0.0078125, %v2506_v47  ;;  %v2581_v16 = vrot.slane %v3466_v51, %v4589_v56 }
0x1d73   :  { %v2510_v6 = vsub.f32 %v2498_v58, %v2508_v59  ;;  %v2511_v7 = vmul.f32 %v2509_v4, %v2509_v4  ;;  %v2585_v58 = vrot.slane %v3466_v51, %v4592_v57  ;;  %v4089_v51 = vld [vmem:[%s5268_s18 + $0x8] sm:$0xff]  }
0x1d75   :  { %2513 = vadd.xlane.f32.xlu0 %v2511_v7  ;;  %v2512_v8 = vmul.f32 %v2510_v6, %v2510_v6 }
0x1d79   :  { %2515 = vadd.xlane.f32.xlu0 %v2512_v8 }
0x1e02   :  { %v2514_v55 = vpop.xlane.xlu0 %2513 }
0x1e03   :  { %v2517_v29 = vmul.f32 0.0078125, %v2514_v55 }
0x1e05   :  { %v2519_v30 = vadd.f32 1e-05, %v2517_v29 }
0x1e06   :  { %v2516_v54 = vpop.xlane.xlu0 %2515 }
0x1e07   :  { %4188 = vrsqrt.f32 %v2519_v30  ;;  %v2518_v48 = vmul.f32 0.0078125, %v2516_v54 }
0x1e09   :  { %v2520_v31 = vadd.f32 1e-05, %v2518_v48 }
0x1e0b   :  { %4190 = vrsqrt.f32 %v2520_v31 }
0x1e11   :  { %v4189_v33 = vpop.eup %4188 }
0x1e12   :  { %v2523_v36 = vmul.f32 %v4189_v33, %v2509_v4 }
0x1e14   :  { %v2531_v23 = vmul.f32 %v3432_v37, %v2523_v36 }
0x1e15   :  { %v4191_v49 = vpop.eup %4190 }
0x1e16   :  { %v2524_v22 = vmul.f32 %v4191_v49, %v2510_v6  ;;  %v5132_v38 = vadd.f32 %v3433_v41, %v2531_v23 }
0x1e18   :  { %v2532_v50 = vmul.f32 %v3432_v37, %v2524_v22 }
0x1e1a   :  { %v5134_v39 = vadd.f32 %v3433_v41, %v2532_v50  ;;  %v3483_v41 = vld [vmem:[#allocation7 + $0x1] ss:$0 sm:$0xff] }
0x1e1c   :  { %v2574_v53 = vpack.c.bf16 %v5134_v39, %v5132_v38 }
0x1e1e   :  { %3661 = vmatprep.mubr.bf16.mxu1 %v2574_v53 }
0x1e1f   :  { %3662 = vmatmul.mubr.bf16.vlgmr.msra.gmra.mrb[44].mxu1 %v2574_v53 }
0x1e20   :  { %3873 = vmatprep.mubr.msk.bf16.mxu1 %vm4313_vm0, %v4312_v5  ;;  %3858 = vmatpush3.bf16.xpose.msra.mxu1 %v3035_v46 }
0x1e21   :  { %3859 = vmatprep.subr.bf16.mxu1 %v4312_v5 }
0x1ef2   :  { %v2718_v11 = vpop.f32.mrb[44].mxu1 }
0x1ef3   :  { %v2719_v32 = vadd.f32 %v2718_v11, %v2581_v16  ;;  %v2720_v34 = vpop.f32.mrb[45].mxu1 }
0x1ef4   :  { %v2721_v20 = vadd.f32 %v2720_v34, %v2585_v58  ;;  %v2722_v24 = vpop.f32.mrb[46].mxu1 }
0x1ef5   :  { %v2727_v35 = vmul.f32 %v2719_v32, %v2719_v32  ;;  %v2723_v61 = vadd.f32 %v2722_v24, %v2581_v16  ;;  %v2724_v0 = vpop.f32.mrb[47].mxu1  ;;  %v3038_v16 = vsel %vm464_vm1, %v4089_v51, 0 }
0x1ef6   :  { %v2728_v1 = vmul.f32 %v2721_v20, %v2721_v20  ;;  %v2725_v2 = vadd.f32 %v2724_v0, %v2585_v58  ;;  %3860 = vmatpush3.bf16.xpose.msra.mxu1 %v3038_v16  ;;  %v4091_v58 = vld [vmem:[%s5268_s18 + $0x18] sm:$0xff]  }
0x1ef7   :  { %v2731_v13 = vmul.f32 %v2727_v35, %v2719_v32  ;;  %v2729_v3 = vmul.f32 %v2723_v61, %v2723_v61  ;;  %3861 = vmatprep.subr.bf16.mxu1 %v4312_v5  ;;  %v3044_v11 = vsel %vm464_vm1, %v4091_v58, 0  ;;  %v4094_v35 = vld [vmem:[%s5268_s18 + $0x30] sm:$0xff]   ;;  %v4095_v0 = vld [vmem:[%s5268_s18 + $0x38] sm:$0xff]  }
0x1ef8   :  { %v2732_v47 = vmul.f32 %v2728_v1, %v2721_v20  ;;  %v2730_v4 = vmul.f32 %v2725_v2, %v2725_v2  ;;  %v3056_v1 = vsel %vm464_vm1, %v4095_v0, 0 }
0x1ef9   :  { %v2735_v59 = vmul.f32 0.044715, %v2731_v13  ;;  %v2733_v6 = vmul.f32 %v2729_v3, %v2723_v61  ;;  %v2973_v13 = vld [vmem:[%s5266_s16 + $0x8] sm:$0xff] }
0x1efa   :  { %v2736_v7 = vmul.f32 0.044715, %v2732_v47  ;;  %v2734_v56 = vmul.f32 %v2730_v4, %v2725_v2  ;;  %v4096_v47 = vld [vmem:[%s5267_s17] sm:$0xff]   ;;  %v4097_v4 = vld [vmem:[%s5267_s17 + $0x8] sm:$0xff]  }
0x1efb   :  { %v2739_v8 = vadd.f32 %v2735_v59, %v2719_v32  ;;  %v2737_v57 = vmul.f32 0.044715, %v2733_v6  ;;  %v4098_v59 = vld [vmem:[%s5267_s17 + $0x10] sm:$0xff]   ;;  %v4099_v6 = vld [vmem:[%s5267_s17 + $0x18] sm:$0xff]  }
0x1efc   :  { %v2740_v9 = vadd.f32 %v2736_v7, %v2721_v20  ;;  %v2738_v10 = vmul.f32 0.044715, %v2734_v56  ;;  %v4100_v7 = vld [vmem:[%s5267_s17 + $0x20] sm:$0xff]  }
0x1efd   :  { %v2743_v12 = vmul.f32 0.7978846, %v2739_v8  ;;  %v2741_v14 = vadd.f32 %v2737_v57, %v2723_v61 }
0x1efe   :  { %v2744_v60 = vmul.f32 0.7978846, %v2740_v9  ;;  %v2742_v40 = vadd.f32 %v2738_v10, %v2725_v2 }
0x1eff   :  { %4192 = vtanh.f32 %v2743_v12  ;;  %v2745_v62 = vmul.f32 0.7978846, %v2741_v14 }
0x1f00   :  { %4194 = vtanh.f32 %v2744_v60  ;;  %v2746_v63 = vmul.f32 0.7978846, %v2742_v40  ;;  %v4101_v40 = vld [vmem:[%s5267_s17 + $0x28] sm:$0xff]  }
0x1f01   :  { %4196 = vtanh.f32 %v2745_v62  ;;  %v4102_v62 = vld [vmem:[%s5267_s17 + $0x30] sm:$0xff]  }
0x1f02   :  { %4198 = vtanh.f32 %v2746_v63  ;;  %v4103_v63 = vld [vmem:[%s5267_s17 + $0x38] sm:$0xff]  }
0x1f09   :  { %v4193_v15 = vpop.eup %4192 }
0x1f0a   :  { %v4195_v18 = vpop.eup %4194  ;;  %v2751_v25 = vadd.f32 1.0, %v4193_v15 }
0x1f0b   :  { %v4197_v26 = vpop.eup %4196  ;;  %v2752_v27 = vadd.f32 1.0, %v4195_v18 }
0x1f0c   :  { %v4199_v28 = vpop.eup %4198  ;;  %v2755_v55 = vmul.f32 0.5, %v2751_v25  ;;  %v2753_v29 = vadd.f32 1.0, %v4197_v26 }
0x1f0d   :  { %v2754_v30 = vadd.f32 1.0, %v4199_v28  ;;  %v2756_v54 = vmul.f32 0.5, %v2752_v27 }
0x1f0e   :  { %v2757_v48 = vmul.f32 0.5, %v2753_v29  ;;  %v2759_v33 = vmul.f32 %v2755_v55, %v2719_v32  ;;  %v4092_v32 = vld [vmem:[%s5268_s18 + $0x20] sm:$0xff]  }
0x1f0f   :  { %v2758_v31 = vmul.f32 0.5, %v2754_v30  ;;  %v2760_v37 = vmul.f32 %v2756_v54, %v2721_v20  ;;  %v3047_v34 = vsel %vm464_vm1, %v4092_v32, 0  ;;  %v4093_v20 = vld [vmem:[%s5268_s18 + $0x28] sm:$0xff]   ;;  %v3502_v29 = vld [vmem:[%s5264_s14 + $0x1] ss:$0 sm:$0xff] }
0x1f10   :  { %v2761_v36 = vmul.f32 %v2757_v48, %v2723_v61  ;;  %v3050_v24 = vsel %vm464_vm1, %v4093_v20, 0  ;;  %v3053_v61 = vsel %vm464_vm1, %v4094_v35, 0  ;;  %v3521_v35 = vld [vmem:[%s5269_s19] ss:$0 sm:$0xff] }
0x1f11   :  { %v2762_v49 = vmul.f32 %v2758_v31, %v2725_v2  ;;  %v2972_v2 = vld [vmem:[%s5266_s16] sm:$0xff] }
0x1f12   :  { %v2780_v22 = vpack.c.bf16 %v2761_v36, %v2759_v33  ;;  %v2974_v3 = vpack.c.bf16 %v2973_v13, %v2972_v2  ;;  %v3503_v31 = vld [vmem:[%s5265_s15 + $0x1] ss:$0 sm:$0xff] }
0x1f13   :  { %v2781_v23 = vpack.c.bf16 %v2762_v49, %v2760_v37 }
0x1f15   :  { %2902 = vmatprep.mubr.bf16.mxu0 %v2781_v23 }
0x1f16   :  { %2903 = vmatmul.mubr.bf16.vlgmr.msra.gmra.mrb[52].mxu0 %v2780_v22  ;;  %v3189_v22 = vand.u32 127, %v218_v52 }
0x1f18   :  { %vm3190_vm5 = vcmp.lt.s32.totalorder %v3189_v22, 9 }
0x1fe9   :  { %v2904_v50 = vpop.f32.mrb[52].mxu0 }
0x1fea   :  { %v2905_v53 = vadd.f32 %v3483_v41, %v2904_v50  ;;  %v2906_v42 = vpop.f32.mrb[53].mxu0 }
0x1feb   :  { %v2907_v17 = vpop.f32.mrb[54].mxu0 }
0x1fec   :  { %v2908_v43 = vadd.f32 %v3483_v41, %v2907_v17  ;;  %v2909_v21 = vpop.f32.mrb[55].mxu0  ;;  %v2911_v44 = vadd.f32 %v2905_v53, %v5132_v38  ;;  %v4090_v38 = vld [vmem:[%s5268_s18 + $0x10] sm:$0xff]  }
0x1fee   :  { %2917 = vadd.xlane.f32.xlu0 %v2911_v44  ;;  %v2912_v45 = vadd.f32 %v2908_v43, %v5134_v39  ;;  %v3041_v39 = vsel %vm464_vm1, %v4090_v38, 0 }
0x1fef   :  { %3862 = vmatpush3.bf16.xpose.msra.mxu1 %v3041_v39 }
0x1ff0   :  { %2919 = vadd.xlane.f32.xlu1 %v2912_v45  ;;  %3863 = vmatprep.subr.bf16.mxu1 %v4312_v5 }
0x1ff7   :  { %3864 = vmatpush3.bf16.xpose.msra.mxu1 %v3044_v11 }
0x1ff8   :  { %3865 = vmatprep.subr.bf16.mxu1 %v4312_v5 }
0x1fff   :  { %3866 = vmatpush3.bf16.xpose.msra.mxu1 %v3047_v34 }
0x2000   :  { %3867 = vmatprep.subr.bf16.mxu1 %v4312_v5 }
0x2007   :  { %3868 = vmatpush3.bf16.xpose.msra.mxu1 %v3050_v24 }
0x2008   :  { %3869 = vmatprep.subr.bf16.mxu1 %v4312_v5 }
0x200f   :  { %3870 = vmatpush3.bf16.xpose.msra.mxu1 %v3053_v61 }
0x2010   :  { %3871 = vmatprep.subr.bf16.mxu1 %v4312_v5 }
0x2017   :  { %3872 = vmatpush3.bf16.xpose.msra.mxu1 %v3056_v1  ;;  %v3522_v1 = vld [vmem:[%s5292_s25] ss:$0 sm:$0xff] }
0x2018   :  { %3877 = vmatprep.subr.bf16.mxu1 %v4312_v5 }
0x201e   :  { %3874 = vmatmul.mubr.msk.bf16.vlgmr.msra.gmra.mrb[48].mxu1 %vm464_vm1, %v2974_v3 }
0x201f   :  { %3878 = vmatpush3.bf16.xpose.msra.mxu1 %v4096_v47  ;;  %3893 = vmatprep.mubr.msk.bf16.mxu1 %vm4313_vm0, %v4312_v5 }
0x2020   :  { %3879 = vmatprep.subr.bf16.mxu1 %v4312_v5 }
0x2027   :  { %3880 = vmatpush3.bf16.xpose.msra.mxu1 %v4097_v4 }
0x2028   :  { %3881 = vmatprep.subr.bf16.mxu1 %v4312_v5 }
0x202f   :  { %3882 = vmatpush3.bf16.xpose.msra.mxu1 %v4098_v59 }
0x2030   :  { %3883 = vmatprep.subr.bf16.mxu1 %v4312_v5 }
0x2037   :  { %3884 = vmatpush3.bf16.xpose.msra.mxu1 %v4099_v6 }
0x2038   :  { %3885 = vmatprep.subr.bf16.mxu1 %v4312_v5 }
0x203f   :  { %3886 = vmatpush3.bf16.xpose.msra.mxu1 %v4100_v7 }
0x2040   :  { %3887 = vmatprep.subr.bf16.mxu1 %v4312_v5 }
0x2047   :  { %3888 = vmatpush3.bf16.xpose.msra.mxu1 %v4101_v40 }
0x2048   :  { %3889 = vmatprep.subr.bf16.mxu1 %v4312_v5 }
0x204f   :  { %3890 = vmatpush3.bf16.xpose.msra.mxu1 %v4102_v62 }
0x2050   :  { %3891 = vmatprep.subr.bf16.mxu1 %v4312_v5 }
0x2057   :  { %3892 = vmatpush3.bf16.xpose.msra.mxu1 %v4103_v63 }
0x207b   :  { %v2918_v56 = vpop.xlane.xlu0 %2917 }
0x207c   :  { %v2921_v8 = vmul.f32 0.0078125, %v2918_v56 }
0x207d   :  { %v2920_v57 = vpop.xlane.xlu1 %2919 }
0x207e   :  { %v2923_v9 = vsub.f32 %v2911_v44, %v2921_v8  ;;  %v2922_v10 = vmul.f32 0.0078125, %v2920_v57 }
0x2080   :  { %v2924_v12 = vsub.f32 %v2912_v45, %v2922_v10  ;;  %v2925_v14 = vmul.f32 %v2923_v9, %v2923_v9 }
0x2082   :  { %2927 = vadd.xlane.f32.xlu0 %v2925_v14  ;;  %v2926_v60 = vmul.f32 %v2924_v12, %v2924_v12 }
0x2084   :  { %2929 = vadd.xlane.f32.xlu1 %v2926_v60 }
0x210f   :  { %v2928_v15 = vpop.xlane.xlu0 %2927 }
0x2110   :  { %v2931_v18 = vmul.f32 0.0078125, %v2928_v15 }
0x2111   :  { %v2930_v25 = vpop.xlane.xlu1 %2929 }
0x2112   :  { %v2933_v26 = vadd.f32 1e-05, %v2931_v18  ;;  %v2932_v27 = vmul.f32 0.0078125, %v2930_v25 }
0x2114   :  { %4200 = vrsqrt.f32 %v2933_v26  ;;  %v2934_v28 = vadd.f32 1e-05, %v2932_v27 }
0x2116   :  { %4202 = vrsqrt.f32 %v2934_v28 }
0x211e   :  { %v4201_v55 = vpop.eup %4200 }
0x211f   :  { %v2937_v30 = vmul.f32 %v4201_v55, %v2923_v9 }
0x2120   :  { %v4203_v5 = vpop.eup %4202 }
0x2121   :  { %v2938_v54 = vmul.f32 %v4203_v5, %v2924_v12  ;;  %v2945_v48 = vmul.f32 %v3502_v29, %v2937_v30 }
0x2123   :  { %v2946_v33 = vmul.f32 %v3502_v29, %v2938_v54  ;;  %v2953_v36 = vadd.f32 %v3503_v31, %v2945_v48 }
0x2125   :  { %v2954_v37 = vadd.f32 %v3503_v31, %v2946_v33 }
0x2127   :  { %v2955_v49 = vpack.c.bf16 %v2954_v37, %v2953_v36 }
0x2129   :  { %3894 = vmatmul.mubr.bf16.vlgmr.msra.gmra.mrb[48].mxu1 %v2955_v49 }
0x21fc   :  { %v3181_v23 = vpop.f32.mrb[48].mxu1 }
0x21fd   :  { %v3895_v41 = vpop.f32.mrb[49].mxu1  ;;  %v3191_v50 = vsel %vm3190_vm5, %v3181_v23, 0.0 }
0x21fe   :  { %3193 = vadd.xlane.f32.xlu0 %v3191_v50  ;;  %v3184_v53 = vpop.f32.mrb[50].mxu1 }
0x21ff   :  { %v3896_v42 = vpop.f32.mrb[51].mxu1  ;;  %v3192_v17 = vsel %vm3190_vm5, %v3184_v53, 0.0 }
0x2200   :  { %3195 = vadd.xlane.f32.xlu1 %v3192_v17 }
0x228b   :  { %v3194_v43 = vpop.xlane.xlu0 %3193 }
0x228c   :  { %v3197_v21 = vmul.f32 0.11111111, %v3194_v43 }
0x228d   :  { %v3196_v44 = vpop.xlane.xlu1 %3195 }
0x228e   :  { %v3199_v45 = vsub.f32 %v3181_v23, %v3197_v21  ;;  %v3198_v19 = vmul.f32 0.11111111, %v3196_v44 }
0x2290   :  { %v3200_v46 = vsub.f32 %v3184_v53, %v3198_v19  ;;  %v3201_v51 = vsel %vm3190_vm5, %v3199_v45, 0.0 }
0x2291   :  { %v3203_v52 = vmul.f32 %v3201_v51, %v3201_v51 }
0x2292   :  { %v3202_v16 = vsel %vm3190_vm5, %v3200_v46, 0.0 }
0x2293   :  { %3205 = vadd.xlane.f32.xlu0 %v3203_v52  ;;  %v3204_v38 = vmul.f32 %v3202_v16, %v3202_v16 }
0x2295   :  { %3207 = vadd.xlane.f32.xlu1 %v3204_v38 }
0x2320   :  { %v3206_v39 = vpop.xlane.xlu0 %3205 }
0x2321   :  { %v3209_v58 = vmul.f32 0.11111111, %v3206_v39 }
0x2322   :  { %v3208_v11 = vpop.xlane.xlu1 %3207 }
0x2323   :  { %v3211_v32 = vadd.f32 1e-05, %v3209_v58  ;;  %v3210_v34 = vmul.f32 0.11111111, %v3208_v11 }
0x2325   :  { %4204 = vrsqrt.f32 %v3211_v32  ;;  %v3212_v20 = vadd.f32 1e-05, %v3210_v34 }
0x2327   :  { %4206 = vrsqrt.f32 %v3212_v20 }
0x232f   :  { %v4205_v24 = vpop.eup %4204 }
0x2330   :  { %v3215_v61 = vmul.f32 %v4205_v24, %v3199_v45 }
0x2331   :  { %v4207_v0 = vpop.eup %4206 }
0x2332   :  { %v3224_v2 = vmul.f32 %v3521_v35, %v3215_v61  ;;  %v3216_v13 = vmul.f32 %v4207_v0, %v3200_v46 }
0x2334   :  { %v3233_v3 = vadd.f32 %v3522_v1, %v3224_v2  ;;  %v3225_v47 = vmul.f32 %v3521_v35, %v3216_v13 }
0x2336   :  { %3235 = vst [vmem:[%s5293_s1] sm:$0xff] %v3233_v3  ;;  %v3234_v4 = vadd.f32 %v3522_v1, %v3225_v47 }
0x2338   :  { %3236 = vst [vmem:[%s5293_s1 + $0x8] sm:$0xff] %v3234_v4 }
0x2339   :  { %3241 = vsyncpa [#allocation3], 1 }
0x233a   :  { %3242 = vsyncpa [#allocation5], 1 }
0x233b   :  { %3243 = vsyncpa [#allocation8], 1 }

</bundles_post_ra>
